<compile_context>
chip_gen: v6e
topology: v6e:2x2x1
jax: 0.10.0
libtpu: 0.0.40
codegen_flags: <defaults>
</compile_context>

<pallas_src>
import numpy as np
import jax
import jax.numpy as jnp
from jax.experimental import pallas as pl
from jax.experimental.pallas import tpu as pltpu

# ---- module hyper-parameters (small, consistent with the forward) -----------
BATCH = 2
IN_C, H, W = 3, 16, 16
FLAT = IN_C * H * W            # 768
IN_FEATURES = 4096             # fixed by the module (`in_features = 4096`)
NUM_CLASSES = 16
NUM_MAKES = 8
NUM_MODELS = 12
NUM_SUBMODELS = 10
NUM_GENERATION = 6
TOTAL = NUM_CLASSES + NUM_MAKES + NUM_MODELS + NUM_SUBMODELS + NUM_GENERATION  # 52

# head packing order (matches torch.cat order in forward):
#   [class_fc_one | make | model | submodel | generation]
_OFF_CLASS = 0
_OFF_MAKE = _OFF_CLASS + NUM_CLASSES
_OFF_MODEL = _OFF_MAKE + NUM_MAKES
_OFF_SUB = _OFF_MODEL + NUM_MODELS
_OFF_GEN = _OFF_SUB + NUM_SUBMODELS

# lane padding for the fused/packed tensors
HEAD_PAD = 64                  # TOTAL=52 -> 64 lanes (concat zone)
FC_PAD = 64                    # NUM_CLASSES=16 -> 64 lanes (fc zone)
OUT_PAD = HEAD_PAD + FC_PAD    # single lane-dense [B, 128] output
TILE_N = 2048                  # feature-axis tile (4096 / 2048 = 2 grid steps)
N_TILES = IN_FEATURES // TILE_N


def aux_kernel(x_ref, wb_ref, bb_ref, wh_ref, bh_ref, wf_ref, bf_ref,
               out_ref, acc_ref):
    n = pl.program_id(0)

    @pl.when(n == 0)
    def _init():
        acc_ref[...] = jnp.zeros_like(acc_ref)

    # base stand-in, one feature tile: ReLU(x @ Wb[:, tile] + bb[tile]).
    # Dropout(0.5) is identity at eval.  bf16 x bf16 -> f32 accumulation.
    feat = jnp.dot(x_ref[...], wb_ref[...], preferred_element_type=jnp.float32)
    feat = jnp.maximum(feat + bb_ref[...], 0.0)

    # five auxiliary heads fused into one matmul, accumulated over feature tiles:
    #   concat += feat_tile @ Wh[tile, :]
    acc_ref[...] += jnp.dot(feat.astype(jnp.bfloat16), wh_ref[...],
                            preferred_element_type=jnp.float32)

    @pl.when(n == pl.num_programs(0) - 1)
    def _finalize():
        concat = acc_ref[...] + bh_ref[...]                         # [B, HEAD_PAD]
        fc = jnp.dot(concat.astype(jnp.bfloat16), wf_ref[...],
                     preferred_element_type=jnp.float32) + bf_ref[...]  # [B, FC_PAD]
        # single lane-dense (128-wide) store; sliced apart in the wrapper
        out_ref[...] = jnp.concatenate([concat, fc], axis=-1)


def auxillary_learning_a(x, params):
    """x: [B, IN_C, H, W] float32 (NCHW). Returns (fc, make, model, submodel, generation)."""
    b = x.shape[0]
    x_flat = x.reshape(b, -1).astype(jnp.bfloat16)  # row-major flatten == torch .view(b, -1)

    (w_base, b_base, w_heads, b_heads, w_final, b_final) = params

    packed = pl.pallas_call(
        aux_kernel,
        out_shape=jax.ShapeDtypeStruct((b, OUT_PAD), jnp.float32),
        grid_spec=pltpu.PrefetchScalarGridSpec(
            num_scalar_prefetch=0,
            grid=(N_TILES,),
            in_specs=[
                pl.BlockSpec((b, FLAT), lambda n: (0, 0)),          # x (resident)
                pl.BlockSpec((FLAT, TILE_N), lambda n: (0, n)),     # w_base tile (bf16)
                pl.BlockSpec((1, TILE_N), lambda n: (0, n)),        # b_base tile
                pl.BlockSpec((TILE_N, HEAD_PAD), lambda n: (n, 0)), # packed head W tile (bf16)
                pl.BlockSpec((1, HEAD_PAD), lambda n: (0, 0)),      # packed head bias
                pl.BlockSpec((HEAD_PAD, FC_PAD), lambda n: (0, 0)), # class_fc W (padded)
                pl.BlockSpec((1, FC_PAD), lambda n: (0, 0)),        # class_fc bias (padded)
            ],
            out_specs=pl.BlockSpec((b, OUT_PAD), lambda n: (0, 0)),
            scratch_shapes=[pltpu.VMEM((b, HEAD_PAD), jnp.float32)],
        ),
        compiler_params=pltpu.CompilerParams(
            dimension_semantics=("arbitrary",),
            vmem_limit_bytes=16 * 1024 * 1024,
        ),
    )(x_flat, w_base, b_base, w_heads, b_heads, w_final, b_final)

    fc = packed[:, HEAD_PAD:HEAD_PAD + NUM_CLASSES]
    make = packed[:, _OFF_MAKE:_OFF_MAKE + NUM_MAKES]
    model = packed[:, _OFF_MODEL:_OFF_MODEL + NUM_MODELS]
    sub = packed[:, _OFF_SUB:_OFF_SUB + NUM_SUBMODELS]
    gen = packed[:, _OFF_GEN:_OFF_GEN + NUM_GENERATION]
    return fc, make, model, sub, gen


def init_params(key):
    """Deterministic init (PyTorch-style uniform(-1/sqrt(fan_in), +1/sqrt(fan_in))).

    The two HBM-dominant weight matrices are stored in bf16 (f32 accumulation is
    preserved in-kernel).  Head / final weights are zero-padded to lane-friendly
    widths; the zero padding is mathematically inert.
    """
    ks = jax.random.split(key, 6)

    def lin(kw, kb, fan_in, fan_out):
        bound = 1.0 / np.sqrt(fan_in)
        w = jax.random.uniform(kw, (fan_in, fan_out), jnp.float32, -bound, bound)
        b = jax.random.uniform(kb, (1, fan_out), jnp.float32, -bound, bound)
        return w, b

    # base stand-in Linear(FLAT -> 4096)
    w_base, b_base = lin(ks[0], ks[1], FLAT, IN_FEATURES)
    # packed head weights [4096, TOTAL] == hstack of the 5 head Linears
    w_heads, b_heads = lin(ks[2], ks[3], IN_FEATURES, TOTAL)
    # final class_fc: Linear(TOTAL -> NUM_CLASSES)
    w_final, b_final = lin(ks[4], ks[5], TOTAL, NUM_CLASSES)

    wb = w_base.astype(jnp.bfloat16)
    wh = jnp.zeros((IN_FEATURES, HEAD_PAD), jnp.bfloat16)
    wh = wh.at[:, :TOTAL].set(w_heads.astype(jnp.bfloat16))
    bh = jnp.zeros((1, HEAD_PAD), jnp.float32).at[:, :TOTAL].set(b_heads)
    wf = jnp.zeros((HEAD_PAD, FC_PAD), jnp.bfloat16)
    wf = wf.at[:TOTAL, :NUM_CLASSES].set(w_final.astype(jnp.bfloat16))
    bf = jnp.zeros((1, FC_PAD), jnp.float32).at[:, :NUM_CLASSES].set(b_final)
    return (wb, b_base, wh, bh, wf, bf)


def reference(x, params):
    """Pure-JAX reference using the same (bf16-stored) parameters / precision."""
    (wb, bb, wh, bh, wf, bf) = params
    x_flat = x.reshape(x.shape[0], -1).astype(jnp.bfloat16)
    feat = jnp.dot(x_flat, wb, preferred_element_type=jnp.float32) + bb
    feat = jnp.maximum(feat, 0.0)
    concat = jnp.dot(feat.astype(jnp.bfloat16), wh[:, :TOTAL],
                     preferred_element_type=jnp.float32) + bh[:, :TOTAL]
    fc = jnp.dot(concat.astype(jnp.bfloat16), wf[:TOTAL, :NUM_CLASSES],
                 preferred_element_type=jnp.float32) + bf[:, :NUM_CLASSES]
    make = concat[:, _OFF_MAKE:_OFF_MAKE + NUM_MAKES]
    model = concat[:, _OFF_MODEL:_OFF_MODEL + NUM_MODELS]
    sub = concat[:, _OFF_SUB:_OFF_SUB + NUM_SUBMODELS]
    gen = concat[:, _OFF_GEN:_OFF_GEN + NUM_GENERATION]
    return fc, make, model, sub, gen


if __name__ == "__main__":
    root = jax.random.PRNGKey(0)
    k_params, k_x = jax.random.split(root, 2)
    params = init_params(k_params)
    x = jax.random.normal(k_x, (BATCH, IN_C, H, W), jnp.float32)

    outs = jax.block_until_ready(auxillary_learning_a(x, params))
    refs = jax.block_until_ready(reference(x, params))

    for o, r in zip(outs, refs):
        assert o.shape == r.shape and o.dtype == r.dtype
        np.testing.assert_allclose(np.asarray(o), np.asarray(r), rtol=1e-3, atol=1e-3)

    print("KERNEL_OK")
</pallas_src>

<mosaic_0001>
module attributes {stable_mosaic.version = 11 : i64} {
  func.func @aux_kernel(%arg0: i32, %arg1: memref<2x768xbf16, #tpu.memory_space<vmem>>, %arg2: memref<768x2048xbf16, #tpu.memory_space<vmem>>, %arg3: memref<1x2048xf32, #tpu.memory_space<vmem>>, %arg4: memref<2048x64xbf16, #tpu.memory_space<vmem>>, %arg5: memref<1x64xf32, #tpu.memory_space<vmem>>, %arg6: memref<64x64xbf16, #tpu.memory_space<vmem>>, %arg7: memref<1x64xf32, #tpu.memory_space<vmem>>, %arg8: memref<2x128xf32, #tpu.memory_space<vmem>>, %arg9: memref<2x64xf32, #tpu.memory_space<vmem>>) attributes {dimension_semantics = [#tpu.dimension_semantics<arbitrary>], iteration_bounds = array<i64: 2>, scalar_prefetch = 0 : i64, scratch_operands = 1 : i64, tpu.core_type = #tpu.core_type<tc>, window_params = [{pipeline_mode = #tpu.pipeline_mode<synchronous>, transform_indices = @transform_0, window_bounds = array<i64: 2, 768>}, {transform_indices = @transform_1, window_bounds = array<i64: 768, 2048>}, {transform_indices = @transform_2, window_bounds = array<i64: 1, 2048>}, {transform_indices = @transform_3, window_bounds = array<i64: 2048, 64>}, {pipeline_mode = #tpu.pipeline_mode<synchronous>, transform_indices = @transform_4, window_bounds = array<i64: 1, 64>}, {pipeline_mode = #tpu.pipeline_mode<synchronous>, transform_indices = @transform_5, window_bounds = array<i64: 64, 64>}, {pipeline_mode = #tpu.pipeline_mode<synchronous>, transform_indices = @transform_6, window_bounds = array<i64: 1, 64>}, {pipeline_mode = #tpu.pipeline_mode<synchronous>, transform_indices = @transform_7, window_bounds = array<i64: 2, 128>}]} {
    %c0_i32 = arith.constant 0 : i32
    %0 = arith.cmpi eq, %arg0, %c0_i32 : i32
    %1 = arith.extui %0 : i1 to i32
    %c0_i32_0 = arith.constant 0 : i32
    %2 = arith.cmpi ne, %1, %c0_i32_0 : i32
    scf.if %2 {
      %cst_15 = arith.constant 0.000000e+00 : f32
      %20 = vector.broadcast %cst_15 : f32 to vector<2x64xf32>
      %c0_16 = arith.constant 0 : index
      %c0_17 = arith.constant 0 : index
      %21 = vector.load %arg9[%c0_16, %c0_17] : memref<2x64xf32, #tpu.memory_space<vmem>>, vector<2x64xf32>
      tpu.vector_store %arg9[%c0_16, %c0_17], %20 {strides = array<i32>} : memref<2x64xf32, #tpu.memory_space<vmem>>, vector<2x64xf32>,
    } else {
    }
    %c0 = arith.constant 0 : index
    %c0_1 = arith.constant 0 : index
    %3 = vector.load %arg1[%c0, %c0_1] : memref<2x768xbf16, #tpu.memory_space<vmem>>, vector<2x768xbf16>
    %c0_2 = arith.constant 0 : index
    %c0_3 = arith.constant 0 : index
    %4 = vector.load %arg2[%c0_2, %c0_3] : memref<768x2048xbf16, #tpu.memory_space<vmem>>, vector<768x2048xbf16>
    %cst = arith.constant dense<0.000000e+00> : vector<2x2048xf32>
    %5 = tpu.matmul %3, %4, %cst {dimension_numbers = #tpu.dot_dimension_numbers<[1], [0], [0], [1], [0, 0, 1, 1], [], []>} : vector<2x768xbf16>, vector<768x2048xbf16>, vector<2x2048xf32> -> vector<2x2048xf32>
    %c0_4 = arith.constant 0 : index
    %c0_5 = arith.constant 0 : index
    %6 = vector.load %arg3[%c0_4, %c0_5] : memref<1x2048xf32, #tpu.memory_space<vmem>>, vector<1x2048xf32>
    %7 = vector.broadcast %6 : vector<1x2048xf32> to vector<2x2048xf32>
    %8 = arith.addf %5, %7 : vector<2x2048xf32>
    %cst_6 = arith.constant 0.000000e+00 : f32
    %9 = vector.broadcast %cst_6 : f32 to vector<2x2048xf32>
    %10 = arith.maximumf %8, %9 : vector<2x2048xf32>
    %c0_7 = arith.constant 0 : index
    %c0_8 = arith.constant 0 : index
    %11 = vector.load %arg9[%c0_7, %c0_8] : memref<2x64xf32, #tpu.memory_space<vmem>>, vector<2x64xf32>
    %12 = arith.truncf %10 : vector<2x2048xf32> to vector<2x2048xbf16>
    %c0_9 = arith.constant 0 : index
    %c0_10 = arith.constant 0 : index
    %13 = vector.load %arg4[%c0_9, %c0_10] : memref<2048x64xbf16, #tpu.memory_space<vmem>>, vector<2048x64xbf16>
    %cst_11 = arith.constant dense<0.000000e+00> : vector<2x64xf32>
    %14 = tpu.matmul %12, %13, %cst_11 {dimension_numbers = #tpu.dot_dimension_numbers<[1], [0], [0], [1], [0, 0, 1, 1], [], []>} : vector<2x2048xbf16>, vector<2048x64xbf16>, vector<2x64xf32> -> vector<2x64xf32>
    %15 = arith.addf %11, %14 : vector<2x64xf32>
    %c0_12 = arith.constant 0 : index
    %c0_13 = arith.constant 0 : index
    %16 = vector.load %arg9[%c0_12, %c0_13] : memref<2x64xf32, #tpu.memory_space<vmem>>, vector<2x64xf32>
    tpu.vector_store %arg9[%c0_12, %c0_13], %15 {strides = array<i32>} : memref<2x64xf32, #tpu.memory_space<vmem>>, vector<2x64xf32>,
    %c1_i32 = arith.constant 1 : i32
    %17 = arith.cmpi eq, %arg0, %c1_i32 : i32
    %18 = arith.extui %17 : i1 to i32
    %c0_i32_14 = arith.constant 0 : i32
    %19 = arith.cmpi ne, %18, %c0_i32_14 : i32
    scf.if %19 {
      %c0_15 = arith.constant 0 : index
      %c0_16 = arith.constant 0 : index
      %20 = vector.load %arg9[%c0_15, %c0_16] : memref<2x64xf32, #tpu.memory_space<vmem>>, vector<2x64xf32>
      %c0_17 = arith.constant 0 : index
      %c0_18 = arith.constant 0 : index
      %21 = vector.load %arg5[%c0_17, %c0_18] : memref<1x64xf32, #tpu.memory_space<vmem>>, vector<1x64xf32>
      %22 = vector.broadcast %21 : vector<1x64xf32> to vector<2x64xf32>
      %23 = arith.addf %20, %22 : vector<2x64xf32>
      %24 = arith.truncf %23 : vector<2x64xf32> to vector<2x64xbf16>
      %c0_19 = arith.constant 0 : index
      %c0_20 = arith.constant 0 : index
      %25 = vector.load %arg6[%c0_19, %c0_20] : memref<64x64xbf16, #tpu.memory_space<vmem>>, vector<64x64xbf16>
      %cst_21 = arith.constant dense<0.000000e+00> : vector<2x64xf32>
      %26 = tpu.matmul %24, %25, %cst_21 {dimension_numbers = #tpu.dot_dimension_numbers<[1], [0], [0], [1], [0, 0, 1, 1], [], []>} : vector<2x64xbf16>, vector<64x64xbf16>, vector<2x64xf32> -> vector<2x64xf32>
      %c0_22 = arith.constant 0 : index
      %c0_23 = arith.constant 0 : index
      %27 = vector.load %arg7[%c0_22, %c0_23] : memref<1x64xf32, #tpu.memory_space<vmem>>, vector<1x64xf32>
      %28 = vector.broadcast %27 : vector<1x64xf32> to vector<2x64xf32>
      %29 = arith.addf %26, %28 : vector<2x64xf32>
      %30 = tpu.concatenate %23, %29 in 1 : vector<2x64xf32>, vector<2x64xf32> -> vector<2x128xf32>
      %c0_24 = arith.constant 0 : index
      %c0_25 = arith.constant 0 : index
      %31 = vector.load %arg8[%c0_24, %c0_25] : memref<2x128xf32, #tpu.memory_space<vmem>>, vector<2x128xf32>
      tpu.vector_store %arg8[%c0_24, %c0_25], %30 {strides = array<i32>} : memref<2x128xf32, #tpu.memory_space<vmem>>, vector<2x128xf32>,
    } else {
    }
    return
  }
  func.func @transform_0(%arg0: i32) -> (i32, i32) {
    %c0_i32 = arith.constant 0 : i32
    %c0_i32_0 = arith.constant 0 : i32
    %c0_i32_1 = arith.constant 0 : i32
    return %c0_i32, %c0_i32_0 : i32, i32
  }
  func.func @transform_1(%arg0: i32) -> (i32, i32) {
    %c0_i32 = arith.constant 0 : i32
    %c0_i32_0 = arith.constant 0 : i32
    return %c0_i32, %arg0 : i32, i32
  }
  func.func @transform_2(%arg0: i32) -> (i32, i32) {
    %c0_i32 = arith.constant 0 : i32
    %c0_i32_0 = arith.constant 0 : i32
    return %c0_i32, %arg0 : i32, i32
  }
  func.func @transform_3(%arg0: i32) -> (i32, i32) {
    %c0_i32 = arith.constant 0 : i32
    %c0_i32_0 = arith.constant 0 : i32
    return %arg0, %c0_i32 : i32, i32
  }
  func.func @transform_4(%arg0: i32) -> (i32, i32) {
    %c0_i32 = arith.constant 0 : i32
    %c0_i32_0 = arith.constant 0 : i32
    %c0_i32_1 = arith.constant 0 : i32
    return %c0_i32, %c0_i32_0 : i32, i32
  }
  func.func @transform_5(%arg0: i32) -> (i32, i32) {
    %c0_i32 = arith.constant 0 : i32
    %c0_i32_0 = arith.constant 0 : i32
    %c0_i32_1 = arith.constant 0 : i32
    return %c0_i32, %c0_i32_0 : i32, i32
  }
  func.func @transform_6(%arg0: i32) -> (i32, i32) {
    %c0_i32 = arith.constant 0 : i32
    %c0_i32_0 = arith.constant 0 : i32
    %c0_i32_1 = arith.constant 0 : i32
    return %c0_i32, %c0_i32_0 : i32, i32
  }
  func.func @transform_7(%arg0: i32) -> (i32, i32) {
    %c0_i32 = arith.constant 0 : i32
    %c0_i32_0 = arith.constant 0 : i32
    %c0_i32_1 = arith.constant 0 : i32
    return %c0_i32, %c0_i32_0 : i32, i32
  }
}

</mosaic_0001>

<bundles_post_ra>
// kernel: tpu_custom_call.1
= control target key start
LH: loop header
LB: loop body
LE: loop exit
PB: predicated region body
PF: predicated region fallthrough
CT: control target
= control target key end

     0   :  { %12 = vsyncpa [#allocation4], 0  ;;  %s10757_s0 = inlined_call_operand.hbm [shape: bf16[2,768], index: 0, kind: input, shape index: {}]   ;;  %s10758_s1 = inlined_call_operand.hbm [shape: bf16[768,4096], index: 1, kind: input, shape index: {}]   ;;  %s10759_s2 = inlined_call_operand.hbm [shape: f32[1,4096], index: 2, kind: input, shape index: {}]   ;;  %s10760_s3 = inlined_call_operand.vmem [shape: bf16[4096,64], index: 3, kind: input, shape index: {}]   ;;  %s10761_s4 = inlined_call_operand.hbm [shape: f32[1,64], index: 4, kind: input, shape index: {}]   ;;  %s10762_s5 = inlined_call_operand.hbm [shape: bf16[64,64], index: 5, kind: input, shape index: {}]   ;;  %s10763_s6 = inlined_call_operand.hbm [shape: f32[1,64], index: 6, kind: input, shape index: {}]   ;;  %s10764_s7 = inlined_call_operand.hbm [shape: f32[2,128], index: 7, kind: output, shape index: {}]  }
   0x1   :  { %13 = vsyncpa [#allocation7], 0 }
   0x2   :  { %15 = vsyncpa [#allocation7 + $0x1], 0 }
   0x3   :  { %16 = vsyncpa [#allocation10], 0 }
   0x4   :  { %17 = vsyncpa [#allocation13], 0 }
   0x5   :  { %18 = vsyncpa [#allocation5], 0  ;;  %s9402_s24 = smov 0   ;;  %s9404_s25 = smov 0  }
   0x6   :  { %s9406_s26 = smov 0   ;;  %s9408_s27 = smov 0  }
   0x7 LB: > { %s9421_s28 = sadd.s32 4294967295, %s9344_s27   ;;  %p65_p0 = scmp.ne.s32.totalorder %s9336_s25, %s9332_s24  ;;  %s9344_s27 = sphi %s9408_s27, %s10792_s27   ;;  %s9340_s26 = sphi %s9406_s26, %s10791_s26   ;;  %s9336_s25 = sphi %s9404_s25, %s10790_s25   ;;  %s9332_s24 = sphi %s9402_s24, %s10789_s24  }
   0x8   : > { %p10765_p1 = scmp.eq.s32.totalorder %s9421_s28, 0  ;;  %p7749_p2 = scmp.ge.s32.totalorder %s9344_s27, 1 }
   0x9   : > { %p212_p3 = scmp.lt.s32.totalorder %s9344_s27, 3  ;;  %s9346_s8 = smov [#allocation9]  }
   0xa   : > { %p9430_p5 = por %p10765_p1, %p65_p0  ;;  %s236_s9 = sshll.u32 %s9346_s8, 4  ;;  %s237_s9 = int_to_ptr.vmem [resolvable:$true] %s236_s9 }
   0xb   : > { %p9434_p6 = pnand %p7749_p2, %p212_p3  ;;  %s9441_s10 = sadd.s32 1, %s9344_s27  }
   0xc   : > { %s10770_s29 = scalar_select %p9430_p5, 1, 0 }
   0xd   : > { %s10771_s30 = scalar_select %p9434_p6, 1, 0 }
   0xe   : > { %p8898_p7 = pneg %p9434_p6  ;;  %s49_s12 = ssub.s32 %s9344_s27, %s9441_s10 }
   0xf   : > { %p9451_p9 = scmp.eq.s32.totalorder %s49_s12, 0  ;;  %s52_s14 = sadd.s32 1, %s9340_s26 }
  0x10   : > { %p9445_p8 = pnand %p8898_p7, %p10765_p1  ;;  %p59_p10 = scmp.ne.s32.totalorder %s9340_s26, %s9336_s25 }
  0x11   : > { %s9121_s15 = scalar_lea.vmem %s237_s9, 16  ;;  %s9128_s16 = scalar_lea.vmem %s237_s9, 32 }
  0x12   : > { %p10766_p11 = pneg %p9445_p8  ;;  %p9122_p12 = scmp.ne.s32.totalorder %s237_s9, %s9121_s15 }
  0x13   : > { %p9129_p2 = scmp.lt.s32.totalorder %s237_s9, %s237_s9  ;;  %p9130_p3 = scmp.lt.s32.totalorder %s9128_s16, %s9121_s15 }
  0x14   : > { %p9124_p13 = pnand %p9122_p12, %p10766_p11 }
  0x15   : > { %p9131_p7 = por %p9130_p3, %p9129_p2 }
  0x16   : > { %p9125_p0 = pneg %p9124_p13 }
  0x18   : > { %p9132_p4 = pnand %p9131_p7, %p9125_p0 }
  0x1a   : > { %9135 = shalt.err (!%p9132_p4)
}
  0x1b   : > { %8904 = dma.hbm_to_vmem [thread:$0]  (!%p9445_p8), %s10761_s4, 16, %s237_s9, [#allocation10]  }
  0x1c   : > { %s9471_s19 = scalar_select %p9451_p9, %s9340_s26, %s52_s14  }
  0x1d   : > { %p60_p4 = scmp.eq.s32.totalorder %s9344_s27, 0  ;;  %p8922_p12 = scmp.lt.s32.totalorder %s9344_s27, 2 }
  0x1e   : > { %s271_s20 = sand.u32 1, %s9344_s27   ;;  %s273_s21 = sand.u32 1, %s9340_s26  }
  0x1f   : > { %p61_p13 = por %p60_p4, %p59_p10  ;;  %s8677_s22 = sshll.u32 %s9344_s27, 10 }
  0x20   : > { %s8872_s23 = smul.u32 6144, %s273_s21  ;;  %s9486_s12 = scalar_lea.hbm %s10758_s1, %s8677_s22 }
  0x21   : > { %p9488_p0 = pnand %p8922_p12, %p61_p13  ;;  %s9494_s15 = scalar_lea.sflag [#allocation7], %s271_s20 }
  0x22   : > { %s275_s13 = scalar_lea.vmem [#allocation6], %s8872_s23  ;;  %s9136_s16 = scalar_lea.hbm %s9486_s12, 98304 }
  0x23   : > { %s282_s14 = sshll.u32 %s275_s13, 4  ;;  %p9137_p9 = scmp.ne.s32.totalorder %s9486_s12, %s9136_s16  ;;  %s9492_s14 = int_to_ptr.vmem [resolvable:$true] %s282_s14 }
  0x24   : > { %p10769_p10 = pneg %p9488_p0  ;;  %s9141_s22 = scalar_lea.hbm %s10758_s1, 196608 }
  0x25   : > { %p9142_p7 = scmp.lt.s32.totalorder %s9486_s12, %s10758_s1  ;;  %p9143_p4 = scmp.lt.s32.totalorder %s9141_s22, %s9136_s16 }
  0x26   : > { %p9139_p2 = pnand %p10769_p10, %p9137_p9 }
  0x27   : > { %p9144_p12 = por %p9143_p4, %p9142_p7 }
  0x28   : > { %p9140_p3 = pneg %p9139_p2 }
  0x2a   : > { %p9145_p13 = pnand %p9144_p12, %p9140_p3 }
  0x2c   : > { %9148 = shalt.err (!%p9145_p13)
}
  0x2d   : > { %s9149_s20 = scalar_lea.vmem %s9492_s14, 98304  ;;  %s9347_s23 = smov [#allocation6]  }
  0x2e   : > { %p9150_p1 = scmp.ne.s32.totalorder %s9492_s14, %s9149_s20  ;;  %s9154_s13 = sshll.u32 %s9347_s23, 4  ;;  %s9155_s13 = int_to_ptr.vmem [resolvable:$false] %s9154_s13 }
  0x2f   : > { %s9156_s17 = scalar_lea.vmem %s9155_s13, 196608  ;;  %p9157_p11 = scmp.lt.s32.totalorder %s9492_s14, %s9155_s13 }
  0x30   : > { %p9152_p9 = pnand %p9150_p1, %p10769_p10  ;;  %p9158_p5 = scmp.lt.s32.totalorder %s9156_s17, %s9149_s20 }
  0x32   : > { %p9153_p2 = pneg %p9152_p9  ;;  %p9159_p6 = por %p9158_p5, %p9157_p11 }
  0x34   : > { %p9160_p7 = pnand %p9159_p6, %p9153_p2 }
  0x36   : > { %9163 = shalt.err (!%p9160_p7)
}
  0x37   : > { %s9348_s16 = smov 2048   ;;  %s9349_s18 = smov 1024  }
  0x38   : > { %s9350_s22 = smov 64   ;;  %s9351_s24 = smov [#allocation3]  }
  0x39   : > { %8914 = dma.hbm_to_vmem [thread:$0]  (!%p9488_p0), %s9486_s12, 98304, %s9492_s14, %s9494_s15, %s9348_s16, %s9349_s18, %s9350_s22  }
  0x3a   : > { %s225_s8 = sshll.u32 %s9351_s24, 4  ;;  %s9352_s23 = smov [#allocation11]   ;;  %s226_s8 = int_to_ptr.vmem [resolvable:$true] %s225_s8 }
  0x3b   : > { %s246_s13 = sshll.u32 %s9352_s23, 4  ;;  %s9175_s20 = scalar_lea.vmem %s226_s8, 96  ;;  %s247_s13 = int_to_ptr.vmem [resolvable:$true] %s246_s13 }
  0x3c   : > { %p9176_p1 = scmp.ne.s32.totalorder %s226_s8, %s9175_s20  ;;  %p10775_p5 = pneg %p9445_p8 }
  0x3d   : > { %p9183_p3 = scmp.lt.s32.totalorder %s226_s8, %s226_s8  ;;  %p9184_p4 = scmp.lt.s32.totalorder %s9175_s20, %s9175_s20 }
  0x3e   : > { %p9178_p6 = pnand %p9176_p1, %p10775_p5 }
  0x3f   : > { %p9185_p12 = por %p9184_p4, %p9183_p3 }
  0x40   : > { %p9179_p11 = pneg %p9178_p6 }
  0x42   : > { %p9186_p13 = pnand %p9185_p12, %p9179_p11 }
  0x44   : > { %9189 = shalt.err (!%p9186_p13)
}
  0x45   : > { %8901 = dma.hbm_to_vmem [thread:$0]  (!%p9445_p8), %s10757_s0, 96, %s226_s8, [#allocation4]  }
  0x46   : > { %s9201_s14 = scalar_lea.vmem %s247_s13, 512  ;;  %p10776_p2 = pmov %p10775_p5 }
  0x47   : > { %p9202_p9 = scmp.ne.s32.totalorder %s247_s13, %s9201_s14  ;;  %p9209_p5 = scmp.lt.s32.totalorder %s247_s13, %s247_s13 }
  0x48   : > { %p9210_p6 = scmp.lt.s32.totalorder %s9201_s14, %s9201_s14 }
  0x49   : > { %p9204_p7 = pnand %p9202_p9, %p10776_p2 }
  0x4a   : > { %p9211_p10 = por %p9210_p6, %p9209_p5 }
  0x4b   : > { %p9205_p1 = pneg %p9204_p7 }
  0x4d   : > { %p9212_p3 = pnand %p9211_p10, %p9205_p1 }
  0x4f   : > { %9215 = shalt.err (!%p9212_p3)
}
  0x50   : > { %s9353_s16 = smov 4   ;;  %s7757_s8 = sshll.u32 %s273_s21, 4 }
  0x51   : > { %8907 = dma.hbm_to_vmem [thread:$0]  (!%p9445_p8), %s10762_s5, 512, %s247_s13, [#allocation10], %s9350_s22, %s9350_s22, %s9353_s16  }
  0x52   : > { %s9354_s23 = smov [#allocation12]   ;;  %s8678_s17 = sshll.u32 %s9344_s27, 8 }
  0x53   : > { %s260_s20 = sshll.u32 %s9354_s23, 4  ;;  %p10777_p11 = pmov %p10776_p2  ;;  %s261_s20 = int_to_ptr.vmem [resolvable:$true] %s260_s20 }
  0x54   : > { %s9227_s12 = scalar_lea.vmem %s261_s20, 16  ;;  %s9234_s14 = scalar_lea.vmem %s261_s20, 32 }
  0x55   : > { %p9228_p10 = scmp.ne.s32.totalorder %s261_s20, %s9227_s12  ;;  %p9235_p13 = scmp.lt.s32.totalorder %s261_s20, %s261_s20 }
  0x56   : > { %p9236_p9 = scmp.lt.s32.totalorder %s9234_s14, %s9227_s12 }
  0x57   : > { %p9230_p4 = pnand %p9228_p10, %p10777_p11 }
  0x58   : > { %p9237_p2 = por %p9236_p9, %p9235_p13 }
  0x59   : > { %p9231_p12 = pneg %p9230_p4 }
  0x5b   : > { %p9238_p7 = pnand %p9237_p2, %p9231_p12 }
  0x5d   : > { %9241 = shalt.err (!%p9238_p7)
}
  0x5e   : > { %8910 = dma.hbm_to_vmem [thread:$0]  (!%p9445_p8), %s10763_s6, 16, %s261_s20, [#allocation13]  }
  0x5f   : > { %s302_s16 = scalar_lea.hbm %s10759_s2, %s8678_s17  ;;  %s296_s18 = scalar_lea.vmem [#allocation8], %s7757_s8 }
  0x60   : > { %s304_s24 = sshll.u32 %s296_s18, 4  ;;  %s9242_s23 = scalar_lea.hbm %s302_s16, 256  ;;  %s305_s24 = int_to_ptr.vmem [resolvable:$true] %s304_s24 }
  0x61   : > { %p9243_p1 = scmp.ne.s32.totalorder %s302_s16, %s9242_s23  ;;  %p10778_p5 = pneg %p9488_p0 }
  0x62   : > { %s9247_s14 = scalar_lea.hbm %s10759_s2, 512  ;;  %p9248_p8 = scmp.lt.s32.totalorder %s302_s16, %s10759_s2 }
  0x63   : > { %p9245_p6 = pnand %p9243_p1, %p10778_p5  ;;  %p9249_p10 = scmp.lt.s32.totalorder %s9247_s14, %s9242_s23 }
  0x65   : > { %p9246_p3 = pneg %p9245_p6  ;;  %p9250_p11 = por %p9249_p10, %p9248_p8 }
  0x67   : > { %p9251_p4 = pnand %p9250_p11, %p9246_p3 }
  0x69   : > { %9254 = shalt.err (!%p9251_p4)
}
  0x6a   : > { %s9255_s8 = scalar_lea.vmem %s305_s24, 256  ;;  %p10779_p13 = pmov %p10778_p5 }
  0x6b   : > { %p9256_p12 = scmp.ne.s32.totalorder %s305_s24, %s9255_s8  ;;  %s9355_s20 = smov [#allocation8]  }
  0x6c   : > { %s9260_s17 = sshll.u32 %s9355_s20, 4  ;;  %s9261_s17 = int_to_ptr.vmem [resolvable:$false] %s9260_s17 }
  0x6d   : > { %p9258_p9 = pnand %p9256_p12, %p10779_p13  ;;  %s9262_s27 = scalar_lea.vmem %s9261_s17, 512 }
  0x6e   : > { %p9263_p7 = scmp.lt.s32.totalorder %s305_s24, %s9261_s17  ;;  %p9264_p1 = scmp.lt.s32.totalorder %s9262_s27, %s9255_s8 }
  0x6f   : > { %p9259_p2 = pneg %p9258_p9 }
  0x70   : > { %p9265_p5 = por %p9264_p1, %p9263_p7 }
  0x72   : > { %p9266_p6 = pnand %p9265_p5, %p9259_p2 }
  0x74   : > { %9269 = shalt.err (!%p9266_p6)
}
  0x75   : > { %8917 = dma.hbm_to_vmem [thread:$0]  (!%p9488_p0), %s302_s16, 256, %s305_s24, %s9494_s15  }
  0x76   : > { %p10780_p3 = scmp.ne.s32.totalorder %s10771_s30, 0 }
  0x77   : > { %p10781_p8 = scmp.eq.s32.totalorder (!%p10780_p3), %s9421_s28, 0 }
  0x78   : > { %322 = sbr.rel (%p10780_p3) target bundleno = 1669 (0x685), region = 48 }
  0x7d   : > { %9311 = dma.done.wait (%p10781_p8), [#allocation4], 96   ;;  %p10782_p10 = pmov %p10781_p8 }
  0x7e   : > { %s328_s13 = sand.u32 1, %s9421_s28   ;;  %s330_s18 = sand.u32 1, %s9336_s25  }
  0x7f   : > { %9313 = vsyncadd (%p10782_p10), [#allocation4], 4294967200  ;;  %s8873_s23 = smul.u32 6144, %s330_s18  ;;  %s329_s12 = scalar_lea.sflag [#allocation7], %s328_s13 }
  0x80   : > { %p10783_p11 = scmp.ne.s32.totalorder %s10770_s29, 0 }
  0x81   : > { %s9577_s11 = scalar_lea.vmem [#allocation6], %s8873_s23 }
  0x82   : > { %9315 = dma.done.wait (%p10783_p11), %s329_s12, 98560  }
  0x83   : > { %9317 = vsyncadd (%p10783_p11), %s329_s12, 4294868736  ;;  %s7762_s30 = sshll.u32 %s330_s18, 4  ;;  %p10784_p0 = pmov %p10781_p8 }
  0x84   : > { %s9583_s9 = scalar_lea.vmem [#allocation8], %s7762_s30 }
  0x85   : > { %9319 = dma.done.wait (%p10784_p0), [#allocation10], 528   ;;  %p10785_p4 = pmov %p10784_p0 }
  0x86   : > { %p10786_p12 = pmov %p10784_p0 }
  0x87   : > { %9321 = vsyncadd (%p10785_p4), [#allocation10], 4294966768 }
  0x88   : > { %9323 = dma.done.wait (%p10786_p12), [#allocation13], 16   ;;  %p10787_p13 = pmov %p10784_p0 }
  0x89   : > { %s7766_s15 = sshll.u32 %s9421_s28, 8  ;;  %p10788_p2 = scmp.ne.s32.totalorder %s9421_s28, 0 }
  0x8a   : > { %9325 = vsyncadd (%p10787_p13), [#allocation13], 4294967280  ;;  %p392_p9 = scmp.lt.s32.totalorder %s7766_s15, 511 }
  0x8b   : > { %401 = sbr.rel (%p10788_p2) target bundleno = 146 (0x92), region = 76 }
  0x8c   : > { %s10794_s15 = smov (!%p392_p9, %s7766_s15), 511 }
  0x8d   : > { %s7767_s29 = sshll.u32 %s10794_s15, 2 }
  0x8e   : > { %s9597_s14 = scalar_lea.vmem %s10760_s3, %s7767_s29 }
  0x90   : > { %vm402_vm0 = vcmask 517120   ;;  %v9356_v0 = vmov 0.0  }
  0x91   : > { %403 = vst.msk [vmem:[#allocation2] sm:$0x3] %vm402_vm0, %v9356_v0 }
  0x92 PF: > { %v517_v1 = vld [vmem:[%s9577_s11 + $0x380] sm:$0xff]  ;;  %v1177_v33 = vlaneseq  ;;  %v9357_v34 = vmov 1966171168   ;;  %v404_v60 = vld [vmem:[#allocation3] sm:$0x3f]  ;;  %vm7513_vm1 = vcmask 517120  }
  0x93   : > { %v525_v2 = vld [vmem:[%s9577_s11 + $0x3c0] sm:$0xff]  ;;  %v1260_v35 = vunpack.c.l.s4 %v9357_v34  ;;  %p8665_p7 = scmp.ne.s32.totalorder %s9421_s28, 1 }
  0x94   : > { %v773_v3 = vld [vmem:[%s9577_s11 + $0xb80] sm:$0xff]  ;;  %v7882_v4 = vcombine.high %v517_v1, %v525_v2  ;;  %v7881_v6 = vcombine.low %v517_v1, %v525_v2  ;;  %v9623_v44 = vshrl.u32 %v1177_v33, 7  ;;  %s9360_s22 = smov (!%p8665_p7), 64  }
  0x95   : > { %v781_v5 = vld [vmem:[%s9577_s11 + $0xbc0] sm:$0xff]  ;;  %v1261_v45 = vunpack.c.0.s8 %v1260_v35 }
  0x96   : > { %v501_v7 = vld [vmem:[%s9577_s11 + $0x300] sm:$0xff]  ;;  %v8138_v9 = vcombine.high %v773_v3, %v781_v5  ;;  %v8137_v10 = vcombine.low %v773_v3, %v781_v5  ;;  %5151 = vmatprep.subr.bf16.mxu0 %v7882_v4 }
  0x97   : > { %v509_v8 = vld [vmem:[%s9577_s11 + $0x340] sm:$0xff]  ;;  %5152 = vmatpush1.bf16.msra.mxu0 %v7881_v6  ;;  %v9630_v54 = vsub.s32 %v1261_v45, %v9623_v44 }
  0x98   : > { %v7866_v11 = vcombine.high %v501_v7, %v509_v8  ;;  %v757_v12 = vld [vmem:[%s9577_s11 + $0xb00] sm:$0xff]  ;;  %5192 = vmatprep.subr.bf16.mxu1 %v8138_v9  ;;  %v7865_v19 = vcombine.low %v501_v7, %v509_v8 }
  0x99   : > { %v765_v13 = vld [vmem:[%s9577_s11 + $0xb40] sm:$0xff]  ;;  %5193 = vmatpush1.bf16.msra.mxu1 %v8137_v10  ;;  %v9637_v0 = vrot.slane %v404_v60, %v9630_v54 }
  0x9a   : > { %v485_v14 = vld [vmem:[%s9577_s11 + $0x280] sm:$0xff]  ;;  %v8122_v15 = vcombine.high %v757_v12, %v765_v13  ;;  %5153 = vmatprep.subr.bf16.mxu0 %v7866_v11  ;;  %v8121_v20 = vcombine.low %v757_v12, %v765_v13 }
  0x9b   : > { %v493_v16 = vld [vmem:[%s9577_s11 + $0x2c0] sm:$0xff]  ;;  %5154 = vmatpush1.bf16.msra.mxu0 %v7865_v19  ;;  %v1273_v4 = vcombine.high %v9637_v0, %v9637_v0 }
  0x9c   : > { %v741_v17 = vld [vmem:[%s9577_s11 + $0xa80] sm:$0xff]  ;;  %v7850_v21 = vcombine.high %v485_v14, %v493_v16  ;;  %5194 = vmatprep.subr.bf16.mxu1 %v8122_v15  ;;  %v7849_v27 = vcombine.low %v485_v14, %v493_v16 }
  0x9d   : > { %v749_v18 = vld [vmem:[%s9577_s11 + $0xac0] sm:$0xff]  ;;  %5195 = vmatpush1.bf16.msra.mxu1 %v8121_v20  ;;  %v9646_v10 = vrot.slane %v1273_v4, %v9630_v54  ;;  %v1258_v20 = vcombine.high %v404_v60, %v404_v60 }
  0x9e   : > { %v8106_v22 = vcombine.high %v741_v17, %v749_v18  ;;  %v469_v23 = vld [vmem:[%s9577_s11 + $0x200] sm:$0xff]  ;;  %5155 = vmatprep.subr.bf16.mxu0 %v7850_v21  ;;  %v8105_v28 = vcombine.low %v741_v17, %v749_v18 }
  0x9f   : > { %v477_v24 = vld [vmem:[%s9577_s11 + $0x240] sm:$0xff]  ;;  %5156 = vmatpush1.bf16.msra.mxu0 %v7849_v27  ;;  %5183 = vmatprep.mubr.bf16.mxu0 %v9646_v10  ;;  %v9653_v14 = vcombine.high %v9646_v10, %v9646_v10 }
  0xa0   : > { %v725_v25 = vld [vmem:[%s9577_s11 + $0xa00] sm:$0xff]  ;;  %v7834_v29 = vcombine.high %v469_v23, %v477_v24  ;;  %5196 = vmatprep.subr.bf16.mxu1 %v8106_v22  ;;  %v7833_v38 = vcombine.low %v469_v23, %v477_v24 }
  0xa1   : > { %v733_v26 = vld [vmem:[%s9577_s11 + $0xa40] sm:$0xff]  ;;  %5197 = vmatpush1.bf16.msra.mxu1 %v8105_v28  ;;  %5224 = vmatprep.mubr.bf16.mxu1 %v9653_v14 }
  0xa2   : > { %v8090_v30 = vcombine.high %v725_v25, %v733_v26  ;;  %v453_v31 = vld [vmem:[%s9577_s11 + $0x180] sm:$0xff]  ;;  %5157 = vmatprep.subr.bf16.mxu0 %v7834_v29  ;;  %v8089_v39 = vcombine.low %v725_v25, %v733_v26  ;;  %v9663_v29 = vrot.slane %v1258_v20, %v9630_v54  ;;  %v518_v20 = vld [vmem:[%s9577_s11 + $0x388] sm:$0xff] }
  0xa3   : > { %v461_v32 = vld [vmem:[%s9577_s11 + $0x1c0] sm:$0xff]  ;;  %5158 = vmatpush1.bf16.msra.mxu0 %v7833_v38 }
  0xa4   : > { %v709_v36 = vld [vmem:[%s9577_s11 + $0x980] sm:$0xff]  ;;  %v7818_v40 = vcombine.high %v453_v31, %v461_v32  ;;  %5198 = vmatprep.subr.bf16.mxu1 %v8090_v30  ;;  %v7817_v48 = vcombine.low %v453_v31, %v461_v32  ;;  %v9669_v33 = vrot.slane %v9663_v29, %v9630_v54 }
  0xa5   : > { %v717_v37 = vld [vmem:[%s9577_s11 + $0x9c0] sm:$0xff]  ;;  %5199 = vmatpush1.bf16.msra.mxu1 %v8089_v39 }
  0xa6   : > { %v8074_v41 = vcombine.high %v709_v36, %v717_v37  ;;  %v437_v42 = vld [vmem:[%s9577_s11 + $0x100] sm:$0xff]  ;;  %5159 = vmatprep.subr.bf16.mxu0 %v7818_v40  ;;  %v8073_v49 = vcombine.low %v709_v36, %v717_v37 }
  0xa7   : > { %v445_v43 = vld [vmem:[%s9577_s11 + $0x140] sm:$0xff]  ;;  %5160 = vmatpush1.bf16.msra.mxu0 %v7817_v48 }
  0xa8   : > { %v693_v46 = vld [vmem:[%s9577_s11 + $0x900] sm:$0xff]  ;;  %v7802_v50 = vcombine.high %v437_v42, %v445_v43  ;;  %5200 = vmatprep.subr.bf16.mxu1 %v8074_v41  ;;  %v7801_v57 = vcombine.low %v437_v42, %v445_v43 }
  0xa9   : > { %v701_v47 = vld [vmem:[%s9577_s11 + $0x940] sm:$0xff]  ;;  %5201 = vmatpush1.bf16.msra.mxu1 %v8073_v49 }
  0xaa   : > { %v8058_v51 = vcombine.high %v693_v46, %v701_v47  ;;  %v421_v52 = vld [vmem:[%s9577_s11 + $0x80] sm:$0xff]  ;;  %5161 = vmatprep.subr.bf16.mxu0 %v7802_v50  ;;  %v8057_v58 = vcombine.low %v693_v46, %v701_v47 }
  0xab   : > { %v429_v53 = vld [vmem:[%s9577_s11 + $0xc0] sm:$0xff]  ;;  %5162 = vmatpush1.bf16.msra.mxu0 %v7801_v57 }
  0xac   : > { %v677_v55 = vld [vmem:[%s9577_s11 + $0x880] sm:$0xff]  ;;  %v7786_v59 = vcombine.high %v421_v52, %v429_v53  ;;  %5202 = vmatprep.subr.bf16.mxu1 %v8058_v51  ;;  %v7785_v3 = vcombine.low %v421_v52, %v429_v53 }
  0xad   : > { %v685_v56 = vld [vmem:[%s9577_s11 + $0x8c0] sm:$0xff]  ;;  %5203 = vmatpush1.bf16.msra.mxu1 %v8057_v58 }
  0xae   : > { %v8042_v61 = vcombine.high %v677_v55, %v685_v56  ;;  %v405_v62 = vld [vmem:[%s9577_s11] sm:$0xff]  ;;  %5163 = vmatprep.subr.bf16.mxu0 %v7786_v59  ;;  %v8041_v5 = vcombine.low %v677_v55, %v685_v56 }
  0xaf   : > { %v413_v63 = vld [vmem:[%s9577_s11 + $0x40] sm:$0xff]  ;;  %5164 = vmatpush1.bf16.msra.mxu0 %v7785_v3 }
  0xb0   : > { %v661_v1 = vld [vmem:[%s9577_s11 + $0x800] sm:$0xff]  ;;  %v7770_v6 = vcombine.high %v405_v62, %v413_v63  ;;  %5204 = vmatprep.subr.bf16.mxu1 %v8042_v61  ;;  %v7769_v13 = vcombine.low %v405_v62, %v413_v63 }
  0xb1   : > { %v669_v2 = vld [vmem:[%s9577_s11 + $0x840] sm:$0xff]  ;;  %5205 = vmatpush1.bf16.msra.mxu1 %v8041_v5 }
  0xb2   : > { %v8026_v7 = vcombine.high %v661_v1, %v669_v2  ;;  %v645_v8 = vld [vmem:[%s9577_s11 + $0x780] sm:$0xff]  ;;  %5165 = vmatprep.subr.bf16.mxu0 %v7770_v6  ;;  %v8025_v15 = vcombine.low %v661_v1, %v669_v2 }
  0xb3   : > { %v653_v9 = vld [vmem:[%s9577_s11 + $0x7c0] sm:$0xff]  ;;  %5166 = vmatpush1.bf16.msra.mxu0 %v7769_v13 }
  0xb4   : > { %v901_v11 = vld [vmem:[%s9577_s11 + $0xf80] sm:$0xff]  ;;  %v8010_v16 = vcombine.high %v645_v8, %v653_v9  ;;  %5206 = vmatprep.subr.bf16.mxu1 %v8026_v7  ;;  %v8009_v23 = vcombine.low %v645_v8, %v653_v9 }
  0xb5   : > { %v909_v12 = vld [vmem:[%s9577_s11 + $0xfc0] sm:$0xff]  ;;  %5207 = vmatpush1.bf16.msra.mxu1 %v8025_v15 }
  0xb6   : > { %v8266_v17 = vcombine.high %v901_v11, %v909_v12  ;;  %v629_v18 = vld [vmem:[%s9577_s11 + $0x700] sm:$0xff]  ;;  %5167 = vmatprep.subr.bf16.mxu0 %v8010_v16  ;;  %v8265_v24 = vcombine.low %v901_v11, %v909_v12 }
  0xb7   : > { %v637_v19 = vld [vmem:[%s9577_s11 + $0x740] sm:$0xff]  ;;  %5168 = vmatpush2.bf16.msra.mxu0 %v8009_v23  ;;  %v9697_v23 = vrot.slane %v9637_v0, %v9630_v54 }
  0xb8   : > { %v885_v21 = vld [vmem:[%s9577_s11 + $0xf00] sm:$0xff]  ;;  %v7994_v25 = vcombine.high %v629_v18, %v637_v19  ;;  %5208 = vmatprep.subr.bf16.mxu1 %v8266_v17  ;;  %v7993_v32 = vcombine.low %v629_v18, %v637_v19 }
  0xb9   : > { %v893_v22 = vld [vmem:[%s9577_s11 + $0xf40] sm:$0xff]  ;;  %5209 = vmatpush2.bf16.msra.mxu1 %v8265_v24  ;;  %v9707_v0 = vcombine.high %v9697_v23, %v9697_v23 }
  0xba   : > { %v8250_v26 = vcombine.high %v885_v21, %v893_v22  ;;  %v613_v27 = vld [vmem:[%s9577_s11 + $0x680] sm:$0xff]  ;;  %5169 = vmatprep.subr.bf16.mxu0 %v7994_v25  ;;  %v8249_v34 = vcombine.low %v885_v21, %v893_v22  ;;  %v526_v21 = vld [vmem:[%s9577_s11 + $0x3c8] sm:$0xff] }
  0xbb   : > { %v621_v28 = vld [vmem:[%s9577_s11 + $0x6c0] sm:$0xff]  ;;  %5170 = vmatpush2.bf16.msra.mxu0 %v7993_v32  ;;  %v510_v32 = vld [vmem:[%s9577_s11 + $0x348] sm:$0xff] }
  0xbc   : > { %v869_v30 = vld [vmem:[%s9577_s11 + $0xe80] sm:$0xff]  ;;  %v7978_v35 = vcombine.high %v613_v27, %v621_v28  ;;  %5210 = vmatprep.subr.bf16.mxu1 %v8250_v26  ;;  %v7977_v41 = vcombine.low %v613_v27, %v621_v28  ;;  %v7884_v26 = vcombine.high %v518_v20, %v526_v21 }
  0xbd   : > { %v877_v31 = vld [vmem:[%s9577_s11 + $0xec0] sm:$0xff]  ;;  %5211 = vmatpush2.bf16.msra.mxu1 %v8249_v34 }
  0xbe   : > { %v8234_v36 = vcombine.high %v869_v30, %v877_v31  ;;  %v597_v37 = vld [vmem:[%s9577_s11 + $0x600] sm:$0xff]  ;;  %5171 = vmatprep.subr.bf16.mxu0 %v7978_v35  ;;  %v8233_v42 = vcombine.low %v869_v30, %v877_v31  ;;  %v1274_v30 = vcombine.high %v9663_v29, %v9663_v29  ;;  %v502_v31 = vld [vmem:[%s9577_s11 + $0x308] sm:$0xff]  ;;  %v7883_v35 = vcombine.low %v518_v20, %v526_v21 }
  0xbf   : > { %v605_v38 = vld [vmem:[%s9577_s11 + $0x640] sm:$0xff]  ;;  %5172 = vmatpush2.bf16.msra.mxu0 %v7977_v41  ;;  %v7868_v29 = vcombine.high %v502_v31, %v510_v32  ;;  %v414_v21 = vld [vmem:[%s9577_s11 + $0x48] sm:$0xff] }
  0xc0   : > { %v853_v39 = vld [vmem:[%s9577_s11 + $0xe00] sm:$0xff]  ;;  %v7962_v43 = vcombine.high %v597_v37, %v605_v38  ;;  %5212 = vmatprep.subr.bf16.mxu1 %v8234_v36  ;;  %v7961_v50 = vcombine.low %v597_v37, %v605_v38  ;;  %v9714_v41 = vrot.slane %v1274_v30, %v9630_v54 }
  0xc1   : > { %v861_v40 = vld [vmem:[%s9577_s11 + $0xe40] sm:$0xff]  ;;  %5213 = vmatpush2.bf16.msra.mxu1 %v8233_v42 }
  0xc2   : > { %v8218_v45 = vcombine.high %v853_v39, %v861_v40  ;;  %v581_v46 = vld [vmem:[%s9577_s11 + $0x580] sm:$0xff]  ;;  %5173 = vmatprep.subr.bf16.mxu0 %v7962_v43  ;;  %v8217_v51 = vcombine.low %v853_v39, %v861_v40  ;;  %v486_v39 = vld [vmem:[%s9577_s11 + $0x288] sm:$0xff]  ;;  %v7867_v43 = vcombine.low %v502_v31, %v510_v32 }
  0xc3   : > { %v589_v47 = vld [vmem:[%s9577_s11 + $0x5c0] sm:$0xff]  ;;  %5174 = vmatpush2.bf16.msra.mxu0 %v7961_v50  ;;  %v494_v40 = vld [vmem:[%s9577_s11 + $0x2c8] sm:$0xff] }
  0xc4   : > { %v837_v48 = vld [vmem:[%s9577_s11 + $0xd80] sm:$0xff]  ;;  %v7946_v52 = vcombine.high %v581_v46, %v589_v47  ;;  %5214 = vmatprep.subr.bf16.mxu1 %v8218_v45  ;;  %v7945_v59 = vcombine.low %v581_v46, %v589_v47  ;;  %v7852_v54 = vcombine.high %v486_v39, %v494_v40  ;;  %v654_v31 = vld [vmem:[%s9577_s11 + $0x7c8] sm:$0xff] }
  0xc5   : > { %v845_v49 = vld [vmem:[%s9577_s11 + $0xdc0] sm:$0xff]  ;;  %5215 = vmatpush2.bf16.msra.mxu1 %v8217_v51  ;;  %v7851_v51 = vcombine.low %v486_v39, %v494_v40 }
  0xc6   : > { %v8202_v53 = vcombine.high %v837_v48, %v845_v49  ;;  %v565_v55 = vld [vmem:[%s9577_s11 + $0x500] sm:$0xff]  ;;  %5175 = vmatprep.subr.bf16.mxu0 %v7946_v52  ;;  %v8201_v60 = vcombine.low %v837_v48, %v845_v49  ;;  %v470_v48 = vld [vmem:[%s9577_s11 + $0x208] sm:$0xff] }
  0xc7   : > { %v573_v56 = vld [vmem:[%s9577_s11 + $0x540] sm:$0xff]  ;;  %5176 = vmatpush2.bf16.msra.mxu0 %v7945_v59  ;;  %v478_v49 = vld [vmem:[%s9577_s11 + $0x248] sm:$0xff] }
  0xc8   : > { %v821_v57 = vld [vmem:[%s9577_s11 + $0xd00] sm:$0xff]  ;;  %v7930_v61 = vcombine.high %v565_v55, %v573_v56  ;;  %5216 = vmatprep.subr.bf16.mxu1 %v8202_v53  ;;  %v7929_v4 = vcombine.low %v565_v55, %v573_v56  ;;  %v454_v56 = vld [vmem:[%s9577_s11 + $0x188] sm:$0xff] }
  0xc9   : > { %v829_v58 = vld [vmem:[%s9577_s11 + $0xd40] sm:$0xff]  ;;  %5217 = vmatpush2.bf16.msra.mxu1 %v8201_v60  ;;  %v7835_v60 = vcombine.low %v470_v48, %v478_v49 }
  0xca   : > { %v8186_v62 = vcombine.high %v821_v57, %v829_v58  ;;  %v549_v63 = vld [vmem:[%s9577_s11 + $0x480] sm:$0xff]  ;;  %5177 = vmatprep.subr.bf16.mxu0 %v7930_v61  ;;  %v8185_v5 = vcombine.low %v821_v57, %v829_v58  ;;  %v7836_v57 = vcombine.high %v470_v48, %v478_v49  ;;  %v462_v58 = vld [vmem:[%s9577_s11 + $0x1c8] sm:$0xff] }
  0xcb   : > { %v557_v1 = vld [vmem:[%s9577_s11 + $0x4c0] sm:$0xff]  ;;  %5178 = vmatpush2.bf16.msra.mxu0 %v7929_v4 }
  0xcc   : > { %v805_v2 = vld [vmem:[%s9577_s11 + $0xc80] sm:$0xff]  ;;  %v7914_v6 = vcombine.high %v549_v63, %v557_v1  ;;  %5218 = vmatprep.subr.bf16.mxu1 %v8186_v62  ;;  %v7913_v13 = vcombine.low %v549_v63, %v557_v1  ;;  %v438_v1 = vld [vmem:[%s9577_s11 + $0x108] sm:$0xff] }
  0xcd   : > { %v813_v3 = vld [vmem:[%s9577_s11 + $0xcc0] sm:$0xff]  ;;  %5219 = vmatpush2.bf16.msra.mxu1 %v8185_v5  ;;  %v7819_v5 = vcombine.low %v454_v56, %v462_v58 }
  0xce   : > { %v8170_v7 = vcombine.high %v805_v2, %v813_v3  ;;  %v533_v8 = vld [vmem:[%s9577_s11 + $0x400] sm:$0xff]  ;;  %5179 = vmatprep.subr.bf16.mxu0 %v7914_v6  ;;  %v8169_v15 = vcombine.low %v805_v2, %v813_v3  ;;  %v7820_v2 = vcombine.high %v454_v56, %v462_v58  ;;  %v446_v3 = vld [vmem:[%s9577_s11 + $0x148] sm:$0xff] }
  0xcf   : > { %v541_v9 = vld [vmem:[%s9577_s11 + $0x440] sm:$0xff]  ;;  %5180 = vmatpush2.bf16.msra.mxu0 %v7913_v13 }
  0xd0   : > { %v789_v11 = vld [vmem:[%s9577_s11 + $0xc00] sm:$0xff]  ;;  %v7898_v16 = vcombine.high %v533_v8, %v541_v9  ;;  %5220 = vmatprep.subr.bf16.mxu1 %v8170_v7  ;;  %v7897_v22 = vcombine.low %v533_v8, %v541_v9  ;;  %v422_v9 = vld [vmem:[%s9577_s11 + $0x88] sm:$0xff] }
  0xd1   : > { %v797_v12 = vld [vmem:[%s9577_s11 + $0xc40] sm:$0xff]  ;;  %5221 = vmatpush2.bf16.msra.mxu1 %v8169_v15  ;;  %v7803_v15 = vcombine.low %v438_v1, %v446_v3 }
  0xd2   : > { %v8154_v17 = vcombine.high %v789_v11, %v797_v12  ;;  %v1029_v18 = vld [vmem:[%s9577_s11 + $0x1380] sm:$0xff]  ;;  %5181 = vmatprep.subr.bf16.mxu0 %v7898_v16  ;;  %v8153_v24 = vcombine.low %v789_v11, %v797_v12  ;;  %v7804_v11 = vcombine.high %v438_v1, %v446_v3  ;;  %v430_v12 = vld [vmem:[%s9577_s11 + $0xc8] sm:$0xff] }
  0xd3   : > { %v1037_v19 = vld [vmem:[%s9577_s11 + $0x13c0] sm:$0xff]  ;;  %5182 = vmatpush2.bf16.msra.mxu0 %v7897_v22  ;;  %v7788_v20 = vcombine.high %v422_v9, %v430_v12 }
  0xd4   : > { %v8394_v25 = vcombine.high %v1029_v18, %v1037_v19  ;;  %5222 = vmatprep.subr.bf16.mxu1 %v8154_v17  ;;  %v1013_v27 = vld [vmem:[%s9577_s11 + $0x1300] sm:$0xff]  ;;  %v8393_v34 = vcombine.low %v1029_v18, %v1037_v19  ;;  %v406_v19 = vld [vmem:[%s9577_s11 + $0x8] sm:$0xff] }
  0xd5   : > { %v1021_v28 = vld [vmem:[%s9577_s11 + $0x1340] sm:$0xff]  ;;  %5223 = vmatpush2.bf16.msra.mxu1 %v8153_v24  ;;  %v7787_v24 = vcombine.low %v422_v9, %v430_v12  ;;  %v7772_v30 = vcombine.high %v406_v19, %v414_v21 }
  0xd6   : > { %5233 = vmatprep.subr.bf16.mxu0 %v8394_v25  ;;  %v8378_v36 = vcombine.high %v1013_v27, %v1021_v28  ;;  %v997_v37 = vld [vmem:[%s9577_s11 + $0x1280] sm:$0xff]  ;;  %5274 = vmatprep.subr.bf16.mxu1 %v7884_v26  ;;  %v8377_v42 = vcombine.low %v1013_v27, %v1021_v28  ;;  %v646_v28 = vld [vmem:[%s9577_s11 + $0x788] sm:$0xff] }
  0xd7   : > { %v1005_v38 = vld [vmem:[%s9577_s11 + $0x12c0] sm:$0xff]  ;;  %5184 = vmatmul.mubr.bf16.vlgmr.msra.gmra.mxu0 %v9697_v23  ;;  %v8012_v39 = vcombine.high %v646_v28, %v654_v31 }
  0xd8   : > { %5225 = vmatmul.mubr.bf16.vlgmr.msra.gmra.mxu1 %v9707_v0  ;;  %5234 = vmatpush1.bf16.msra.mxu0 %v8393_v34  ;;  %v8362_v45 = vcombine.high %v997_v37, %v1005_v38  ;;  %v981_v46 = vld [vmem:[%s9577_s11 + $0x1200] sm:$0xff]  ;;  %v8361_v50 = vcombine.low %v997_v37, %v1005_v38  ;;  %v7771_v34 = vcombine.low %v406_v19, %v414_v21  ;;  %v630_v38 = vld [vmem:[%s9577_s11 + $0x708] sm:$0xff] }
  0xd9   : > { %5275 = vmatpush1.bf16.msra.mxu1 %v7883_v35  ;;  %5235 = vmatprep.subr.bf16.mxu0 %v8378_v36  ;;  %v989_v47 = vld [vmem:[%s9577_s11 + $0x1240] sm:$0xff] }
  0xda   : > { %5276 = vmatprep.subr.bf16.mxu1 %v7868_v29  ;;  %5265 = vmatprep.mubr.bf16.mxu0 %v9714_v41  ;;  %v8346_v52 = vcombine.high %v981_v46, %v989_v47  ;;  %v965_v53 = vld [vmem:[%s9577_s11 + $0x1180] sm:$0xff]  ;;  %v8345_v59 = vcombine.low %v981_v46, %v989_v47  ;;  %v638_v29 = vld [vmem:[%s9577_s11 + $0x748] sm:$0xff] }
  0xdb   : > { %5306 = vmatprep.mubr.bf16.mxu1 %v9646_v10  ;;  %v973_v55 = vld [vmem:[%s9577_s11 + $0x11c0] sm:$0xff]  ;;  %v614_v47 = vld [vmem:[%s9577_s11 + $0x688] sm:$0xff]  ;;  %v7996_v48 = vcombine.high %v630_v38, %v638_v29 }
  0xdc   : > { %5236 = vmatpush1.bf16.msra.mxu0 %v8377_v42  ;;  %v8330_v61 = vcombine.high %v965_v53, %v973_v55  ;;  %v949_v62 = vld [vmem:[%s9577_s11 + $0x1100] sm:$0xff]  ;;  %v8329_v4 = vcombine.low %v965_v53, %v973_v55  ;;  %v8011_v42 = vcombine.low %v646_v28, %v654_v31  ;;  %v598_v55 = vld [vmem:[%s9577_s11 + $0x608] sm:$0xff] }
  0xdd   : > { %5277 = vmatpush1.bf16.msra.mxu1 %v7867_v43  ;;  %5237 = vmatprep.subr.bf16.mxu0 %v8362_v45  ;;  %v957_v63 = vld [vmem:[%s9577_s11 + $0x1140] sm:$0xff] }
  0xde   : > { %5278 = vmatprep.subr.bf16.mxu1 %v7852_v54  ;;  %v8314_v6 = vcombine.high %v949_v62, %v957_v63  ;;  %v933_v7 = vld [vmem:[%s9577_s11 + $0x1080] sm:$0xff]  ;;  %v8313_v13 = vcombine.low %v949_v62, %v957_v63  ;;  %v622_v54 = vld [vmem:[%s9577_s11 + $0x6c8] sm:$0xff] }
  0xdf   : > { %v941_v8 = vld [vmem:[%s9577_s11 + $0x10c0] sm:$0xff]  ;;  %v7980_v56 = vcombine.high %v614_v47, %v622_v54  ;;  %v582_v63 = vld [vmem:[%s9577_s11 + $0x588] sm:$0xff] }
  0xe0   : > { %5238 = vmatpush1.bf16.msra.mxu0 %v8361_v50  ;;  %v8298_v16 = vcombine.high %v933_v7, %v941_v8  ;;  %v917_v17 = vld [vmem:[%s9577_s11 + $0x1000] sm:$0xff]  ;;  %v8297_v22 = vcombine.low %v933_v7, %v941_v8  ;;  %v7995_v50 = vcombine.low %v630_v38, %v638_v29  ;;  %v566_v8 = vld [vmem:[%s9577_s11 + $0x508] sm:$0xff] }
  0xe1   : > { %5279 = vmatpush1.bf16.msra.mxu1 %v7851_v51  ;;  %5239 = vmatprep.subr.bf16.mxu0 %v8346_v52  ;;  %v925_v18 = vld [vmem:[%s9577_s11 + $0x1040] sm:$0xff] }
  0xe2   : > { %5280 = vmatprep.subr.bf16.mxu1 %v7836_v57  ;;  %v8282_v25 = vcombine.high %v917_v17, %v925_v18  ;;  %v1157_v26 = vld [vmem:[%s9577_s11 + $0x1780] sm:$0xff]  ;;  %v8281_v32 = vcombine.low %v917_v17, %v925_v18  ;;  %v606_v57 = vld [vmem:[%s9577_s11 + $0x648] sm:$0xff] }
  0xe3   : > { %v1165_v27 = vld [vmem:[%s9577_s11 + $0x17c0] sm:$0xff]  ;;  %v7964_v1 = vcombine.high %v598_v55, %v606_v57  ;;  %v550_v18 = vld [vmem:[%s9577_s11 + $0x488] sm:$0xff] }
  0xe4   : > { %5240 = vmatpush1.bf16.msra.mxu0 %v8345_v59  ;;  %v8522_v35 = vcombine.high %v1157_v26, %v1165_v27  ;;  %v1141_v36 = vld [vmem:[%s9577_s11 + $0x1700] sm:$0xff]  ;;  %v8521_v40 = vcombine.low %v1157_v26, %v1165_v27  ;;  %v7979_v59 = vcombine.low %v614_v47, %v622_v54  ;;  %v534_v27 = vld [vmem:[%s9577_s11 + $0x408] sm:$0xff] }
  0xe5   : > { %5281 = vmatpush1.bf16.msra.mxu1 %v7835_v60  ;;  %5241 = vmatprep.subr.bf16.mxu0 %v8330_v61  ;;  %v1149_v37 = vld [vmem:[%s9577_s11 + $0x1740] sm:$0xff] }
  0xe6   : > { %5282 = vmatprep.subr.bf16.mxu1 %v7820_v2  ;;  %v8506_v43 = vcombine.high %v1141_v36, %v1149_v37  ;;  %v1125_v45 = vld [vmem:[%s9577_s11 + $0x1680] sm:$0xff]  ;;  %v8505_v49 = vcombine.low %v1141_v36, %v1149_v37  ;;  %v590_v2 = vld [vmem:[%s9577_s11 + $0x5c8] sm:$0xff] }
  0xe7   : > { %v1133_v46 = vld [vmem:[%s9577_s11 + $0x16c0] sm:$0xff]  ;;  %v7948_v9 = vcombine.high %v582_v63, %v590_v2  ;;  %v782_v36 = vld [vmem:[%s9577_s11 + $0xbc8] sm:$0xff] }
  0xe8   : > { %5242 = vmatpush1.bf16.msra.mxu0 %v8329_v4  ;;  %v8490_v51 = vcombine.high %v1125_v45, %v1133_v46  ;;  %v1109_v52 = vld [vmem:[%s9577_s11 + $0x1600] sm:$0xff]  ;;  %v8489_v58 = vcombine.low %v1125_v45, %v1133_v46  ;;  %v7963_v4 = vcombine.low %v598_v55, %v606_v57  ;;  %v1030_v37 = vld [vmem:[%s9577_s11 + $0x1388] sm:$0xff] }
  0xe9   : > { %5283 = vmatpush1.bf16.msra.mxu1 %v7819_v5  ;;  %5243 = vmatprep.subr.bf16.mxu0 %v8314_v6  ;;  %v1117_v53 = vld [vmem:[%s9577_s11 + $0x1640] sm:$0xff]  ;;  %v766_v45 = vld [vmem:[%s9577_s11 + $0xb48] sm:$0xff] }
  0xea   : > { %5284 = vmatprep.subr.bf16.mxu1 %v7804_v11  ;;  %v8474_v60 = vcombine.high %v1109_v52, %v1117_v53  ;;  %v1093_v61 = vld [vmem:[%s9577_s11 + $0x1580] sm:$0xff]  ;;  %v8473_v3 = vcombine.low %v1109_v52, %v1117_v53  ;;  %v574_v11 = vld [vmem:[%s9577_s11 + $0x548] sm:$0xff] }
  0xeb   : > { %v1101_v62 = vld [vmem:[%s9577_s11 + $0x15c0] sm:$0xff]  ;;  %v7932_v19 = vcombine.high %v566_v8, %v574_v11  ;;  %v1014_v46 = vld [vmem:[%s9577_s11 + $0x1308] sm:$0xff] }
  0xec   : > { %5244 = vmatpush1.bf16.msra.mxu0 %v8313_v13  ;;  %v8458_v5 = vcombine.high %v1093_v61, %v1101_v62  ;;  %v1077_v6 = vld [vmem:[%s9577_s11 + $0x1500] sm:$0xff]  ;;  %v8457_v12 = vcombine.low %v1093_v61, %v1101_v62  ;;  %v7947_v13 = vcombine.low %v582_v63, %v590_v2  ;;  %v750_v52 = vld [vmem:[%s9577_s11 + $0xac8] sm:$0xff] }
  0xed   : > { %5285 = vmatpush1.bf16.msra.mxu1 %v7803_v15  ;;  %5245 = vmatprep.subr.bf16.mxu0 %v8298_v16  ;;  %v1085_v7 = vld [vmem:[%s9577_s11 + $0x1540] sm:$0xff]  ;;  %v998_v55 = vld [vmem:[%s9577_s11 + $0x1288] sm:$0xff] }
  0xee   : > { %5286 = vmatprep.subr.bf16.mxu1 %v7788_v20  ;;  %v8442_v15 = vcombine.high %v1077_v6, %v1085_v7  ;;  %v1061_v16 = vld [vmem:[%s9577_s11 + $0x1480] sm:$0xff]  ;;  %v558_v20 = vld [vmem:[%s9577_s11 + $0x4c8] sm:$0xff]  ;;  %v8441_v21 = vcombine.low %v1077_v6, %v1085_v7 }
  0xef   : > { %v1069_v17 = vld [vmem:[%s9577_s11 + $0x14c0] sm:$0xff]  ;;  %v7916_v28 = vcombine.high %v550_v18, %v558_v20  ;;  %v734_v61 = vld [vmem:[%s9577_s11 + $0xa48] sm:$0xff] }
  0xf0   : > { %5246 = vmatpush1.bf16.msra.mxu0 %v8297_v22  ;;  %v7931_v22 = vcombine.low %v566_v8, %v574_v11  ;;  %v1053_v26 = vld [vmem:[%s9577_s11 + $0x1440] sm:$0xff]  ;;  %v8425_v31 = vcombine.low %v1061_v16, %v1069_v17  ;;  %v982_v62 = vld [vmem:[%s9577_s11 + $0x1208] sm:$0xff] }
  0xf1   : > { %5287 = vmatpush1.bf16.msra.mxu1 %v7787_v24  ;;  %5247 = vmatprep.subr.bf16.mxu0 %v8282_v25  ;;  %v8426_v24 = vcombine.high %v1061_v16, %v1069_v17  ;;  %v1045_v25 = vld [vmem:[%s9577_s11 + $0x1400] sm:$0xff]  ;;  %v718_v6 = vld [vmem:[%s9577_s11 + $0x9c8] sm:$0xff] }
  0xf2   : > { %5288 = vmatprep.subr.bf16.mxu1 %v7772_v30  ;;  %v542_v30 = vld [vmem:[%s9577_s11 + $0x448] sm:$0xff]  ;;  %v8409_v29 = vcombine.low %v1045_v25, %v1053_v26 }
  0xf3   : > { %v7900_v38 = vcombine.high %v534_v27, %v542_v30  ;;  %v966_v7 = vld [vmem:[%s9577_s11 + $0x1188] sm:$0xff] }
  0xf4   : > { %5248 = vmatpush1.bf16.msra.mxu0 %v8281_v32  ;;  %v7915_v32 = vcombine.low %v550_v18, %v558_v20  ;;  %v702_v16 = vld [vmem:[%s9577_s11 + $0x948] sm:$0xff] }
  0xf5   : > { %5289 = vmatpush1.bf16.msra.mxu1 %v7771_v34  ;;  %5249 = vmatprep.subr.bf16.mxu0 %v8522_v35  ;;  %v8410_v34 = vcombine.high %v1045_v25, %v1053_v26  ;;  %v774_v35 = vld [vmem:[%s9577_s11 + $0xb88] sm:$0xff] }
  0xf6   : > { %5290 = vmatprep.subr.bf16.mxu1 %v8012_v39  ;;  %v1038_v39 = vld [vmem:[%s9577_s11 + $0x13c8] sm:$0xff]  ;;  %v8139_v54 = vcombine.low %v774_v35, %v782_v36 }
  0xf7   : > { %v8396_v47 = vcombine.high %v1030_v37, %v1038_v39  ;;  %v950_v17 = vld [vmem:[%s9577_s11 + $0x1108] sm:$0xff] }
  0xf8   : > { %5250 = vmatpush2.bf16.msra.mxu0 %v8521_v40  ;;  %v7899_v40 = vcombine.low %v534_v27, %v542_v30  ;;  %v686_v25 = vld [vmem:[%s9577_s11 + $0x8c8] sm:$0xff] }
  0xf9   : > { %5291 = vmatpush2.bf16.msra.mxu1 %v8011_v42  ;;  %5251 = vmatprep.subr.bf16.mxu0 %v8506_v43  ;;  %v8140_v42 = vcombine.high %v774_v35, %v782_v36  ;;  %v758_v43 = vld [vmem:[%s9577_s11 + $0xb08] sm:$0xff] }
  0xfa   : > { %5292 = vmatprep.subr.bf16.mxu1 %v7996_v48  ;;  %v1022_v48 = vld [vmem:[%s9577_s11 + $0x1348] sm:$0xff]  ;;  %v8123_v57 = vcombine.low %v758_v43, %v766_v45 }
  0xfb   : > { %v8380_v53 = vcombine.high %v1014_v46, %v1022_v48  ;;  %v934_v26 = vld [vmem:[%s9577_s11 + $0x1088] sm:$0xff] }
  0xfc   : > { %5252 = vmatpush2.bf16.msra.mxu0 %v8505_v49  ;;  %v8395_v49 = vcombine.low %v1030_v37, %v1038_v39  ;;  %v670_v35 = vld [vmem:[%s9577_s11 + $0x848] sm:$0xff] }
  0xfd   : > { %5293 = vmatpush2.bf16.msra.mxu1 %v7995_v50  ;;  %5253 = vmatprep.subr.bf16.mxu0 %v8490_v51  ;;  %v8124_v50 = vcombine.high %v758_v43, %v766_v45  ;;  %v742_v51 = vld [vmem:[%s9577_s11 + $0xa88] sm:$0xff] }
  0xfe   : > { %5294 = vmatprep.subr.bf16.mxu1 %v7980_v56  ;;  %v1006_v56 = vld [vmem:[%s9577_s11 + $0x12c8] sm:$0xff]  ;;  %v8107_v2 = vcombine.low %v742_v51, %v750_v52 }
  0xff   : > { %v8364_v63 = vcombine.high %v998_v55, %v1006_v56  ;;  %v918_v36 = vld [vmem:[%s9577_s11 + $0x1008] sm:$0xff] }
 0x100   : > { %5254 = vmatpush2.bf16.msra.mxu0 %v8489_v58  ;;  %v8379_v58 = vcombine.low %v1014_v46, %v1022_v48  ;;  %v910_v43 = vld [vmem:[%s9577_s11 + $0xfc8] sm:$0xff] }
 0x101   : > { %5295 = vmatpush2.bf16.msra.mxu1 %v7979_v59  ;;  %5255 = vmatprep.subr.bf16.mxu0 %v8474_v60  ;;  %v8108_v59 = vcombine.high %v742_v51, %v750_v52  ;;  %v726_v60 = vld [vmem:[%s9577_s11 + $0xa08] sm:$0xff] }
 0x102   : > { %5296 = vmatprep.subr.bf16.mxu1 %v7964_v1  ;;  %v990_v1 = vld [vmem:[%s9577_s11 + $0x1248] sm:$0xff]  ;;  %v8091_v11 = vcombine.low %v726_v60, %v734_v61 }
 0x103   : > { %v8348_v8 = vcombine.high %v982_v62, %v990_v1  ;;  %v1158_v45 = vld [vmem:[%s9577_s11 + $0x1788] sm:$0xff] }
 0x104   : > { %5256 = vmatpush2.bf16.msra.mxu0 %v8473_v3  ;;  %v8363_v3 = vcombine.low %v998_v55, %v1006_v56  ;;  %v894_v51 = vld [vmem:[%s9577_s11 + $0xf48] sm:$0xff] }
 0x105   : > { %5297 = vmatpush2.bf16.msra.mxu1 %v7963_v4  ;;  %5257 = vmatprep.subr.bf16.mxu0 %v8458_v5  ;;  %v8092_v4 = vcombine.high %v726_v60, %v734_v61  ;;  %v710_v5 = vld [vmem:[%s9577_s11 + $0x988] sm:$0xff] }
 0x106   : > { %5298 = vmatprep.subr.bf16.mxu1 %v7948_v9  ;;  %v974_v9 = vld [vmem:[%s9577_s11 + $0x11c8] sm:$0xff]  ;;  %v8075_v20 = vcombine.low %v710_v5, %v718_v6 }
 0x107   : > { %v8332_v18 = vcombine.high %v966_v7, %v974_v9  ;;  %v1142_v52 = vld [vmem:[%s9577_s11 + $0x1708] sm:$0xff] }
 0x108   : > { %5258 = vmatpush2.bf16.msra.mxu0 %v8457_v12  ;;  %v8347_v12 = vcombine.low %v982_v62, %v990_v1  ;;  %v1150_v55 = vld [vmem:[%s9577_s11 + $0x1748] sm:$0xff] }
 0x109   : > { %5299 = vmatpush2.bf16.msra.mxu1 %v7947_v13  ;;  %5259 = vmatprep.subr.bf16.mxu0 %v8442_v15  ;;  %v8076_v13 = vcombine.high %v710_v5, %v718_v6  ;;  %v694_v15 = vld [vmem:[%s9577_s11 + $0x908] sm:$0xff]  ;;  %v8508_v62 = vcombine.high %v1142_v52, %v1150_v55 }
 0x10a   : > { %5300 = vmatprep.subr.bf16.mxu1 %v7932_v19  ;;  %v958_v19 = vld [vmem:[%s9577_s11 + $0x1148] sm:$0xff]  ;;  %v8059_v30 = vcombine.low %v694_v15, %v702_v16 }
 0x10b   : > { %v8316_v27 = vcombine.high %v950_v17, %v958_v19  ;;  %v878_v60 = vld [vmem:[%s9577_s11 + $0xec8] sm:$0xff] }
 0x10c   : > { %5260 = vmatpush2.bf16.msra.mxu0 %v8441_v21  ;;  %v8331_v21 = vcombine.low %v966_v7, %v974_v9  ;;  %v1126_v61 = vld [vmem:[%s9577_s11 + $0x1688] sm:$0xff] }
 0x10d   : > { %5301 = vmatpush2.bf16.msra.mxu1 %v7931_v22  ;;  %5261 = vmatprep.subr.bf16.mxu0 %v8426_v24  ;;  %v8060_v22 = vcombine.high %v694_v15, %v702_v16  ;;  %v678_v24 = vld [vmem:[%s9577_s11 + $0x888] sm:$0xff] }
 0x10e   : > { %5302 = vmatprep.subr.bf16.mxu1 %v7916_v28  ;;  %v942_v28 = vld [vmem:[%s9577_s11 + $0x10c8] sm:$0xff]  ;;  %v8043_v39 = vcombine.low %v678_v24, %v686_v25 }
 0x10f   : > { %v8300_v37 = vcombine.high %v934_v26, %v942_v28  ;;  %v862_v5 = vld [vmem:[%s9577_s11 + $0xe48] sm:$0xff] }
 0x110   : > { %5262 = vmatpush2.bf16.msra.mxu0 %v8425_v31  ;;  %v8315_v31 = vcombine.low %v950_v17, %v958_v19  ;;  %v1110_v6 = vld [vmem:[%s9577_s11 + $0x1608] sm:$0xff] }
 0x111   : > { %5303 = vmatpush2.bf16.msra.mxu1 %v7915_v32  ;;  %5263 = vmatprep.subr.bf16.mxu0 %v8410_v34  ;;  %v8044_v32 = vcombine.high %v678_v24, %v686_v25  ;;  %v662_v34 = vld [vmem:[%s9577_s11 + $0x808] sm:$0xff] }
 0x112   : > { %5304 = vmatprep.subr.bf16.mxu1 %v7900_v38  ;;  %v926_v38 = vld [vmem:[%s9577_s11 + $0x1048] sm:$0xff]  ;;  %v8027_v48 = vcombine.low %v662_v34, %v670_v35 }
 0x113   : > { %v8284_v46 = vcombine.high %v918_v36, %v926_v38  ;;  %v846_v15 = vld [vmem:[%s9577_s11 + $0xdc8] sm:$0xff] }
 0x114   : > { %5264 = vmatpush2.bf16.msra.mxu0 %v8409_v29  ;;  %v8299_v29 = vcombine.low %v934_v26, %v942_v28  ;;  %v1094_v16 = vld [vmem:[%s9577_s11 + $0x1588] sm:$0xff] }
 0x115   : > { %5305 = vmatpush2.bf16.msra.mxu1 %v7899_v40  ;;  %5315 = vmatprep.subr.bf16.mxu0 %v8140_v42  ;;  %v8028_v40 = vcombine.high %v662_v34, %v670_v35  ;;  %v902_v42 = vld [vmem:[%s9577_s11 + $0xf88] sm:$0xff] }
 0x116   : > { %5356 = vmatprep.subr.bf16.mxu1 %v8396_v47  ;;  %v1166_v47 = vld [vmem:[%s9577_s11 + $0x17c8] sm:$0xff]  ;;  %v8267_v56 = vcombine.low %v902_v42, %v910_v43 }
 0x117   : > { %5266 = vmatmul.mubr.bf16.vlgmr.msra.gmra.mxu0 %v9669_v33  ;;  %v830_v24 = vld [vmem:[%s9577_s11 + $0xd48] sm:$0xff] }
 0x118   : > { %5307 = vmatmul.mubr.bf16.vlgmr.msra.gmra.mxu1 %v9697_v23  ;;  %5316 = vmatpush1.bf16.msra.mxu0 %v8139_v54  ;;  %v8283_v54 = vcombine.low %v918_v36, %v926_v38  ;;  %v1078_v25 = vld [vmem:[%s9577_s11 + $0x1508] sm:$0xff] }
 0x119   : > { %5357 = vmatpush1.bf16.msra.mxu1 %v8395_v49  ;;  %5317 = vmatprep.subr.bf16.mxu0 %v8124_v50  ;;  %v8268_v49 = vcombine.high %v902_v42, %v910_v43  ;;  %v886_v50 = vld [vmem:[%s9577_s11 + $0xf08] sm:$0xff] }
 0x11a   : > { %5358 = vmatprep.subr.bf16.mxu1 %v8380_v53  ;;  %5347 = vmatprep.mubr.bf16.mxu0 %v9653_v14  ;;  %v8524_v53 = vcombine.high %v1158_v45, %v1166_v47  ;;  %v8251_v1 = vcombine.low %v886_v50, %v894_v51  ;;  %v814_v34 = vld [vmem:[%s9577_s11 + $0xcc8] sm:$0xff] }
 0x11b   : > { %5388 = vmatprep.mubr.bf16.mxu1 %v9714_v41  ;;  %v1062_v35 = vld [vmem:[%s9577_s11 + $0x1488] sm:$0xff] }
 0x11c   : > { %5318 = vmatpush1.bf16.msra.mxu0 %v8123_v57  ;;  %v8523_v57 = vcombine.low %v1158_v45, %v1166_v47  ;;  %v798_v42 = vld [vmem:[%s9577_s11 + $0xc48] sm:$0xff] }
 0x11d   : > { %5359 = vmatpush1.bf16.msra.mxu1 %v8379_v58  ;;  %5319 = vmatprep.subr.bf16.mxu0 %v8108_v59  ;;  %v8252_v58 = vcombine.high %v886_v50, %v894_v51  ;;  %v870_v59 = vld [vmem:[%s9577_s11 + $0xe88] sm:$0xff]  ;;  %v527_v50 = vld [vmem:[%s9577_s11 + $0x3d0] sm:$0xff] }
 0x11e   : > { %5360 = vmatprep.subr.bf16.mxu1 %v8364_v63  ;;  %v1134_v63 = vld [vmem:[%s9577_s11 + $0x16c8] sm:$0xff]  ;;  %v8235_v9 = vcombine.low %v870_v59, %v878_v60  ;;  %v775_v51 = vld [vmem:[%s9577_s11 + $0xb90] sm:$0xff] }
 0x11f   : > { %v8492_v7 = vcombine.high %v1126_v61, %v1134_v63  ;;  %v1046_v43 = vld [vmem:[%s9577_s11 + $0x1408] sm:$0xff] }
 0x120   : > { %5320 = vmatpush1.bf16.msra.mxu0 %v8107_v2  ;;  %v8507_v2 = vcombine.low %v1142_v52, %v1150_v55 }
 0x121   : > { %5361 = vmatpush1.bf16.msra.mxu1 %v8363_v3  ;;  %5321 = vmatprep.subr.bf16.mxu0 %v8092_v4  ;;  %v8236_v3 = vcombine.high %v870_v59, %v878_v60  ;;  %v854_v4 = vld [vmem:[%s9577_s11 + $0xe08] sm:$0xff]  ;;  %v511_v59 = vld [vmem:[%s9577_s11 + $0x350] sm:$0xff] }
 0x122   : > { %5362 = vmatprep.subr.bf16.mxu1 %v8348_v8  ;;  %v1118_v8 = vld [vmem:[%s9577_s11 + $0x1648] sm:$0xff]  ;;  %v8219_v19 = vcombine.low %v854_v4, %v862_v5  ;;  %v759_v60 = vld [vmem:[%s9577_s11 + $0xb10] sm:$0xff] }
 0x123   : > { %v8476_v17 = vcombine.high %v1110_v6, %v1118_v8 }
 0x124   : > { %5322 = vmatpush1.bf16.msra.mxu0 %v8091_v11  ;;  %v8491_v11 = vcombine.low %v1126_v61, %v1134_v63 }
 0x125   : > { %5363 = vmatpush1.bf16.msra.mxu1 %v8347_v12  ;;  %5323 = vmatprep.subr.bf16.mxu0 %v8076_v13  ;;  %v8220_v12 = vcombine.high %v854_v4, %v862_v5  ;;  %v838_v13 = vld [vmem:[%s9577_s11 + $0xd88] sm:$0xff]  ;;  %v487_v4 = vld [vmem:[%s9577_s11 + $0x290] sm:$0xff] }
 0x126   : > { %5364 = vmatprep.subr.bf16.mxu1 %v8332_v18  ;;  %v1102_v18 = vld [vmem:[%s9577_s11 + $0x15c8] sm:$0xff]  ;;  %v8203_v28 = vcombine.low %v838_v13, %v846_v15  ;;  %v495_v5 = vld [vmem:[%s9577_s11 + $0x2d0] sm:$0xff] }
 0x127   : > { %v8460_v26 = vcombine.high %v1094_v16, %v1102_v18 }
 0x128   : > { %5324 = vmatpush1.bf16.msra.mxu0 %v8075_v20  ;;  %v8475_v20 = vcombine.low %v1110_v6, %v1118_v8  ;;  %v743_v6 = vld [vmem:[%s9577_s11 + $0xa90] sm:$0xff] }
 0x129   : > { %5365 = vmatpush1.bf16.msra.mxu1 %v8331_v21  ;;  %5325 = vmatprep.subr.bf16.mxu0 %v8060_v22  ;;  %v8204_v21 = vcombine.high %v838_v13, %v846_v15  ;;  %v822_v22 = vld [vmem:[%s9577_s11 + $0xd08] sm:$0xff]  ;;  %v471_v13 = vld [vmem:[%s9577_s11 + $0x210] sm:$0xff] }
 0x12a   : > { %5366 = vmatprep.subr.bf16.mxu1 %v8316_v27  ;;  %v1086_v27 = vld [vmem:[%s9577_s11 + $0x1548] sm:$0xff]  ;;  %v8187_v38 = vcombine.low %v822_v22, %v830_v24  ;;  %v479_v15 = vld [vmem:[%s9577_s11 + $0x250] sm:$0xff] }
 0x12b   : > { %v8444_v36 = vcombine.high %v1078_v25, %v1086_v27 }
 0x12c   : > { %5326 = vmatpush1.bf16.msra.mxu0 %v8059_v30  ;;  %v8459_v30 = vcombine.low %v1094_v16, %v1102_v18  ;;  %v727_v16 = vld [vmem:[%s9577_s11 + $0xa10] sm:$0xff]  ;;  %v7853_v18 = vcombine.low %v487_v4, %v495_v5 }
 0x12d   : > { %5367 = vmatpush1.bf16.msra.mxu1 %v8315_v31  ;;  %5327 = vmatprep.subr.bf16.mxu0 %v8044_v32  ;;  %v8188_v31 = vcombine.high %v822_v22, %v830_v24  ;;  %v806_v32 = vld [vmem:[%s9577_s11 + $0xc88] sm:$0xff]  ;;  %v455_v22 = vld [vmem:[%s9577_s11 + $0x190] sm:$0xff] }
 0x12e   : > { %5368 = vmatprep.subr.bf16.mxu1 %v8300_v37  ;;  %v1070_v37 = vld [vmem:[%s9577_s11 + $0x14c8] sm:$0xff]  ;;  %v8171_v47 = vcombine.low %v806_v32, %v814_v34  ;;  %v463_v24 = vld [vmem:[%s9577_s11 + $0x1d0] sm:$0xff] }
 0x12f   : > { %v8428_v45 = vcombine.high %v1062_v35, %v1070_v37 }
 0x130   : > { %5328 = vmatpush1.bf16.msra.mxu0 %v8043_v39  ;;  %v8443_v39 = vcombine.low %v1078_v25, %v1086_v27  ;;  %v711_v25 = vld [vmem:[%s9577_s11 + $0x990] sm:$0xff]  ;;  %v7837_v27 = vcombine.low %v471_v13, %v479_v15 }
 0x131   : > { %5369 = vmatpush1.bf16.msra.mxu1 %v8299_v29  ;;  %5329 = vmatprep.subr.bf16.mxu0 %v8028_v40  ;;  %v8172_v29 = vcombine.high %v806_v32, %v814_v34  ;;  %v790_v40 = vld [vmem:[%s9577_s11 + $0xc08] sm:$0xff]  ;;  %v439_v32 = vld [vmem:[%s9577_s11 + $0x110] sm:$0xff] }
 0x132   : > { %5370 = vmatprep.subr.bf16.mxu1 %v8284_v46  ;;  %v1054_v46 = vld [vmem:[%s9577_s11 + $0x1448] sm:$0xff]  ;;  %v8155_v55 = vcombine.low %v790_v40, %v798_v42  ;;  %v447_v34 = vld [vmem:[%s9577_s11 + $0x150] sm:$0xff] }
 0x133   : > { %v8412_v52 = vcombine.high %v1046_v43, %v1054_v46 }
 0x134   : > { %5330 = vmatpush1.bf16.msra.mxu0 %v8027_v48  ;;  %v8427_v48 = vcombine.low %v1062_v35, %v1070_v37  ;;  %v695_v35 = vld [vmem:[%s9577_s11 + $0x910] sm:$0xff]  ;;  %v7821_v37 = vcombine.low %v455_v22, %v463_v24 }
 0x135   : > { %5371 = vmatpush1.bf16.msra.mxu1 %v8283_v54  ;;  %5331 = vmatprep.subr.bf16.mxu0 %v8268_v49  ;;  %v8156_v54 = vcombine.high %v790_v40, %v798_v42  ;;  %v519_v49 = vld [vmem:[%s9577_s11 + $0x390] sm:$0xff] }
 0x136   : > { %5372 = vmatprep.subr.bf16.mxu1 %v8524_v53  ;;  %v783_v53 = vld [vmem:[%s9577_s11 + $0xbd0] sm:$0xff]  ;;  %v7885_v63 = vcombine.low %v519_v49, %v527_v50 }
 0x137   : > { %v8142_v61 = vcombine.high %v775_v51, %v783_v53  ;;  %v423_v40 = vld [vmem:[%s9577_s11 + $0x90] sm:$0xff] }
 0x138   : > { %5332 = vmatpush2.bf16.msra.mxu0 %v8267_v56  ;;  %v8411_v56 = vcombine.low %v1046_v43, %v1054_v46  ;;  %v431_v42 = vld [vmem:[%s9577_s11 + $0xd0] sm:$0xff]  ;;  %v7805_v46 = vcombine.low %v439_v32, %v447_v34 }
 0x139   : > { %5373 = vmatpush2.bf16.msra.mxu1 %v8523_v57  ;;  %5333 = vmatprep.subr.bf16.mxu0 %v8252_v58  ;;  %v7886_v57 = vcombine.high %v519_v49, %v527_v50  ;;  %v503_v58 = vld [vmem:[%s9577_s11 + $0x310] sm:$0xff] }
 0x13a   : > { %5374 = vmatprep.subr.bf16.mxu1 %v8508_v62  ;;  %v767_v62 = vld [vmem:[%s9577_s11 + $0xb50] sm:$0xff]  ;;  %v7869_v8 = vcombine.low %v503_v58, %v511_v59 }
 0x13b   : > { %v679_v43 = vld [vmem:[%s9577_s11 + $0x890] sm:$0xff] }
 0x13c   : > { %5334 = vmatpush2.bf16.msra.mxu0 %v8251_v1  ;;  %v8141_v1 = vcombine.low %v775_v51, %v783_v53  ;;  %v407_v49 = vld [vmem:[%s9577_s11 + $0x10] sm:$0xff]  ;;  %v7789_v53 = vcombine.low %v423_v40, %v431_v42 }
 0x13d   : > { %5375 = vmatpush2.bf16.msra.mxu1 %v8507_v2  ;;  %5335 = vmatprep.subr.bf16.mxu0 %v8236_v3  ;;  %v7870_v2 = vcombine.high %v503_v58, %v511_v59  ;;  %v8126_v3 = vcombine.high %v759_v60, %v767_v62  ;;  %v415_v50 = vld [vmem:[%s9577_s11 + $0x50] sm:$0xff] }
 0x13e   : > { %5376 = vmatprep.subr.bf16.mxu1 %v8492_v7  ;;  %v751_v7 = vld [vmem:[%s9577_s11 + $0xad0] sm:$0xff] }
 0x13f   : > { %v663_v51 = vld [vmem:[%s9577_s11 + $0x810] sm:$0xff] }
 0x140   : > { %5336 = vmatpush2.bf16.msra.mxu0 %v8235_v9  ;;  %v8125_v9 = vcombine.low %v759_v60, %v767_v62  ;;  %v647_v58 = vld [vmem:[%s9577_s11 + $0x790] sm:$0xff]  ;;  %v7773_v62 = vcombine.low %v407_v49, %v415_v50 }
 0x141   : > { %5377 = vmatpush2.bf16.msra.mxu1 %v8491_v11  ;;  %5337 = vmatprep.subr.bf16.mxu0 %v8220_v12  ;;  %v7854_v11 = vcombine.high %v487_v4, %v495_v5  ;;  %v8110_v12 = vcombine.high %v743_v6, %v751_v7  ;;  %v655_v59 = vld [vmem:[%s9577_s11 + $0x7d0] sm:$0xff] }
 0x142   : > { %5378 = vmatprep.subr.bf16.mxu1 %v8476_v17  ;;  %v735_v17 = vld [vmem:[%s9577_s11 + $0xa50] sm:$0xff] }
 0x143   : > { %v903_v60 = vld [vmem:[%s9577_s11 + $0xf90] sm:$0xff] }
 0x144   : > { %5338 = vmatpush2.bf16.msra.mxu0 %v8219_v19  ;;  %v8109_v19 = vcombine.low %v743_v6, %v751_v7  ;;  %v639_v4 = vld [vmem:[%s9577_s11 + $0x750] sm:$0xff]  ;;  %v8013_v7 = vcombine.low %v647_v58, %v655_v59 }
 0x145   : > { %5379 = vmatpush2.bf16.msra.mxu1 %v8475_v20  ;;  %5339 = vmatprep.subr.bf16.mxu0 %v8204_v21  ;;  %v7838_v20 = vcombine.high %v471_v13, %v479_v15  ;;  %v8094_v21 = vcombine.high %v727_v16, %v735_v17  ;;  %v887_v5 = vld [vmem:[%s9577_s11 + $0xf10] sm:$0xff] }
 0x146   : > { %5380 = vmatprep.subr.bf16.mxu1 %v8460_v26  ;;  %v719_v26 = vld [vmem:[%s9577_s11 + $0x9d0] sm:$0xff] }
 0x147   : > { %v895_v6 = vld [vmem:[%s9577_s11 + $0xf50] sm:$0xff] }
 0x148   : > { %5340 = vmatpush2.bf16.msra.mxu0 %v8203_v28  ;;  %v8093_v28 = vcombine.low %v727_v16, %v735_v17  ;;  %v623_v13 = vld [vmem:[%s9577_s11 + $0x6d0] sm:$0xff] }
 0x149   : > { %5381 = vmatpush2.bf16.msra.mxu1 %v8459_v30  ;;  %5341 = vmatprep.subr.bf16.mxu0 %v8188_v31  ;;  %v7822_v30 = vcombine.high %v455_v22, %v463_v24  ;;  %v8078_v31 = vcombine.high %v711_v25, %v719_v26  ;;  %v871_v15 = vld [vmem:[%s9577_s11 + $0xe90] sm:$0xff] }
 0x14a   : > { %5382 = vmatprep.subr.bf16.mxu1 %v8444_v36  ;;  %v703_v36 = vld [vmem:[%s9577_s11 + $0x950] sm:$0xff] }
 0x14b   : > { %v879_v16 = vld [vmem:[%s9577_s11 + $0xed0] sm:$0xff] }
 0x14c   : > { %5342 = vmatpush2.bf16.msra.mxu0 %v8187_v38  ;;  %v8077_v38 = vcombine.low %v711_v25, %v719_v26  ;;  %v607_v22 = vld [vmem:[%s9577_s11 + $0x650] sm:$0xff] }
 0x14d   : > { %5383 = vmatpush2.bf16.msra.mxu1 %v8443_v39  ;;  %5343 = vmatprep.subr.bf16.mxu0 %v8172_v29  ;;  %v7806_v39 = vcombine.high %v439_v32, %v447_v34  ;;  %v8062_v29 = vcombine.high %v695_v35, %v703_v36  ;;  %v855_v24 = vld [vmem:[%s9577_s11 + $0xe10] sm:$0xff] }
 0x14e   : > { %5384 = vmatprep.subr.bf16.mxu1 %v8428_v45  ;;  %v687_v45 = vld [vmem:[%s9577_s11 + $0x8d0] sm:$0xff] }
 0x14f   : > { %v863_v25 = vld [vmem:[%s9577_s11 + $0xe50] sm:$0xff] }
 0x150   : > { %5344 = vmatpush2.bf16.msra.mxu0 %v8171_v47  ;;  %v8061_v47 = vcombine.low %v695_v35, %v703_v36  ;;  %v591_v32 = vld [vmem:[%s9577_s11 + $0x5d0] sm:$0xff] }
 0x151   : > { %5385 = vmatpush2.bf16.msra.mxu1 %v8427_v48  ;;  %5345 = vmatprep.subr.bf16.mxu0 %v8156_v54  ;;  %v7790_v48 = vcombine.high %v423_v40, %v431_v42  ;;  %v8046_v54 = vcombine.high %v679_v43, %v687_v45  ;;  %v839_v34 = vld [vmem:[%s9577_s11 + $0xd90] sm:$0xff] }
 0x152   : > { %5386 = vmatprep.subr.bf16.mxu1 %v8412_v52  ;;  %v671_v52 = vld [vmem:[%s9577_s11 + $0x850] sm:$0xff] }
 0x153   : > { %v847_v35 = vld [vmem:[%s9577_s11 + $0xdd0] sm:$0xff] }
 0x154   : > { %5346 = vmatpush2.bf16.msra.mxu0 %v8155_v55  ;;  %v8045_v55 = vcombine.low %v679_v43, %v687_v45  ;;  %v575_v40 = vld [vmem:[%s9577_s11 + $0x550] sm:$0xff] }
 0x155   : > { %5387 = vmatpush2.bf16.msra.mxu1 %v8411_v56  ;;  %5397 = vmatprep.subr.bf16.mxu0 %v7886_v57  ;;  %v7774_v56 = vcombine.high %v407_v49, %v415_v50  ;;  %v8030_v57 = vcombine.high %v663_v51, %v671_v52  ;;  %v823_v42 = vld [vmem:[%s9577_s11 + $0xd10] sm:$0xff] }
 0x156   : > { %5438 = vmatprep.subr.bf16.mxu1 %v8142_v61  ;;  %v911_v61 = vld [vmem:[%s9577_s11 + $0xfd0] sm:$0xff] }
 0x157   : > { %5348 = vmatmul.mubr.bf16.vlgmr.msra.gmra.mxu0 %v9707_v0  ;;  %v831_v43 = vld [vmem:[%s9577_s11 + $0xd50] sm:$0xff] }
 0x158   : > { %5389 = vmatmul.mubr.bf16.vlgmr.msra.gmra.mxu1 %v9669_v33  ;;  %5398 = vmatpush1.bf16.msra.mxu0 %v7885_v63  ;;  %v8029_v63 = vcombine.low %v663_v51, %v671_v52  ;;  %v559_v49 = vld [vmem:[%s9577_s11 + $0x4d0] sm:$0xff] }
 0x159   : > { %5439 = vmatpush1.bf16.msra.mxu1 %v8141_v1  ;;  %5399 = vmatprep.subr.bf16.mxu0 %v7870_v2  ;;  %v8014_v1 = vcombine.high %v647_v58, %v655_v59  ;;  %v8270_v2 = vcombine.high %v903_v60, %v911_v61  ;;  %v807_v50 = vld [vmem:[%s9577_s11 + $0xc90] sm:$0xff] }
 0x15a   : > { %5440 = vmatprep.subr.bf16.mxu1 %v8126_v3  ;;  %5429 = vmatprep.mubr.bf16.mxu0 %v9646_v10  ;;  %v631_v3 = vld [vmem:[%s9577_s11 + $0x710] sm:$0xff] }
 0x15b   : > { %5470 = vmatprep.mubr.bf16.mxu1 %v9653_v14  ;;  %v7997_v17 = vcombine.low %v631_v3, %v639_v4  ;;  %v815_v51 = vld [vmem:[%s9577_s11 + $0xcd0] sm:$0xff] }
 0x15c   : > { %5400 = vmatpush1.bf16.msra.mxu0 %v7869_v8  ;;  %v8269_v8 = vcombine.low %v903_v60, %v911_v61  ;;  %v543_v58 = vld [vmem:[%s9577_s11 + $0x450] sm:$0xff] }
 0x15d   : > { %5441 = vmatpush1.bf16.msra.mxu1 %v8125_v9  ;;  %5401 = vmatprep.subr.bf16.mxu0 %v7854_v11  ;;  %v7998_v9 = vcombine.high %v631_v3, %v639_v4  ;;  %v8254_v11 = vcombine.high %v887_v5, %v895_v6  ;;  %v791_v59 = vld [vmem:[%s9577_s11 + $0xc10] sm:$0xff]  ;;  %v520_v4 = vld [vmem:[%s9577_s11 + $0x398] sm:$0xff] }
 0x15e   : > { %5442 = vmatprep.subr.bf16.mxu1 %v8110_v12  ;;  %v615_v12 = vld [vmem:[%s9577_s11 + $0x690] sm:$0xff] }
 0x15f   : > { %v7981_v26 = vcombine.low %v615_v12, %v623_v13  ;;  %v799_v60 = vld [vmem:[%s9577_s11 + $0xc50] sm:$0xff] }
 0x160   : > { %5402 = vmatpush1.bf16.msra.mxu0 %v7853_v18  ;;  %v8253_v18 = vcombine.low %v887_v5, %v895_v6  ;;  %v1039_v3 = vld [vmem:[%s9577_s11 + $0x13d0] sm:$0xff]  ;;  %v528_v5 = vld [vmem:[%s9577_s11 + $0x3d8] sm:$0xff] }
 0x161   : > { %5443 = vmatpush1.bf16.msra.mxu1 %v8109_v19  ;;  %5403 = vmatprep.subr.bf16.mxu0 %v7838_v20  ;;  %v7982_v19 = vcombine.high %v615_v12, %v623_v13  ;;  %v8238_v20 = vcombine.high %v871_v15, %v879_v16  ;;  %v7888_v12 = vcombine.high %v520_v4, %v528_v5  ;;  %v1183_v13 = vsub.s32 1, %v9623_v44 }
 0x162   : > { %5444 = vmatprep.subr.bf16.mxu1 %v8094_v21  ;;  %v599_v21 = vld [vmem:[%s9577_s11 + $0x610] sm:$0xff] }
 0x163   : > { %v7965_v36 = vcombine.low %v599_v21, %v607_v22 }
 0x164   : > { %5404 = vmatpush1.bf16.msra.mxu0 %v7837_v27  ;;  %v8237_v27 = vcombine.low %v871_v15, %v879_v16  ;;  %v1015_v15 = vld [vmem:[%s9577_s11 + $0x1310] sm:$0xff] }
 0x165   : > { %5445 = vmatpush1.bf16.msra.mxu1 %v8093_v28  ;;  %5405 = vmatprep.subr.bf16.mxu0 %v7822_v30  ;;  %v7966_v28 = vcombine.high %v599_v21, %v607_v22  ;;  %v8222_v30 = vcombine.high %v855_v24, %v863_v25  ;;  %v1023_v16 = vld [vmem:[%s9577_s11 + $0x1350] sm:$0xff]  ;;  %v7887_v21 = vcombine.low %v520_v4, %v528_v5  ;;  %v440_v4 = vld [vmem:[%s9577_s11 + $0x118] sm:$0xff] }
 0x166   : > { %5446 = vmatprep.subr.bf16.mxu1 %v8078_v31  ;;  %v583_v31 = vld [vmem:[%s9577_s11 + $0x590] sm:$0xff]  ;;  %v8382_v22 = vcombine.high %v1015_v15, %v1023_v16  ;;  %v448_v5 = vld [vmem:[%s9577_s11 + $0x158] sm:$0xff] }
 0x167   : > { %v7949_v45 = vcombine.low %v583_v31, %v591_v32 }
 0x168   : > { %5406 = vmatpush1.bf16.msra.mxu0 %v7821_v37  ;;  %v8221_v37 = vcombine.low %v855_v24, %v863_v25 }
 0x169   : > { %5447 = vmatpush1.bf16.msra.mxu1 %v8077_v38  ;;  %5407 = vmatprep.subr.bf16.mxu0 %v7806_v39  ;;  %v7950_v38 = vcombine.high %v583_v31, %v591_v32  ;;  %v8206_v39 = vcombine.high %v839_v34, %v847_v35  ;;  %v496_v31 = vld [vmem:[%s9577_s11 + $0x2d8] sm:$0xff] }
 0x16a   : > { %5448 = vmatprep.subr.bf16.mxu1 %v8062_v29  ;;  %v567_v29 = vld [vmem:[%s9577_s11 + $0x510] sm:$0xff] }
 0x16b   : > { %v7933_v52 = vcombine.low %v567_v29, %v575_v40 }
 0x16c   : > { %5408 = vmatpush1.bf16.msra.mxu0 %v7805_v46  ;;  %v8205_v46 = vcombine.low %v839_v34, %v847_v35  ;;  %v8381_v35 = vcombine.low %v1015_v15, %v1023_v16  ;;  %v935_v15 = vld [vmem:[%s9577_s11 + $0x1090] sm:$0xff] }
 0x16d   : > { %5449 = vmatpush1.bf16.msra.mxu1 %v8061_v47  ;;  %5409 = vmatprep.subr.bf16.mxu0 %v7790_v48  ;;  %v7934_v47 = vcombine.high %v567_v29, %v575_v40  ;;  %v8190_v48 = vcombine.high %v823_v42, %v831_v43  ;;  %v943_v16 = vld [vmem:[%s9577_s11 + $0x10d0] sm:$0xff] }
 0x16e   : > { %5450 = vmatprep.subr.bf16.mxu1 %v8046_v54  ;;  %v551_v54 = vld [vmem:[%s9577_s11 + $0x490] sm:$0xff] }
 0x16f   : > { %v7917_v61 = vcombine.low %v551_v54, %v559_v49 }
 0x170   : > { %5410 = vmatpush1.bf16.msra.mxu0 %v7789_v53  ;;  %v8189_v53 = vcombine.low %v823_v42, %v831_v43  ;;  %v983_v43 = vld [vmem:[%s9577_s11 + $0x1210] sm:$0xff] }
 0x171   : > { %5451 = vmatpush1.bf16.msra.mxu1 %v8045_v55  ;;  %5411 = vmatprep.subr.bf16.mxu0 %v7774_v56  ;;  %v7918_v55 = vcombine.high %v551_v54, %v559_v49  ;;  %v8174_v56 = vcombine.high %v807_v50, %v815_v51 }
 0x172   : > { %5452 = vmatprep.subr.bf16.mxu1 %v8030_v57  ;;  %v535_v57 = vld [vmem:[%s9577_s11 + $0x410] sm:$0xff] }
 0x173   : > { %v7901_v6 = vcombine.low %v535_v57, %v543_v58 }
 0x174   : > { %5412 = vmatpush1.bf16.msra.mxu0 %v7773_v62  ;;  %v8173_v62 = vcombine.low %v807_v50, %v815_v51 }
 0x175   : > { %5453 = vmatpush1.bf16.msra.mxu1 %v8029_v63  ;;  %5413 = vmatprep.subr.bf16.mxu0 %v8014_v1  ;;  %v7902_v63 = vcombine.high %v535_v57, %v543_v58  ;;  %v8158_v1 = vcombine.high %v791_v59, %v799_v60  ;;  %v967_v57 = vld [vmem:[%s9577_s11 + $0x1190] sm:$0xff] }
 0x176   : > { %5454 = vmatprep.subr.bf16.mxu1 %v8270_v2  ;;  %v1031_v2 = vld [vmem:[%s9577_s11 + $0x1390] sm:$0xff] }
 0x177   : > { %v975_v58 = vld [vmem:[%s9577_s11 + $0x11d0] sm:$0xff] }
 0x178   : > { %5414 = vmatpush2.bf16.msra.mxu0 %v8013_v7  ;;  %v1179_v7 = vsub.s32 0, %v9623_v44 }
 0x179   : > { %5455 = vmatpush2.bf16.msra.mxu1 %v8269_v8  ;;  %5415 = vmatprep.subr.bf16.mxu0 %v7998_v9  ;;  %v8157_v8 = vcombine.low %v791_v59, %v799_v60  ;;  %v9914_v9 = vld [vmem:[%s9583_s9] sm:$0xff]  ;;  %v456_v59 = vld [vmem:[%s9577_s11 + $0x198] sm:$0xff] }
 0x17a   : > { %5456 = vmatprep.subr.bf16.mxu1 %v8254_v11  ;;  %v8398_v11 = vcombine.high %v1031_v2, %v1039_v3  ;;  %v1184_v24 = vrot.slane %v9914_v9, %v1183_v13  ;;  %v464_v60 = vld [vmem:[%s9577_s11 + $0x1d8] sm:$0xff] }
 0x17c   : > { %5416 = vmatpush2.bf16.msra.mxu0 %v7997_v17  ;;  %v504_v17 = vld [vmem:[%s9577_s11 + $0x318] sm:$0xff] }
 0x17d   : > { %5457 = vmatpush2.bf16.msra.mxu1 %v8253_v18  ;;  %5417 = vmatprep.subr.bf16.mxu0 %v7982_v19  ;;  %v512_v18 = vld [vmem:[%s9577_s11 + $0x358] sm:$0xff]  ;;  %v1180_v19 = vrot.slane %v9914_v9, %v1179_v7 }
 0x17e   : > { %5458 = vmatprep.subr.bf16.mxu1 %v8238_v20  ;;  %v8397_v20 = vcombine.low %v1031_v2, %v1039_v3  ;;  %v7872_v25 = vcombine.high %v504_v17, %v512_v18  ;;  %v951_v2 = vld [vmem:[%s9577_s11 + $0x1110] sm:$0xff] }
 0x17f   : > { %v959_v3 = vld [vmem:[%s9577_s11 + $0x1150] sm:$0xff] }
 0x180   : > { %5418 = vmatpush2.bf16.msra.mxu0 %v7981_v26  ;;  %v999_v26 = vld [vmem:[%s9577_s11 + $0x1290] sm:$0xff] }
 0x181   : > { %5459 = vmatpush2.bf16.msra.mxu1 %v8237_v27  ;;  %5419 = vmatprep.subr.bf16.mxu0 %v7966_v28  ;;  %v1007_v27 = vld [vmem:[%s9577_s11 + $0x12d0] sm:$0xff] }
 0x182   : > { %5460 = vmatprep.subr.bf16.mxu1 %v8222_v30  ;;  %v488_v30 = vld [vmem:[%s9577_s11 + $0x298] sm:$0xff]  ;;  %v8365_v50 = vcombine.low %v999_v26, %v1007_v27 }
 0x183   : > { %v7856_v42 = vcombine.high %v488_v30, %v496_v31 }
 0x184   : > { %5420 = vmatpush2.bf16.msra.mxu0 %v7965_v36 }
 0x185   : > { %5461 = vmatpush2.bf16.msra.mxu1 %v8221_v37  ;;  %5421 = vmatprep.subr.bf16.mxu0 %v7950_v38  ;;  %v7871_v37 = vcombine.low %v504_v17, %v512_v18  ;;  %v8366_v38 = vcombine.high %v999_v26, %v1007_v27  ;;  %v424_v17 = vld [vmem:[%s9577_s11 + $0x98] sm:$0xff] }
 0x186   : > { %5462 = vmatprep.subr.bf16.mxu1 %v8206_v39  ;;  %v432_v18 = vld [vmem:[%s9577_s11 + $0xd8] sm:$0xff] }
 0x187   : > { %v408_v26 = vld [vmem:[%s9577_s11 + $0x18] sm:$0xff] }
 0x188   : > { %5422 = vmatpush2.bf16.msra.mxu0 %v7949_v45  ;;  %v991_v45 = vld [vmem:[%s9577_s11 + $0x1250] sm:$0xff]  ;;  %v416_v27 = vld [vmem:[%s9577_s11 + $0x58] sm:$0xff] }
 0x189   : > { %5463 = vmatpush2.bf16.msra.mxu1 %v8205_v46  ;;  %5423 = vmatprep.subr.bf16.mxu0 %v7934_v47  ;;  %v472_v47 = vld [vmem:[%s9577_s11 + $0x218] sm:$0xff] }
 0x18a   : > { %5464 = vmatprep.subr.bf16.mxu1 %v8190_v48  ;;  %v480_v48 = vld [vmem:[%s9577_s11 + $0x258] sm:$0xff] }
 0x18c   : > { %5424 = vmatpush2.bf16.msra.mxu0 %v7933_v52  ;;  %v7855_v52 = vcombine.low %v488_v30, %v496_v31  ;;  %v7791_v30 = vcombine.low %v424_v17, %v432_v18 }
 0x18d   : > { %5465 = vmatpush2.bf16.msra.mxu1 %v8189_v53  ;;  %5425 = vmatprep.subr.bf16.mxu0 %v7918_v55  ;;  %v8350_v53 = vcombine.high %v983_v43, %v991_v45 }
 0x18e   : > { %5466 = vmatprep.subr.bf16.mxu1 %v8174_v56  ;;  %v7840_v56 = vcombine.high %v472_v47, %v480_v48 }
 0x190   : > { %5426 = vmatpush2.bf16.msra.mxu0 %v7917_v61  ;;  %v8349_v61 = vcombine.low %v983_v43, %v991_v45  ;;  %v1143_v43 = vld [vmem:[%s9577_s11 + $0x1710] sm:$0xff] }
 0x191   : > { %5467 = vmatpush2.bf16.msra.mxu1 %v8173_v62  ;;  %5427 = vmatprep.subr.bf16.mxu0 %v7902_v63  ;;  %v7839_v62 = vcombine.low %v472_v47, %v480_v48  ;;  %v8334_v63 = vcombine.high %v967_v57, %v975_v58  ;;  %v1151_v45 = vld [vmem:[%s9577_s11 + $0x1750] sm:$0xff]  ;;  %v640_v47 = vld [vmem:[%s9577_s11 + $0x758] sm:$0xff] }
 0x192   : > { %5468 = vmatprep.subr.bf16.mxu1 %v8158_v1  ;;  %v7824_v1 = vcombine.high %v456_v59, %v464_v60 }
 0x194   : > { %5428 = vmatpush2.bf16.msra.mxu0 %v7901_v6  ;;  %v8333_v6 = vcombine.low %v967_v57, %v975_v58  ;;  %v8509_v57 = vcombine.low %v1143_v43, %v1151_v45 }
 0x195   : > { %5469 = vmatpush2.bf16.msra.mxu1 %v8157_v8  ;;  %5479 = vmatprep.subr.bf16.mxu0 %v8398_v11  ;;  %v7823_v8 = vcombine.low %v456_v59, %v464_v60  ;;  %v8318_v11 = vcombine.high %v951_v2, %v959_v3 }
 0x196   : > { %5520 = vmatprep.subr.bf16.mxu1 %v7888_v12  ;;  %v7808_v12 = vcombine.high %v440_v4, %v448_v5 }
 0x197   : > { %v5185_v28 = vpop.f32.mrf.mxu0  ;;  %5430 = vmatmul.mubr.bf16.vlgmr.msra.gmra.mxu0 %v9697_v23 }
 0x198   : > { %v5186_v32 = vadd.f32 %v5185_v28, %v1180_v19  ;;  %v5226_v34 = vpop.f32.mrf.mxu1  ;;  %5471 = vmatmul.mubr.bf16.vlgmr.msra.gmra.mxu1 %v9707_v0  ;;  %5480 = vmatpush1.bf16.msra.mxu0 %v8397_v20  ;;  %v8317_v19 = vcombine.low %v951_v2, %v959_v3  ;;  %v7807_v20 = vcombine.low %v440_v4, %v448_v5 }
 0x199   : > { %5521 = vmatpush1.bf16.msra.mxu1 %v7887_v21  ;;  %v5187_v36 = vpop.f32.mrf.mxu0  ;;  %5481 = vmatprep.subr.bf16.mxu0 %v8382_v22  ;;  %v8302_v21 = vcombine.high %v935_v15, %v943_v16  ;;  %v7792_v22 = vcombine.high %v424_v17, %v432_v18  ;;  %v8301_v28 = vcombine.low %v935_v15, %v943_v16 }
 0x19a   : > { %v9933_v39 = vadd.f32 %v5226_v34, %v5186_v32  ;;  %v5188_v29 = vadd.f32 %v5187_v36, %v1184_v24  ;;  %v5228_v40 = vpop.f32.mrf.mxu1  ;;  %5522 = vmatprep.subr.bf16.mxu1 %v7872_v25  ;;  %5511 = vmatprep.mubr.bf16.mxu0 %v9714_v41  ;;  %v919_v24 = vld [vmem:[%s9577_s11 + $0x1010] sm:$0xff]  ;;  %v7776_v32 = vcombine.high %v408_v26, %v416_v27  ;;  %v648_v36 = vld [vmem:[%s9577_s11 + $0x798] sm:$0xff] }
 0x19b   : > { %v5189_v46 = vpop.f32.mrf.mxu0  ;;  %5552 = vmatprep.mubr.bf16.mxu1 %v9646_v10  ;;  %v927_v25 = vld [vmem:[%s9577_s11 + $0x1050] sm:$0xff] }
 0x19c   : > { %v9941_v54 = vadd.f32 %v5228_v40, %v5188_v29  ;;  %v5230_v49 = vpop.f32.mrf.mxu1  ;;  %5482 = vmatpush1.bf16.msra.mxu0 %v8381_v35  ;;  %v8286_v31 = vcombine.high %v919_v24, %v927_v25  ;;  %v1159_v34 = vld [vmem:[%s9577_s11 + $0x1790] sm:$0xff]  ;;  %v7775_v29 = vcombine.low %v408_v26, %v416_v27  ;;  %v632_v46 = vld [vmem:[%s9577_s11 + $0x718] sm:$0xff] }
 0x19d   : > { %5523 = vmatpush1.bf16.msra.mxu1 %v7871_v37  ;;  %v5190_v51 = vpop.f32.mrf.mxu0  ;;  %5483 = vmatprep.subr.bf16.mxu0 %v8366_v38  ;;  %v1167_v35 = vld [vmem:[%s9577_s11 + $0x17d0] sm:$0xff]  ;;  %v656_v37 = vld [vmem:[%s9577_s11 + $0x7d8] sm:$0xff]  ;;  %v8285_v38 = vcombine.low %v919_v24, %v927_v25  ;;  %v7999_v58 = vcombine.low %v632_v46, %v640_v47 }
 0x19e   : > { %v5231_v55 = vpop.f32.mrf.mxu1  ;;  %5524 = vmatprep.subr.bf16.mxu1 %v7856_v42  ;;  %v8526_v40 = vcombine.high %v1159_v34, %v1167_v35  ;;  %v8016_v42 = vcombine.high %v648_v36, %v656_v37  ;;  %v8525_v48 = vcombine.low %v1159_v34, %v1167_v35  ;;  %v8015_v49 = vcombine.low %v648_v36, %v656_v37 }
 0x19f   : > { %v8000_v51 = vcombine.high %v632_v46, %v640_v47  ;;  %v616_v55 = vld [vmem:[%s9577_s11 + $0x698] sm:$0xff] }
 0x1a0   : > { %5484 = vmatpush1.bf16.msra.mxu0 %v8365_v50  ;;  %v8510_v50 = vcombine.high %v1143_v43, %v1151_v45 }
 0x1a1   : > { %5525 = vmatpush1.bf16.msra.mxu1 %v7855_v52  ;;  %5485 = vmatprep.subr.bf16.mxu0 %v8350_v53  ;;  %v1127_v52 = vld [vmem:[%s9577_s11 + $0x1690] sm:$0xff] }
 0x1a2   : > { %5526 = vmatprep.subr.bf16.mxu1 %v7840_v56  ;;  %v1135_v53 = vld [vmem:[%s9577_s11 + $0x16d0] sm:$0xff]  ;;  %v624_v56 = vld [vmem:[%s9577_s11 + $0x6d8] sm:$0xff] }
 0x1a3   : > { %v8494_v59 = vcombine.high %v1127_v52, %v1135_v53  ;;  %v7984_v60 = vcombine.high %v616_v55, %v624_v56  ;;  %v8493_v2 = vcombine.low %v1127_v52, %v1135_v53  ;;  %v7983_v3 = vcombine.low %v616_v55, %v624_v56 }
 0x1a4   : > { %5486 = vmatpush1.bf16.msra.mxu0 %v8349_v61  ;;  %v1111_v61 = vld [vmem:[%s9577_s11 + $0x1610] sm:$0xff] }
 0x1a5   : > { %5527 = vmatpush1.bf16.msra.mxu1 %v7839_v62  ;;  %5487 = vmatprep.subr.bf16.mxu0 %v8334_v63  ;;  %v1119_v62 = vld [vmem:[%s9577_s11 + $0x1650] sm:$0xff]  ;;  %v600_v63 = vld [vmem:[%s9577_s11 + $0x618] sm:$0xff] }
 0x1a6   : > { %5528 = vmatprep.subr.bf16.mxu1 %v7824_v1  ;;  %v608_v1 = vld [vmem:[%s9577_s11 + $0x658] sm:$0xff]  ;;  %v8478_v4 = vcombine.high %v1111_v61, %v1119_v62  ;;  %v8477_v15 = vcombine.low %v1111_v61, %v1119_v62 }
 0x1a7   : > { %v7968_v5 = vcombine.high %v600_v63, %v608_v1  ;;  %v7967_v16 = vcombine.low %v600_v63, %v608_v1 }
 0x1a8   : > { %5488 = vmatpush1.bf16.msra.mxu0 %v8333_v6  ;;  %v1095_v6 = vld [vmem:[%s9577_s11 + $0x1590] sm:$0xff] }
 0x1a9   : > { %5529 = vmatpush1.bf16.msra.mxu1 %v7823_v8  ;;  %5489 = vmatprep.subr.bf16.mxu0 %v8318_v11  ;;  %v1103_v8 = vld [vmem:[%s9577_s11 + $0x15d0] sm:$0xff]  ;;  %v584_v11 = vld [vmem:[%s9577_s11 + $0x598] sm:$0xff] }
 0x1aa   : > { %5530 = vmatprep.subr.bf16.mxu1 %v7808_v12  ;;  %v592_v12 = vld [vmem:[%s9577_s11 + $0x5d8] sm:$0xff]  ;;  %v8462_v17 = vcombine.high %v1095_v6, %v1103_v8  ;;  %v8461_v24 = vcombine.low %v1095_v6, %v1103_v8 }
 0x1ab   : > { %v7952_v18 = vcombine.high %v584_v11, %v592_v12  ;;  %v7951_v25 = vcombine.low %v584_v11, %v592_v12  ;;  %v1008_v6 = vld [vmem:[%s9577_s11 + $0x12d8] sm:$0xff] }
 0x1ac   : > { %5490 = vmatpush1.bf16.msra.mxu0 %v8317_v19  ;;  %v1079_v19 = vld [vmem:[%s9577_s11 + $0x1510] sm:$0xff] }
 0x1ad   : > { %5531 = vmatpush1.bf16.msra.mxu1 %v7807_v20  ;;  %5491 = vmatprep.subr.bf16.mxu0 %v8302_v21  ;;  %v1087_v20 = vld [vmem:[%s9577_s11 + $0x1550] sm:$0xff]  ;;  %v568_v21 = vld [vmem:[%s9577_s11 + $0x518] sm:$0xff] }
 0x1ae   : > { %5532 = vmatprep.subr.bf16.mxu1 %v7792_v22  ;;  %v576_v22 = vld [vmem:[%s9577_s11 + $0x558] sm:$0xff]  ;;  %v8446_v26 = vcombine.high %v1079_v19, %v1087_v20  ;;  %v8445_v34 = vcombine.low %v1079_v19, %v1087_v20 }
 0x1af   : > { %v7936_v27 = vcombine.high %v568_v21, %v576_v22  ;;  %v7935_v35 = vcombine.low %v568_v21, %v576_v22  ;;  %v728_v20 = vld [vmem:[%s9577_s11 + $0xa18] sm:$0xff] }
 0x1b0   : > { %5492 = vmatpush1.bf16.msra.mxu0 %v8301_v28  ;;  %v1063_v28 = vld [vmem:[%s9577_s11 + $0x1490] sm:$0xff]  ;;  %v736_v21 = vld [vmem:[%s9577_s11 + $0xa58] sm:$0xff] }
 0x1b1   : > { %5533 = vmatpush1.bf16.msra.mxu1 %v7791_v30  ;;  %5493 = vmatprep.subr.bf16.mxu0 %v8286_v31  ;;  %v1071_v30 = vld [vmem:[%s9577_s11 + $0x14d0] sm:$0xff]  ;;  %v552_v31 = vld [vmem:[%s9577_s11 + $0x498] sm:$0xff] }
 0x1b2   : > { %5534 = vmatprep.subr.bf16.mxu1 %v7776_v32  ;;  %v560_v32 = vld [vmem:[%s9577_s11 + $0x4d8] sm:$0xff]  ;;  %v8430_v36 = vcombine.high %v1063_v28, %v1071_v30  ;;  %v8429_v43 = vcombine.low %v1063_v28, %v1071_v30  ;;  %v8096_v30 = vcombine.high %v728_v20, %v736_v21 }
 0x1b3   : > { %v7920_v37 = vcombine.high %v552_v31, %v560_v32  ;;  %v7919_v45 = vcombine.low %v552_v31, %v560_v32 }
 0x1b4   : > { %5494 = vmatpush1.bf16.msra.mxu0 %v8285_v38  ;;  %v1047_v38 = vld [vmem:[%s9577_s11 + $0x1410] sm:$0xff] }
 0x1b5   : > { %5535 = vmatpush1.bf16.msra.mxu1 %v7775_v29  ;;  %5495 = vmatprep.subr.bf16.mxu0 %v8526_v40  ;;  %v1055_v29 = vld [vmem:[%s9577_s11 + $0x1450] sm:$0xff]  ;;  %v536_v40 = vld [vmem:[%s9577_s11 + $0x418] sm:$0xff] }
 0x1b6   : > { %5536 = vmatprep.subr.bf16.mxu1 %v8016_v42  ;;  %v544_v42 = vld [vmem:[%s9577_s11 + $0x458] sm:$0xff]  ;;  %v8414_v46 = vcombine.high %v1047_v38, %v1055_v29  ;;  %v8413_v52 = vcombine.low %v1047_v38, %v1055_v29  ;;  %v8095_v38 = vcombine.low %v728_v20, %v736_v21 }
 0x1b7   : > { %v7904_v47 = vcombine.high %v536_v40, %v544_v42  ;;  %v7903_v53 = vcombine.low %v536_v40, %v544_v42 }
 0x1b8   : > { %5496 = vmatpush2.bf16.msra.mxu0 %v8525_v48  ;;  %v776_v48 = vld [vmem:[%s9577_s11 + $0xb98] sm:$0xff] }
 0x1b9   : > { %5537 = vmatpush2.bf16.msra.mxu1 %v8015_v49  ;;  %5497 = vmatprep.subr.bf16.mxu0 %v8510_v50  ;;  %v784_v49 = vld [vmem:[%s9577_s11 + $0xbd8] sm:$0xff] }
 0x1ba   : > { %5538 = vmatprep.subr.bf16.mxu1 %v8000_v51  ;;  %v1032_v50 = vld [vmem:[%s9577_s11 + $0x1398] sm:$0xff]  ;;  %v8144_v55 = vcombine.high %v776_v48, %v784_v49  ;;  %v8143_v61 = vcombine.low %v776_v48, %v784_v49 }
 0x1bb   : > { %v1040_v51 = vld [vmem:[%s9577_s11 + $0x13d8] sm:$0xff] }
 0x1bc   : > { %5498 = vmatpush2.bf16.msra.mxu0 %v8509_v57  ;;  %v8400_v56 = vcombine.high %v1032_v50, %v1040_v51  ;;  %v760_v57 = vld [vmem:[%s9577_s11 + $0xb18] sm:$0xff]  ;;  %v8399_v62 = vcombine.low %v1032_v50, %v1040_v51 }
 0x1bd   : > { %5539 = vmatpush2.bf16.msra.mxu1 %v7999_v58  ;;  %5499 = vmatprep.subr.bf16.mxu0 %v8494_v59  ;;  %v768_v58 = vld [vmem:[%s9577_s11 + $0xb58] sm:$0xff] }
 0x1be   : > { %5540 = vmatprep.subr.bf16.mxu1 %v7984_v60  ;;  %v1016_v59 = vld [vmem:[%s9577_s11 + $0x1318] sm:$0xff]  ;;  %v8128_v63 = vcombine.high %v760_v57, %v768_v58  ;;  %v8127_v12 = vcombine.low %v760_v57, %v768_v58 }
 0x1bf   : > { %v1024_v60 = vld [vmem:[%s9577_s11 + $0x1358] sm:$0xff] }
 0x1c0   : > { %5500 = vmatpush2.bf16.msra.mxu0 %v8493_v2  ;;  %v8384_v1 = vcombine.high %v1016_v59, %v1024_v60  ;;  %v744_v2 = vld [vmem:[%s9577_s11 + $0xa98] sm:$0xff] }
 0x1c1   : > { %5541 = vmatpush2.bf16.msra.mxu1 %v7983_v3  ;;  %5501 = vmatprep.subr.bf16.mxu0 %v8478_v4  ;;  %v752_v3 = vld [vmem:[%s9577_s11 + $0xad8] sm:$0xff] }
 0x1c2   : > { %5542 = vmatprep.subr.bf16.mxu1 %v7968_v5  ;;  %v1000_v5 = vld [vmem:[%s9577_s11 + $0x1298] sm:$0xff] }
 0x1c3   : > { %v8367_v28 = vcombine.low %v1000_v5, %v1008_v6 }
 0x1c4   : > { %5502 = vmatpush2.bf16.msra.mxu0 %v8477_v15 }
 0x1c5   : > { %5543 = vmatpush2.bf16.msra.mxu1 %v7967_v16  ;;  %5503 = vmatprep.subr.bf16.mxu0 %v8462_v17  ;;  %v8383_v16 = vcombine.low %v1016_v59, %v1024_v60  ;;  %v8112_v17 = vcombine.high %v744_v2, %v752_v3 }
 0x1c6   : > { %5544 = vmatprep.subr.bf16.mxu1 %v7952_v18 }
 0x1c8   : > { %5504 = vmatpush2.bf16.msra.mxu0 %v8461_v24  ;;  %v984_v24 = vld [vmem:[%s9577_s11 + $0x1218] sm:$0xff] }
 0x1c9   : > { %5545 = vmatpush2.bf16.msra.mxu1 %v7951_v25  ;;  %5505 = vmatprep.subr.bf16.mxu0 %v8446_v26  ;;  %v992_v25 = vld [vmem:[%s9577_s11 + $0x1258] sm:$0xff] }
 0x1ca   : > { %5546 = vmatprep.subr.bf16.mxu1 %v7936_v27  ;;  %v8352_v32 = vcombine.high %v984_v24, %v992_v25  ;;  %v8351_v29 = vcombine.low %v984_v24, %v992_v25  ;;  %v896_v24 = vld [vmem:[%s9577_s11 + $0xf58] sm:$0xff] }
 0x1cb   : > { %v1144_v25 = vld [vmem:[%s9577_s11 + $0x1718] sm:$0xff] }
 0x1cc   : > { %5506 = vmatpush2.bf16.msra.mxu0 %v8445_v34  ;;  %v712_v34 = vld [vmem:[%s9577_s11 + $0x998] sm:$0xff] }
 0x1cd   : > { %5547 = vmatpush2.bf16.msra.mxu1 %v7935_v35  ;;  %5507 = vmatprep.subr.bf16.mxu0 %v8430_v36  ;;  %v720_v35 = vld [vmem:[%s9577_s11 + $0x9d8] sm:$0xff] }
 0x1ce   : > { %5548 = vmatprep.subr.bf16.mxu1 %v7920_v37  ;;  %v968_v36 = vld [vmem:[%s9577_s11 + $0x1198] sm:$0xff]  ;;  %v8080_v40 = vcombine.high %v712_v34, %v720_v35  ;;  %v8079_v48 = vcombine.low %v712_v34, %v720_v35 }
 0x1cf   : > { %v976_v37 = vld [vmem:[%s9577_s11 + $0x11d8] sm:$0xff] }
 0x1d0   : > { %5508 = vmatpush2.bf16.msra.mxu0 %v8429_v43  ;;  %v8336_v42 = vcombine.high %v968_v36, %v976_v37  ;;  %v696_v43 = vld [vmem:[%s9577_s11 + $0x918] sm:$0xff]  ;;  %v8335_v49 = vcombine.low %v968_v36, %v976_v37 }
 0x1d1   : > { %5549 = vmatpush2.bf16.msra.mxu1 %v7919_v45  ;;  %5509 = vmatprep.subr.bf16.mxu0 %v8414_v46  ;;  %v704_v45 = vld [vmem:[%s9577_s11 + $0x958] sm:$0xff] }
 0x1d2   : > { %5550 = vmatprep.subr.bf16.mxu1 %v7904_v47  ;;  %v952_v46 = vld [vmem:[%s9577_s11 + $0x1118] sm:$0xff]  ;;  %v8064_v50 = vcombine.high %v696_v43, %v704_v45  ;;  %v8063_v57 = vcombine.low %v696_v43, %v704_v45 }
 0x1d3   : > { %v960_v47 = vld [vmem:[%s9577_s11 + $0x1158] sm:$0xff] }
 0x1d4   : > { %5510 = vmatpush2.bf16.msra.mxu0 %v8413_v52  ;;  %v8320_v51 = vcombine.high %v952_v46, %v960_v47  ;;  %v680_v52 = vld [vmem:[%s9577_s11 + $0x898] sm:$0xff]  ;;  %v8319_v58 = vcombine.low %v952_v46, %v960_v47 }
 0x1d5   : > { %5551 = vmatpush2.bf16.msra.mxu1 %v7903_v53  ;;  %5561 = vmatprep.subr.bf16.mxu0 %v8144_v55  ;;  %v688_v53 = vld [vmem:[%s9577_s11 + $0x8d8] sm:$0xff] }
 0x1d6   : > { %5602 = vmatprep.subr.bf16.mxu1 %v8400_v56  ;;  %v936_v55 = vld [vmem:[%s9577_s11 + $0x1098] sm:$0xff]  ;;  %v8048_v59 = vcombine.high %v680_v52, %v688_v53 }
 0x1d7   : > { %v5267_v4 = vpop.f32.mrf.mxu0  ;;  %5512 = vmatmul.mubr.bf16.vlgmr.msra.gmra.mxu0 %v9669_v33  ;;  %v944_v56 = vld [vmem:[%s9577_s11 + $0x10d8] sm:$0xff] }
 0x1d8   : > { %v10005_v8 = vadd.f32 %v5267_v4, %v9933_v39  ;;  %v10007_v11 = vpop.f32.mrf.mxu1  ;;  %5553 = vmatmul.mubr.bf16.vlgmr.msra.gmra.mxu1 %v9697_v23  ;;  %5562 = vmatpush1.bf16.msra.mxu0 %v8143_v61  ;;  %v8368_v39 = vcombine.high %v1000_v5, %v1008_v6  ;;  %v8304_v60 = vcombine.high %v936_v55, %v944_v56  ;;  %v664_v61 = vld [vmem:[%s9577_s11 + $0x818] sm:$0xff] }
 0x1d9   : > { %5603 = vmatpush1.bf16.msra.mxu1 %v8399_v62  ;;  %v5269_v15 = vpop.f32.mrf.mxu0  ;;  %5563 = vmatprep.subr.bf16.mxu0 %v8128_v63  ;;  %v672_v62 = vld [vmem:[%s9577_s11 + $0x858] sm:$0xff] }
 0x1da   : > { %v10011_v18 = vadd.f32 %v5269_v15, %v9941_v54  ;;  %v10013_v19 = vpop.f32.mrf.mxu1  ;;  %5604 = vmatprep.subr.bf16.mxu1 %v8384_v1  ;;  %5593 = vmatprep.mubr.bf16.mxu0 %v9653_v14  ;;  %v8111_v54 = vcombine.low %v744_v2, %v752_v3  ;;  %v920_v63 = vld [vmem:[%s9577_s11 + $0x1018] sm:$0xff]  ;;  %v8047_v2 = vcombine.low %v680_v52, %v688_v53 }
 0x1db   : > { %v5271_v22 = vpop.f32.mrf.mxu0  ;;  %5634 = vmatprep.mubr.bf16.mxu1 %v9714_v41  ;;  %v928_v1 = vld [vmem:[%s9577_s11 + $0x1058] sm:$0xff]  ;;  %v8303_v3 = vcombine.low %v936_v55, %v944_v56  ;;  %v8032_v4 = vcombine.high %v664_v61, %v672_v62 }
 0x1dc   : > { %v5312_v26 = vpop.f32.mrf.mxu1  ;;  %5564 = vmatpush1.bf16.msra.mxu0 %v8127_v12  ;;  %v8288_v5 = vcombine.high %v920_v63, %v928_v1  ;;  %v904_v6 = vld [vmem:[%s9577_s11 + $0xf98] sm:$0xff] }
 0x1dd   : > { %5605 = vmatpush1.bf16.msra.mxu1 %v8383_v16  ;;  %v5272_v27 = vpop.f32.mrf.mxu0  ;;  %5565 = vmatprep.subr.bf16.mxu0 %v8112_v17  ;;  %v912_v12 = vld [vmem:[%s9577_s11 + $0xfd8] sm:$0xff]  ;;  %v8031_v17 = vcombine.low %v664_v61, %v672_v62 }
 0x1de   : > { %v5313_v31 = vpop.f32.mrf.mxu1  ;;  %5606 = vmatprep.subr.bf16.mxu1 %v8368_v39  ;;  %v1160_v15 = vld [vmem:[%s9577_s11 + $0x1798] sm:$0xff]  ;;  %v8287_v39 = vcombine.low %v920_v63, %v928_v1  ;;  %v8272_v20 = vcombine.high %v904_v6, %v912_v12 }
 0x1df   : > { %v1168_v16 = vld [vmem:[%s9577_s11 + $0x17d8] sm:$0xff] }
 0x1e0   : > { %5566 = vmatpush1.bf16.msra.mxu0 %v8111_v54  ;;  %v8528_v21 = vcombine.high %v1160_v15, %v1168_v16  ;;  %v888_v22 = vld [vmem:[%s9577_s11 + $0xf18] sm:$0xff]  ;;  %v8271_v54 = vcombine.low %v904_v6, %v912_v12  ;;  %v8527_v27 = vcombine.low %v1160_v15, %v1168_v16 }
 0x1e1   : > { %5607 = vmatpush1.bf16.msra.mxu1 %v8367_v28  ;;  %5567 = vmatprep.subr.bf16.mxu0 %v8096_v30  ;;  %v1152_v26 = vld [vmem:[%s9577_s11 + $0x1758] sm:$0xff]  ;;  %v8256_v28 = vcombine.high %v888_v22, %v896_v24  ;;  %v8255_v36 = vcombine.low %v888_v22, %v896_v24 }
 0x1e2   : > { %5608 = vmatprep.subr.bf16.mxu1 %v8352_v32  ;;  %v8512_v30 = vcombine.high %v1144_v25, %v1152_v26  ;;  %v872_v31 = vld [vmem:[%s9577_s11 + $0xe98] sm:$0xff]  ;;  %v8511_v37 = vcombine.low %v1144_v25, %v1152_v26 }
 0x1e3   : > { %v880_v32 = vld [vmem:[%s9577_s11 + $0xed8] sm:$0xff] }
 0x1e4   : > { %5568 = vmatpush1.bf16.msra.mxu0 %v8095_v38  ;;  %v1128_v34 = vld [vmem:[%s9577_s11 + $0x1698] sm:$0xff]  ;;  %v8240_v38 = vcombine.high %v872_v31, %v880_v32  ;;  %v8239_v46 = vcombine.low %v872_v31, %v880_v32  ;;  %v529_v31 = vld [vmem:[%s9577_s11 + $0x3e0] sm:$0xff] }
 0x1e5   : > { %5609 = vmatpush1.bf16.msra.mxu1 %v8351_v29  ;;  %5569 = vmatprep.subr.bf16.mxu0 %v8080_v40  ;;  %v1136_v35 = vld [vmem:[%s9577_s11 + $0x16d8] sm:$0xff]  ;;  %v777_v32 = vld [vmem:[%s9577_s11 + $0xba0] sm:$0xff] }
 0x1e6   : > { %5610 = vmatprep.subr.bf16.mxu1 %v8336_v42  ;;  %v8496_v29 = vcombine.high %v1128_v34, %v1136_v35  ;;  %v856_v40 = vld [vmem:[%s9577_s11 + $0xe18] sm:$0xff]  ;;  %v8495_v47 = vcombine.low %v1128_v34, %v1136_v35  ;;  %v785_v34 = vld [vmem:[%s9577_s11 + $0xbe0] sm:$0xff]  ;;  %v1191_v35 = vsub.s32 3, %v9623_v44 }
 0x1e7   : > { %v864_v42 = vld [vmem:[%s9577_s11 + $0xe58] sm:$0xff] }
 0x1e8   : > { %5570 = vmatpush1.bf16.msra.mxu0 %v8079_v48  ;;  %v1112_v43 = vld [vmem:[%s9577_s11 + $0x1618] sm:$0xff]  ;;  %v8224_v48 = vcombine.high %v856_v40, %v864_v42  ;;  %v8223_v55 = vcombine.low %v856_v40, %v864_v42  ;;  %v8146_v40 = vcombine.high %v777_v32, %v785_v34  ;;  %v505_v42 = vld [vmem:[%s9577_s11 + $0x320] sm:$0xff] }
 0x1e9   : > { %5611 = vmatpush1.bf16.msra.mxu1 %v8335_v49  ;;  %5571 = vmatprep.subr.bf16.mxu0 %v8064_v50  ;;  %v1120_v45 = vld [vmem:[%s9577_s11 + $0x1658] sm:$0xff] }
 0x1ea   : > { %5612 = vmatprep.subr.bf16.mxu1 %v8320_v51  ;;  %v8480_v49 = vcombine.high %v1112_v43, %v1120_v45  ;;  %v840_v50 = vld [vmem:[%s9577_s11 + $0xd98] sm:$0xff]  ;;  %v8479_v56 = vcombine.low %v1112_v43, %v1120_v45  ;;  %v513_v43 = vld [vmem:[%s9577_s11 + $0x360] sm:$0xff] }
 0x1eb   : > { %v848_v51 = vld [vmem:[%s9577_s11 + $0xdd8] sm:$0xff]  ;;  %v761_v45 = vld [vmem:[%s9577_s11 + $0xb20] sm:$0xff] }
 0x1ec   : > { %5572 = vmatpush1.bf16.msra.mxu0 %v8063_v57  ;;  %v1096_v52 = vld [vmem:[%s9577_s11 + $0x1598] sm:$0xff]  ;;  %v8208_v57 = vcombine.high %v840_v50, %v848_v51  ;;  %v8207_v63 = vcombine.low %v840_v50, %v848_v51  ;;  %v7874_v50 = vcombine.high %v505_v42, %v513_v43 }
 0x1ed   : > { %5613 = vmatpush1.bf16.msra.mxu1 %v8319_v58  ;;  %5573 = vmatprep.subr.bf16.mxu0 %v8048_v59  ;;  %v1104_v53 = vld [vmem:[%s9577_s11 + $0x15d8] sm:$0xff] }
 0x1ee   : > { %5614 = vmatprep.subr.bf16.mxu1 %v8304_v60  ;;  %v8464_v58 = vcombine.high %v1096_v52, %v1104_v53  ;;  %v824_v59 = vld [vmem:[%s9577_s11 + $0xd18] sm:$0xff]  ;;  %v8463_v1 = vcombine.low %v1096_v52, %v1104_v53  ;;  %v489_v53 = vld [vmem:[%s9577_s11 + $0x2a0] sm:$0xff] }
 0x1ef   : > { %v832_v60 = vld [vmem:[%s9577_s11 + $0xd58] sm:$0xff] }
 0x1f0   : > { %5574 = vmatpush1.bf16.msra.mxu0 %v8047_v2  ;;  %v1080_v61 = vld [vmem:[%s9577_s11 + $0x1518] sm:$0xff]  ;;  %v8192_v2 = vcombine.high %v824_v59, %v832_v60  ;;  %v8191_v15 = vcombine.low %v824_v59, %v832_v60 }
 0x1f1   : > { %5615 = vmatpush1.bf16.msra.mxu1 %v8303_v3  ;;  %5575 = vmatprep.subr.bf16.mxu0 %v8032_v4  ;;  %v1088_v62 = vld [vmem:[%s9577_s11 + $0x1558] sm:$0xff] }
 0x1f2   : > { %5616 = vmatprep.subr.bf16.mxu1 %v8288_v5  ;;  %v8448_v3 = vcombine.high %v1080_v61, %v1088_v62  ;;  %v808_v4 = vld [vmem:[%s9577_s11 + $0xc98] sm:$0xff]  ;;  %v8447_v16 = vcombine.low %v1080_v61, %v1088_v62 }
 0x1f3   : > { %v816_v5 = vld [vmem:[%s9577_s11 + $0xcd8] sm:$0xff] }
 0x1f4   : > { %5576 = vmatpush1.bf16.msra.mxu0 %v8031_v17  ;;  %v1064_v6 = vld [vmem:[%s9577_s11 + $0x1498] sm:$0xff]  ;;  %v8176_v17 = vcombine.high %v808_v4, %v816_v5  ;;  %v8175_v25 = vcombine.low %v808_v4, %v816_v5  ;;  %v473_v4 = vld [vmem:[%s9577_s11 + $0x220] sm:$0xff] }
 0x1f5   : > { %5617 = vmatpush1.bf16.msra.mxu1 %v8287_v39  ;;  %5577 = vmatprep.subr.bf16.mxu0 %v8272_v20  ;;  %v1072_v12 = vld [vmem:[%s9577_s11 + $0x14d8] sm:$0xff]  ;;  %v481_v5 = vld [vmem:[%s9577_s11 + $0x260] sm:$0xff] }
 0x1f6   : > { %5618 = vmatprep.subr.bf16.mxu1 %v8528_v21  ;;  %v8432_v39 = vcombine.high %v1064_v6, %v1072_v12  ;;  %v792_v20 = vld [vmem:[%s9577_s11 + $0xc18] sm:$0xff]  ;;  %v8431_v26 = vcombine.low %v1064_v6, %v1072_v12  ;;  %v729_v12 = vld [vmem:[%s9577_s11 + $0xa20] sm:$0xff] }
 0x1f7   : > { %v800_v21 = vld [vmem:[%s9577_s11 + $0xc58] sm:$0xff] }
 0x1f8   : > { %5578 = vmatpush2.bf16.msra.mxu0 %v8271_v54  ;;  %v1048_v22 = vld [vmem:[%s9577_s11 + $0x1418] sm:$0xff]  ;;  %v8160_v54 = vcombine.high %v792_v20, %v800_v21 }
 0x1f9   : > { %5619 = vmatpush2.bf16.msra.mxu1 %v8527_v27  ;;  %5579 = vmatprep.subr.bf16.mxu0 %v8256_v28  ;;  %v1056_v24 = vld [vmem:[%s9577_s11 + $0x1458] sm:$0xff]  ;;  %v1187_v27 = vsub.s32 2, %v9623_v44 }
 0x1fa   : > { %5620 = vmatprep.subr.bf16.mxu1 %v8512_v30  ;;  %v8416_v28 = vcombine.high %v1048_v22, %v1056_v24  ;;  %v521_v30 = vld [vmem:[%s9577_s11 + $0x3a0] sm:$0xff] }
 0x1fc   : > { %5580 = vmatpush2.bf16.msra.mxu0 %v8255_v36  ;;  %v8159_v36 = vcombine.low %v792_v20, %v800_v21 }
 0x1fd   : > { %5621 = vmatpush2.bf16.msra.mxu1 %v8511_v37  ;;  %5581 = vmatprep.subr.bf16.mxu0 %v8240_v38  ;;  %v8415_v37 = vcombine.low %v1048_v22, %v1056_v24  ;;  %v7890_v38 = vcombine.high %v521_v30, %v529_v31  ;;  %v7842_v22 = vcombine.high %v473_v4, %v481_v5 }
 0x1fe   : > { %5622 = vmatprep.subr.bf16.mxu1 %v8496_v29  ;;  %v1188_v29 = vrot.slane %v9914_v9, %v1187_v27 }
 0x200   : > { %5582 = vmatpush2.bf16.msra.mxu0 %v8239_v46  ;;  %v769_v46 = vld [vmem:[%s9577_s11 + $0xb60] sm:$0xff]  ;;  %v5309_v51 = vadd.f32 %v10007_v11, %v1188_v29  ;;  %v7873_v11 = vcombine.low %v505_v42, %v513_v43 }
 0x201   : > { %5623 = vmatpush2.bf16.msra.mxu1 %v8495_v47  ;;  %5583 = vmatprep.subr.bf16.mxu0 %v8224_v48  ;;  %v1192_v47 = vrot.slane %v9914_v9, %v1191_v35  ;;  %v7889_v48 = vcombine.low %v521_v30, %v529_v31  ;;  %v8130_v52 = vcombine.high %v761_v45, %v769_v46  ;;  %v721_v30 = vld [vmem:[%s9577_s11 + $0x9e0] sm:$0xff] }
 0x202   : > { %5624 = vmatprep.subr.bf16.mxu1 %v8480_v49  ;;  %v8145_v49 = vcombine.low %v777_v32, %v785_v34  ;;  %v8129_v62 = vcombine.low %v761_v45, %v769_v46  ;;  %v7841_v31 = vcombine.low %v473_v4, %v481_v5  ;;  %v697_v29 = vld [vmem:[%s9577_s11 + $0x920] sm:$0xff] }
 0x203   : > { %v5311_v59 = vadd.f32 %v10013_v19, %v1192_v47  ;;  %v425_v47 = vld [vmem:[%s9577_s11 + $0xa0] sm:$0xff] }
 0x204   : > { %5584 = vmatpush2.bf16.msra.mxu0 %v8223_v55  ;;  %v497_v55 = vld [vmem:[%s9577_s11 + $0x2e0] sm:$0xff] }
 0x205   : > { %5625 = vmatpush2.bf16.msra.mxu1 %v8479_v56  ;;  %5585 = vmatprep.subr.bf16.mxu0 %v8208_v57  ;;  %v745_v57 = vld [vmem:[%s9577_s11 + $0xaa0] sm:$0xff] }
 0x206   : > { %5626 = vmatprep.subr.bf16.mxu1 %v8464_v58  ;;  %v753_v58 = vld [vmem:[%s9577_s11 + $0xae0] sm:$0xff] }
 0x207   : > { %v8114_v19 = vcombine.high %v745_v57, %v753_v58  ;;  %v8113_v21 = vcombine.low %v745_v57, %v753_v58  ;;  %v417_v57 = vld [vmem:[%s9577_s11 + $0x60] sm:$0xff] }
 0x208   : > { %5586 = vmatpush2.bf16.msra.mxu0 %v8207_v63  ;;  %v7858_v63 = vcombine.high %v489_v53, %v497_v55  ;;  %v665_v58 = vld [vmem:[%s9577_s11 + $0x820] sm:$0xff] }
 0x209   : > { %5627 = vmatpush2.bf16.msra.mxu1 %v8463_v1  ;;  %5587 = vmatprep.subr.bf16.mxu0 %v8192_v2 }
 0x20a   : > { %5628 = vmatprep.subr.bf16.mxu1 %v8448_v3 }
 0x20c   : > { %5588 = vmatpush2.bf16.msra.mxu0 %v8191_v15  ;;  %v737_v15 = vld [vmem:[%s9577_s11 + $0xa60] sm:$0xff] }
 0x20d   : > { %5629 = vmatpush2.bf16.msra.mxu1 %v8447_v16  ;;  %5589 = vmatprep.subr.bf16.mxu0 %v8176_v17  ;;  %v8097_v32 = vcombine.low %v729_v12, %v737_v15 }
 0x20e   : > { %5630 = vmatprep.subr.bf16.mxu1 %v8432_v39  ;;  %v7857_v39 = vcombine.low %v489_v53, %v497_v55 }
 0x210   : > { %5590 = vmatpush2.bf16.msra.mxu0 %v8175_v25  ;;  %v8098_v25 = vcombine.high %v729_v12, %v737_v15  ;;  %v633_v12 = vld [vmem:[%s9577_s11 + $0x720] sm:$0xff] }
 0x211   : > { %5631 = vmatpush2.bf16.msra.mxu1 %v8431_v26  ;;  %5591 = vmatprep.subr.bf16.mxu0 %v8160_v54  ;;  %v457_v26 = vld [vmem:[%s9577_s11 + $0x1a0] sm:$0xff] }
 0x212   : > { %5632 = vmatprep.subr.bf16.mxu1 %v8416_v28  ;;  %v465_v54 = vld [vmem:[%s9577_s11 + $0x1e0] sm:$0xff] }
 0x213   : > { %v713_v28 = vld [vmem:[%s9577_s11 + $0x9a0] sm:$0xff]  ;;  %v7826_v34 = vcombine.high %v457_v26, %v465_v54  ;;  %v7825_v42 = vcombine.low %v457_v26, %v465_v54 }
 0x214   : > { %5592 = vmatpush2.bf16.msra.mxu0 %v8159_v36  ;;  %v8082_v36 = vcombine.high %v713_v28, %v721_v30  ;;  %v8081_v43 = vcombine.low %v713_v28, %v721_v30  ;;  %v641_v15 = vld [vmem:[%s9577_s11 + $0x760] sm:$0xff] }
 0x215   : > { %5633 = vmatpush2.bf16.msra.mxu1 %v8415_v37  ;;  %5643 = vmatprep.subr.bf16.mxu0 %v7890_v38  ;;  %v441_v37 = vld [vmem:[%s9577_s11 + $0x120] sm:$0xff]  ;;  %v8001_v30 = vcombine.low %v633_v12, %v641_v15 }
 0x216   : > { %5684 = vmatprep.subr.bf16.mxu1 %v8146_v40  ;;  %v449_v38 = vld [vmem:[%s9577_s11 + $0x160] sm:$0xff] }
 0x217   : > { %v5349_v56 = vpop.f32.mrf.mxu0  ;;  %5594 = vmatmul.mubr.bf16.vlgmr.msra.gmra.mxu0 %v9707_v0  ;;  %v705_v40 = vld [vmem:[%s9577_s11 + $0x960] sm:$0xff]  ;;  %v7810_v45 = vcombine.high %v441_v37, %v449_v38 }
 0x218   : > { %v5350_v9 = vadd.f32 %v5349_v56, %v5309_v51  ;;  %v5390_v60 = vpop.f32.mrf.mxu1  ;;  %5635 = vmatmul.mubr.bf16.vlgmr.msra.gmra.mxu1 %v9669_v33  ;;  %5644 = vmatpush1.bf16.msra.mxu0 %v7889_v48  ;;  %v8066_v46 = vcombine.high %v697_v29, %v705_v40  ;;  %v433_v48 = vld [vmem:[%s9577_s11 + $0xe0] sm:$0xff]  ;;  %v7809_v51 = vcombine.low %v441_v37, %v449_v38 }
 0x219   : > { %5685 = vmatpush1.bf16.msra.mxu1 %v8145_v49  ;;  %v5351_v61 = vpop.f32.mrf.mxu0  ;;  %5645 = vmatprep.subr.bf16.mxu0 %v7874_v50  ;;  %v681_v49 = vld [vmem:[%s9577_s11 + $0x8a0] sm:$0xff]  ;;  %v7794_v53 = vcombine.high %v425_v47, %v433_v48 }
 0x21a   : > { %v10093_v1 = vadd.f32 %v5390_v60, %v5350_v9  ;;  %v5352_v2 = vadd.f32 %v5351_v61, %v5311_v59  ;;  %v5392_v3 = vpop.f32.mrf.mxu1  ;;  %5686 = vmatprep.subr.bf16.mxu1 %v8130_v52  ;;  %5675 = vmatprep.mubr.bf16.mxu0 %v9646_v10  ;;  %v689_v50 = vld [vmem:[%s9577_s11 + $0x8e0] sm:$0xff]  ;;  %v8065_v52 = vcombine.low %v697_v29, %v705_v40 }
 0x21b   : > { %v5353_v6 = vpop.f32.mrf.mxu0  ;;  %5716 = vmatprep.mubr.bf16.mxu1 %v9653_v14  ;;  %v8050_v55 = vcombine.high %v681_v49, %v689_v50  ;;  %v409_v56 = vld [vmem:[%s9577_s11 + $0x20] sm:$0xff]  ;;  %v7793_v9 = vcombine.low %v425_v47, %v433_v48  ;;  %v8049_v60 = vcombine.low %v681_v49, %v689_v50 }
 0x21c   : > { %v10101_v16 = vadd.f32 %v5392_v3, %v5352_v2  ;;  %v5394_v17 = vpop.f32.mrf.mxu1  ;;  %5646 = vmatpush1.bf16.msra.mxu0 %v7873_v11  ;;  %v673_v59 = vld [vmem:[%s9577_s11 + $0x860] sm:$0xff]  ;;  %v7778_v11 = vcombine.high %v409_v56, %v417_v57 }
 0x21d   : > { %5687 = vmatpush1.bf16.msra.mxu1 %v8129_v62  ;;  %v5354_v20 = vpop.f32.mrf.mxu0  ;;  %5647 = vmatprep.subr.bf16.mxu0 %v7858_v63  ;;  %v8034_v61 = vcombine.high %v665_v58, %v673_v59  ;;  %v649_v62 = vld [vmem:[%s9577_s11 + $0x7a0] sm:$0xff]  ;;  %v8033_v4 = vcombine.low %v665_v58, %v673_v59 }
 0x21e   : > { %v5395_v24 = vpop.f32.mrf.mxu1  ;;  %5688 = vmatprep.subr.bf16.mxu1 %v8114_v19  ;;  %v657_v63 = vld [vmem:[%s9577_s11 + $0x7e0] sm:$0xff]  ;;  %v7777_v19 = vcombine.low %v409_v56, %v417_v57 }
 0x21f   : > { %v905_v2 = vld [vmem:[%s9577_s11 + $0xfa0] sm:$0xff]  ;;  %v8018_v5 = vcombine.high %v649_v62, %v657_v63  ;;  %v8017_v20 = vcombine.low %v649_v62, %v657_v63 }
 0x220   : > { %5648 = vmatpush1.bf16.msra.mxu0 %v7857_v39  ;;  %v913_v3 = vld [vmem:[%s9577_s11 + $0xfe0] sm:$0xff] }
 0x221   : > { %5689 = vmatpush1.bf16.msra.mxu1 %v8113_v21  ;;  %5649 = vmatprep.subr.bf16.mxu0 %v7842_v22  ;;  %v8274_v6 = vcombine.high %v905_v2, %v913_v3  ;;  %v889_v17 = vld [vmem:[%s9577_s11 + $0xf20] sm:$0xff]  ;;  %v8273_v21 = vcombine.low %v905_v2, %v913_v3  ;;  %v8002_v22 = vcombine.high %v633_v12, %v641_v15 }
 0x222   : > { %5690 = vmatprep.subr.bf16.mxu1 %v8098_v25  ;;  %v897_v39 = vld [vmem:[%s9577_s11 + $0xf60] sm:$0xff] }
 0x223   : > { %v8258_v24 = vcombine.high %v889_v17, %v897_v39  ;;  %v617_v25 = vld [vmem:[%s9577_s11 + $0x6a0] sm:$0xff] }
 0x224   : > { %5650 = vmatpush1.bf16.msra.mxu0 %v7841_v31  ;;  %v625_v26 = vld [vmem:[%s9577_s11 + $0x6e0] sm:$0xff]  ;;  %v8257_v31 = vcombine.low %v889_v17, %v897_v39 }
 0x225   : > { %5691 = vmatpush1.bf16.msra.mxu1 %v8097_v32  ;;  %5651 = vmatprep.subr.bf16.mxu0 %v7826_v34  ;;  %v873_v54 = vld [vmem:[%s9577_s11 + $0xea0] sm:$0xff]  ;;  %v7986_v32 = vcombine.high %v617_v25, %v625_v26  ;;  %v7985_v40 = vcombine.low %v617_v25, %v625_v26  ;;  %v522_v26 = vld [vmem:[%s9577_s11 + $0x3a8] sm:$0xff] }
 0x226   : > { %5692 = vmatprep.subr.bf16.mxu1 %v8082_v36  ;;  %v881_v28 = vld [vmem:[%s9577_s11 + $0xee0] sm:$0xff] }
 0x227   : > { %v8242_v34 = vcombine.high %v873_v54, %v881_v28  ;;  %v601_v36 = vld [vmem:[%s9577_s11 + $0x620] sm:$0xff] }
 0x228   : > { %5652 = vmatpush1.bf16.msra.mxu0 %v7825_v42  ;;  %v609_v37 = vld [vmem:[%s9577_s11 + $0x660] sm:$0xff]  ;;  %v8241_v42 = vcombine.low %v873_v54, %v881_v28  ;;  %v530_v54 = vld [vmem:[%s9577_s11 + $0x3e8] sm:$0xff] }
 0x229   : > { %5693 = vmatpush1.bf16.msra.mxu1 %v8081_v43  ;;  %5653 = vmatprep.subr.bf16.mxu0 %v7810_v45  ;;  %v857_v38 = vld [vmem:[%s9577_s11 + $0xe20] sm:$0xff]  ;;  %v7970_v43 = vcombine.high %v601_v36, %v609_v37  ;;  %v7969_v50 = vcombine.low %v601_v36, %v609_v37  ;;  %v1199_v36 = vsub.s32 5, %v9623_v44 }
 0x22a   : > { %5694 = vmatprep.subr.bf16.mxu1 %v8066_v46  ;;  %v865_v29 = vld [vmem:[%s9577_s11 + $0xe60] sm:$0xff] }
 0x22b   : > { %v8226_v45 = vcombine.high %v857_v38, %v865_v29  ;;  %v585_v46 = vld [vmem:[%s9577_s11 + $0x5a0] sm:$0xff] }
 0x22c   : > { %5654 = vmatpush1.bf16.msra.mxu0 %v7809_v51  ;;  %v593_v47 = vld [vmem:[%s9577_s11 + $0x5e0] sm:$0xff]  ;;  %v8225_v51 = vcombine.low %v857_v38, %v865_v29  ;;  %v506_v29 = vld [vmem:[%s9577_s11 + $0x328] sm:$0xff] }
 0x22d   : > { %5695 = vmatpush1.bf16.msra.mxu1 %v8065_v52  ;;  %5655 = vmatprep.subr.bf16.mxu0 %v7794_v53  ;;  %v841_v48 = vld [vmem:[%s9577_s11 + $0xda0] sm:$0xff]  ;;  %v7954_v52 = vcombine.high %v585_v46, %v593_v47  ;;  %v7953_v59 = vcombine.low %v585_v46, %v593_v47  ;;  %v7891_v46 = vcombine.low %v522_v26, %v530_v54 }
 0x22e   : > { %5696 = vmatprep.subr.bf16.mxu1 %v8050_v55  ;;  %v849_v49 = vld [vmem:[%s9577_s11 + $0xde0] sm:$0xff] }
 0x22f   : > { %v8210_v53 = vcombine.high %v841_v48, %v849_v49  ;;  %v569_v55 = vld [vmem:[%s9577_s11 + $0x520] sm:$0xff] }
 0x230   : > { %5656 = vmatpush1.bf16.msra.mxu0 %v7793_v9  ;;  %v577_v56 = vld [vmem:[%s9577_s11 + $0x560] sm:$0xff]  ;;  %v8209_v9 = vcombine.low %v841_v48, %v849_v49 }
 0x231   : > { %5697 = vmatpush1.bf16.msra.mxu1 %v8049_v60  ;;  %5657 = vmatprep.subr.bf16.mxu0 %v7778_v11  ;;  %v825_v57 = vld [vmem:[%s9577_s11 + $0xd20] sm:$0xff]  ;;  %v7938_v60 = vcombine.high %v569_v55, %v577_v56  ;;  %v7937_v3 = vcombine.low %v569_v55, %v577_v56  ;;  %v498_v55 = vld [vmem:[%s9577_s11 + $0x2e8] sm:$0xff] }
 0x232   : > { %5698 = vmatprep.subr.bf16.mxu1 %v8034_v61  ;;  %v833_v58 = vld [vmem:[%s9577_s11 + $0xd60] sm:$0xff] }
 0x233   : > { %v8194_v11 = vcombine.high %v825_v57, %v833_v58  ;;  %v553_v61 = vld [vmem:[%s9577_s11 + $0x4a0] sm:$0xff] }
 0x234   : > { %5658 = vmatpush1.bf16.msra.mxu0 %v7777_v19  ;;  %v561_v62 = vld [vmem:[%s9577_s11 + $0x4e0] sm:$0xff]  ;;  %v8193_v19 = vcombine.low %v825_v57, %v833_v58 }
 0x235   : > { %5699 = vmatpush1.bf16.msra.mxu1 %v8033_v4  ;;  %5659 = vmatprep.subr.bf16.mxu0 %v8018_v5  ;;  %v809_v63 = vld [vmem:[%s9577_s11 + $0xca0] sm:$0xff]  ;;  %v7922_v4 = vcombine.high %v553_v61, %v561_v62  ;;  %v7921_v39 = vcombine.low %v553_v61, %v561_v62 }
 0x236   : > { %5700 = vmatprep.subr.bf16.mxu1 %v8274_v6  ;;  %v817_v2 = vld [vmem:[%s9577_s11 + $0xce0] sm:$0xff] }
 0x237   : > { %v8178_v5 = vcombine.high %v809_v63, %v817_v2  ;;  %v537_v6 = vld [vmem:[%s9577_s11 + $0x420] sm:$0xff] }
 0x238   : > { %5660 = vmatpush2.bf16.msra.mxu0 %v8017_v20  ;;  %v545_v12 = vld [vmem:[%s9577_s11 + $0x460] sm:$0xff]  ;;  %v8177_v20 = vcombine.low %v809_v63, %v817_v2 }
 0x239   : > { %5701 = vmatpush2.bf16.msra.mxu1 %v8273_v21  ;;  %5661 = vmatprep.subr.bf16.mxu0 %v8002_v22  ;;  %v793_v15 = vld [vmem:[%s9577_s11 + $0xc20] sm:$0xff]  ;;  %v7906_v21 = vcombine.high %v537_v6, %v545_v12  ;;  %v7905_v28 = vcombine.low %v537_v6, %v545_v12 }
 0x23a   : > { %5702 = vmatprep.subr.bf16.mxu1 %v8258_v24  ;;  %v801_v17 = vld [vmem:[%s9577_s11 + $0xc60] sm:$0xff] }
 0x23b   : > { %v8162_v22 = vcombine.high %v793_v15, %v801_v17  ;;  %v1033_v24 = vld [vmem:[%s9577_s11 + $0x13a0] sm:$0xff] }
 0x23c   : > { %5662 = vmatpush2.bf16.msra.mxu0 %v8001_v30  ;;  %v1041_v25 = vld [vmem:[%s9577_s11 + $0x13e0] sm:$0xff]  ;;  %v1195_v30 = vsub.s32 4, %v9623_v44 }
 0x23d   : > { %5703 = vmatpush2.bf16.msra.mxu1 %v8257_v31  ;;  %5663 = vmatprep.subr.bf16.mxu0 %v7986_v32  ;;  %v8161_v31 = vcombine.low %v793_v15, %v801_v17  ;;  %v8402_v32 = vcombine.high %v1033_v24, %v1041_v25  ;;  %v1017_v37 = vld [vmem:[%s9577_s11 + $0x1320] sm:$0xff] }
 0x23e   : > { %5704 = vmatprep.subr.bf16.mxu1 %v8242_v34  ;;  %v7892_v34 = vcombine.high %v522_v26, %v530_v54  ;;  %v1025_v38 = vld [vmem:[%s9577_s11 + $0x1360] sm:$0xff]  ;;  %v458_v26 = vld [vmem:[%s9577_s11 + $0x1a8] sm:$0xff] }
 0x23f   : > { %v8386_v47 = vcombine.high %v1017_v37, %v1025_v38  ;;  %v8385_v58 = vcombine.low %v1017_v37, %v1025_v38  ;;  %v985_v2 = vld [vmem:[%s9577_s11 + $0x1220] sm:$0xff]  ;;  %v466_v54 = vld [vmem:[%s9577_s11 + $0x1e8] sm:$0xff] }
 0x240   : > { %5664 = vmatpush2.bf16.msra.mxu0 %v7985_v40  ;;  %v514_v40 = vld [vmem:[%s9577_s11 + $0x368] sm:$0xff]  ;;  %v953_v37 = vld [vmem:[%s9577_s11 + $0x1120] sm:$0xff] }
 0x241   : > { %5705 = vmatpush2.bf16.msra.mxu1 %v8241_v42  ;;  %5665 = vmatprep.subr.bf16.mxu0 %v7970_v43  ;;  %v10162_v42 = vld [vmem:[%s9583_s9] sm:$0xff]  ;;  %v7876_v49 = vcombine.high %v506_v29, %v514_v40 }
 0x242   : > { %5706 = vmatprep.subr.bf16.mxu1 %v8226_v45  ;;  %v1196_v43 = vrot.slane %v10162_v42, %v1195_v30  ;;  %v8401_v45 = vcombine.low %v1033_v24, %v1041_v25  ;;  %v1200_v48 = vrot.slane %v10162_v42, %v1199_v36  ;;  %v969_v24 = vld [vmem:[%s9577_s11 + $0x11a0] sm:$0xff] }
 0x243   : > { %v977_v25 = vld [vmem:[%s9577_s11 + $0x11e0] sm:$0xff] }
 0x244   : > { %5666 = vmatpush2.bf16.msra.mxu0 %v7969_v50  ;;  %v1001_v50 = vld [vmem:[%s9577_s11 + $0x12a0] sm:$0xff] }
 0x245   : > { %5707 = vmatpush2.bf16.msra.mxu1 %v8225_v51  ;;  %5667 = vmatprep.subr.bf16.mxu0 %v7954_v52  ;;  %v1009_v51 = vld [vmem:[%s9577_s11 + $0x12e0] sm:$0xff] }
 0x246   : > { %5708 = vmatprep.subr.bf16.mxu1 %v8210_v53  ;;  %v490_v53 = vld [vmem:[%s9577_s11 + $0x2a8] sm:$0xff]  ;;  %v8369_v15 = vcombine.low %v1001_v50, %v1009_v51  ;;  %v961_v38 = vld [vmem:[%s9577_s11 + $0x1160] sm:$0xff] }
 0x247   : > { %v7860_v63 = vcombine.high %v490_v53, %v498_v55 }
 0x248   : > { %5668 = vmatpush2.bf16.msra.mxu0 %v7953_v59 }
 0x249   : > { %5709 = vmatpush2.bf16.msra.mxu1 %v8209_v9  ;;  %5669 = vmatprep.subr.bf16.mxu0 %v7938_v60  ;;  %v7875_v9 = vcombine.low %v506_v29, %v514_v40  ;;  %v8370_v60 = vcombine.high %v1001_v50, %v1009_v51  ;;  %v442_v29 = vld [vmem:[%s9577_s11 + $0x128] sm:$0xff] }
 0x24a   : > { %5710 = vmatprep.subr.bf16.mxu1 %v8194_v11  ;;  %v450_v40 = vld [vmem:[%s9577_s11 + $0x168] sm:$0xff] }
 0x24b   : > { %v426_v50 = vld [vmem:[%s9577_s11 + $0xa8] sm:$0xff] }
 0x24c   : > { %5670 = vmatpush2.bf16.msra.mxu0 %v7937_v3  ;;  %v993_v3 = vld [vmem:[%s9577_s11 + $0x1260] sm:$0xff]  ;;  %v434_v51 = vld [vmem:[%s9577_s11 + $0xe8] sm:$0xff] }
 0x24d   : > { %5711 = vmatpush2.bf16.msra.mxu1 %v8193_v19  ;;  %5671 = vmatprep.subr.bf16.mxu0 %v7922_v4  ;;  %v474_v4 = vld [vmem:[%s9577_s11 + $0x228] sm:$0xff] }
 0x24e   : > { %5712 = vmatprep.subr.bf16.mxu1 %v8178_v5  ;;  %v482_v5 = vld [vmem:[%s9577_s11 + $0x268] sm:$0xff] }
 0x250   : > { %5672 = vmatpush2.bf16.msra.mxu0 %v7921_v39  ;;  %v7859_v39 = vcombine.low %v490_v53, %v498_v55  ;;  %v7811_v53 = vcombine.low %v442_v29, %v450_v40 }
 0x251   : > { %5713 = vmatpush2.bf16.msra.mxu1 %v8177_v20  ;;  %5673 = vmatprep.subr.bf16.mxu0 %v7906_v21  ;;  %v8354_v20 = vcombine.high %v985_v2, %v993_v3 }
 0x252   : > { %5714 = vmatprep.subr.bf16.mxu1 %v8162_v22  ;;  %v7844_v22 = vcombine.high %v474_v4, %v482_v5 }
 0x254   : > { %5674 = vmatpush2.bf16.msra.mxu0 %v7905_v28  ;;  %v8353_v28 = vcombine.low %v985_v2, %v993_v3  ;;  %v1161_v2 = vld [vmem:[%s9577_s11 + $0x17a0] sm:$0xff] }
 0x255   : > { %5715 = vmatpush2.bf16.msra.mxu1 %v8161_v31  ;;  %5725 = vmatprep.subr.bf16.mxu0 %v8402_v32  ;;  %v7843_v31 = vcombine.low %v474_v4, %v482_v5  ;;  %v8338_v32 = vcombine.high %v969_v24, %v977_v25  ;;  %v1169_v3 = vld [vmem:[%s9577_s11 + $0x17e0] sm:$0xff]  ;;  %v658_v4 = vld [vmem:[%s9577_s11 + $0x7e8] sm:$0xff] }
 0x256   : > { %5766 = vmatprep.subr.bf16.mxu1 %v7892_v34  ;;  %v7828_v34 = vcombine.high %v458_v26, %v466_v54 }
 0x257   : > { %v5431_v52 = vpop.f32.mrf.mxu0  ;;  %5676 = vmatmul.mubr.bf16.vlgmr.msra.gmra.mxu0 %v9697_v23 }
 0x258   : > { %v5432_v56 = vadd.f32 %v5431_v52, %v1196_v43  ;;  %v5472_v57 = vpop.f32.mrf.mxu1  ;;  %5717 = vmatmul.mubr.bf16.vlgmr.msra.gmra.mxu1 %v9707_v0  ;;  %5726 = vmatpush1.bf16.msra.mxu0 %v8401_v45  ;;  %v8337_v43 = vcombine.low %v969_v24, %v977_v25  ;;  %v7827_v45 = vcombine.low %v458_v26, %v466_v54 }
 0x259   : > { %5767 = vmatpush1.bf16.msra.mxu1 %v7891_v46  ;;  %v5433_v59 = vpop.f32.mrf.mxu0  ;;  %5727 = vmatprep.subr.bf16.mxu0 %v8386_v47  ;;  %v8322_v46 = vcombine.high %v953_v37, %v961_v38  ;;  %v7812_v47 = vcombine.high %v442_v29, %v450_v40  ;;  %v8321_v52 = vcombine.low %v953_v37, %v961_v38 }
 0x25a   : > { %v10176_v11 = vadd.f32 %v5472_v57, %v5432_v56  ;;  %v5434_v61 = vadd.f32 %v5433_v59, %v1200_v48  ;;  %v5474_v62 = vpop.f32.mrf.mxu1  ;;  %5768 = vmatprep.subr.bf16.mxu1 %v7876_v49  ;;  %5757 = vmatprep.mubr.bf16.mxu0 %v9714_v41  ;;  %v937_v48 = vld [vmem:[%s9577_s11 + $0x10a0] sm:$0xff]  ;;  %v7796_v56 = vcombine.high %v426_v50, %v434_v51  ;;  %v410_v59 = vld [vmem:[%s9577_s11 + $0x28] sm:$0xff] }
 0x25b   : > { %v5435_v19 = vpop.f32.mrf.mxu0  ;;  %5798 = vmatprep.mubr.bf16.mxu1 %v9646_v10  ;;  %v945_v49 = vld [vmem:[%s9577_s11 + $0x10e0] sm:$0xff]  ;;  %v8529_v24 = vcombine.low %v1161_v2, %v1169_v3 }
 0x25c   : > { %v10184_v6 = vadd.f32 %v5474_v62, %v5434_v61  ;;  %v5476_v12 = vpop.f32.mrf.mxu1  ;;  %5728 = vmatpush1.bf16.msra.mxu0 %v8385_v58  ;;  %v8306_v55 = vcombine.high %v937_v48, %v945_v49  ;;  %v921_v57 = vld [vmem:[%s9577_s11 + $0x1020] sm:$0xff]  ;;  %v7795_v61 = vcombine.low %v426_v50, %v434_v51  ;;  %v650_v19 = vld [vmem:[%s9577_s11 + $0x7a8] sm:$0xff] }
 0x25d   : > { %5769 = vmatpush1.bf16.msra.mxu1 %v7875_v9  ;;  %v5436_v17 = vpop.f32.mrf.mxu0  ;;  %5729 = vmatprep.subr.bf16.mxu0 %v8370_v60  ;;  %v929_v58 = vld [vmem:[%s9577_s11 + $0x1060] sm:$0xff]  ;;  %v418_v9 = vld [vmem:[%s9577_s11 + $0x68] sm:$0xff]  ;;  %v8305_v60 = vcombine.low %v937_v48, %v945_v49  ;;  %v8019_v25 = vcombine.low %v650_v19, %v658_v4 }
 0x25e   : > { %v5477_v21 = vpop.f32.mrf.mxu1  ;;  %5770 = vmatprep.subr.bf16.mxu1 %v7860_v63  ;;  %v8290_v62 = vcombine.high %v921_v57, %v929_v58  ;;  %v7780_v63 = vcombine.high %v410_v59, %v418_v9  ;;  %v8289_v5 = vcombine.low %v921_v57, %v929_v58  ;;  %v7779_v12 = vcombine.low %v410_v59, %v418_v9 }
 0x25f   : > { %v8020_v17 = vcombine.high %v650_v19, %v658_v4  ;;  %v634_v21 = vld [vmem:[%s9577_s11 + $0x728] sm:$0xff] }
 0x260   : > { %5730 = vmatpush1.bf16.msra.mxu0 %v8369_v15  ;;  %v8530_v15 = vcombine.high %v1161_v2, %v1169_v3 }
 0x261   : > { %5771 = vmatpush1.bf16.msra.mxu1 %v7859_v39  ;;  %5731 = vmatprep.subr.bf16.mxu0 %v8354_v20  ;;  %v1145_v39 = vld [vmem:[%s9577_s11 + $0x1720] sm:$0xff] }
 0x262   : > { %5772 = vmatprep.subr.bf16.mxu1 %v7844_v22  ;;  %v1153_v20 = vld [vmem:[%s9577_s11 + $0x1760] sm:$0xff]  ;;  %v642_v22 = vld [vmem:[%s9577_s11 + $0x768] sm:$0xff] }
 0x263   : > { %v8514_v26 = vcombine.high %v1145_v39, %v1153_v20  ;;  %v8004_v54 = vcombine.high %v634_v21, %v642_v22  ;;  %v8513_v37 = vcombine.low %v1145_v39, %v1153_v20  ;;  %v8003_v38 = vcombine.low %v634_v21, %v642_v22 }
 0x264   : > { %5732 = vmatpush1.bf16.msra.mxu0 %v8353_v28  ;;  %v1129_v28 = vld [vmem:[%s9577_s11 + $0x16a0] sm:$0xff] }
 0x265   : > { %5773 = vmatpush1.bf16.msra.mxu1 %v7843_v31  ;;  %5733 = vmatprep.subr.bf16.mxu0 %v8338_v32  ;;  %v1137_v31 = vld [vmem:[%s9577_s11 + $0x16e0] sm:$0xff]  ;;  %v618_v32 = vld [vmem:[%s9577_s11 + $0x6a8] sm:$0xff] }
 0x266   : > { %5774 = vmatprep.subr.bf16.mxu1 %v7828_v34  ;;  %v626_v34 = vld [vmem:[%s9577_s11 + $0x6e8] sm:$0xff]  ;;  %v8498_v29 = vcombine.high %v1129_v28, %v1137_v31  ;;  %v8497_v48 = vcombine.low %v1129_v28, %v1137_v31 }
 0x267   : > { %v7988_v40 = vcombine.high %v618_v32, %v626_v34  ;;  %v7987_v49 = vcombine.low %v618_v32, %v626_v34 }
 0x268   : > { %5734 = vmatpush1.bf16.msra.mxu0 %v8337_v43  ;;  %v1113_v43 = vld [vmem:[%s9577_s11 + $0x1620] sm:$0xff] }
 0x269   : > { %5775 = vmatpush1.bf16.msra.mxu1 %v7827_v45  ;;  %5735 = vmatprep.subr.bf16.mxu0 %v8322_v46  ;;  %v1121_v45 = vld [vmem:[%s9577_s11 + $0x1660] sm:$0xff]  ;;  %v602_v46 = vld [vmem:[%s9577_s11 + $0x628] sm:$0xff] }
 0x26a   : > { %5776 = vmatprep.subr.bf16.mxu1 %v7812_v47  ;;  %v610_v47 = vld [vmem:[%s9577_s11 + $0x668] sm:$0xff]  ;;  %v8482_v50 = vcombine.high %v1113_v43, %v1121_v45  ;;  %v8481_v57 = vcombine.low %v1113_v43, %v1121_v45 }
 0x26b   : > { %v7972_v51 = vcombine.high %v602_v46, %v610_v47  ;;  %v7971_v58 = vcombine.low %v602_v46, %v610_v47 }
 0x26c   : > { %5736 = vmatpush1.bf16.msra.mxu0 %v8321_v52  ;;  %v1097_v52 = vld [vmem:[%s9577_s11 + $0x15a0] sm:$0xff] }
 0x26d   : > { %5777 = vmatpush1.bf16.msra.mxu1 %v7811_v53  ;;  %5737 = vmatprep.subr.bf16.mxu0 %v8306_v55  ;;  %v1105_v53 = vld [vmem:[%s9577_s11 + $0x15e0] sm:$0xff]  ;;  %v586_v55 = vld [vmem:[%s9577_s11 + $0x5a8] sm:$0xff] }
 0x26e   : > { %5778 = vmatprep.subr.bf16.mxu1 %v7796_v56  ;;  %v594_v56 = vld [vmem:[%s9577_s11 + $0x5e8] sm:$0xff]  ;;  %v8466_v59 = vcombine.high %v1097_v52, %v1105_v53  ;;  %v8465_v2 = vcombine.low %v1097_v52, %v1105_v53 }
 0x26f   : > { %v7956_v9 = vcombine.high %v586_v55, %v594_v56  ;;  %v7955_v3 = vcombine.low %v586_v55, %v594_v56 }
 0x270   : > { %5738 = vmatpush1.bf16.msra.mxu0 %v8305_v60  ;;  %v1081_v60 = vld [vmem:[%s9577_s11 + $0x1520] sm:$0xff] }
 0x271   : > { %5779 = vmatpush1.bf16.msra.mxu1 %v7795_v61  ;;  %5739 = vmatprep.subr.bf16.mxu0 %v8290_v62  ;;  %v1089_v61 = vld [vmem:[%s9577_s11 + $0x1560] sm:$0xff]  ;;  %v570_v62 = vld [vmem:[%s9577_s11 + $0x528] sm:$0xff] }
 0x272   : > { %5780 = vmatprep.subr.bf16.mxu1 %v7780_v63  ;;  %v578_v63 = vld [vmem:[%s9577_s11 + $0x568] sm:$0xff]  ;;  %v8450_v19 = vcombine.high %v1081_v60, %v1089_v61  ;;  %v8449_v39 = vcombine.low %v1081_v60, %v1089_v61 }
 0x273   : > { %v7940_v4 = vcombine.high %v570_v62, %v578_v63  ;;  %v7939_v20 = vcombine.low %v570_v62, %v578_v63  ;;  %v1010_v60 = vld [vmem:[%s9577_s11 + $0x12e8] sm:$0xff] }
 0x274   : > { %5740 = vmatpush1.bf16.msra.mxu0 %v8289_v5  ;;  %v1065_v5 = vld [vmem:[%s9577_s11 + $0x14a0] sm:$0xff] }
 0x275   : > { %5781 = vmatpush1.bf16.msra.mxu1 %v7779_v12  ;;  %5741 = vmatprep.subr.bf16.mxu0 %v8530_v15  ;;  %v1073_v12 = vld [vmem:[%s9577_s11 + $0x14e0] sm:$0xff]  ;;  %v554_v15 = vld [vmem:[%s9577_s11 + $0x4a8] sm:$0xff] }
 0x276   : > { %5782 = vmatprep.subr.bf16.mxu1 %v8020_v17  ;;  %v562_v17 = vld [vmem:[%s9577_s11 + $0x4e8] sm:$0xff]  ;;  %v8434_v21 = vcombine.high %v1065_v5, %v1073_v12  ;;  %v8433_v28 = vcombine.low %v1065_v5, %v1073_v12 }
 0x277   : > { %v7924_v22 = vcombine.high %v554_v15, %v562_v17  ;;  %v7923_v31 = vcombine.low %v554_v15, %v562_v17  ;;  %v730_v12 = vld [vmem:[%s9577_s11 + $0xa28] sm:$0xff] }
 0x278   : > { %5742 = vmatpush2.bf16.msra.mxu0 %v8529_v24  ;;  %v1049_v24 = vld [vmem:[%s9577_s11 + $0x1420] sm:$0xff]  ;;  %v738_v15 = vld [vmem:[%s9577_s11 + $0xa68] sm:$0xff] }
 0x279   : > { %5783 = vmatpush2.bf16.msra.mxu1 %v8019_v25  ;;  %5743 = vmatprep.subr.bf16.mxu0 %v8514_v26  ;;  %v1057_v25 = vld [vmem:[%s9577_s11 + $0x1460] sm:$0xff]  ;;  %v538_v26 = vld [vmem:[%s9577_s11 + $0x428] sm:$0xff] }
 0x27a   : > { %5784 = vmatprep.subr.bf16.mxu1 %v8004_v54  ;;  %v546_v54 = vld [vmem:[%s9577_s11 + $0x468] sm:$0xff]  ;;  %v8418_v32 = vcombine.high %v1049_v24, %v1057_v25  ;;  %v8417_v43 = vcombine.low %v1049_v24, %v1057_v25  ;;  %v8100_v25 = vcombine.high %v730_v12, %v738_v15 }
 0x27b   : > { %v7908_v34 = vcombine.high %v538_v26, %v546_v54  ;;  %v7907_v45 = vcombine.low %v538_v26, %v546_v54 }
 0x27c   : > { %5744 = vmatpush2.bf16.msra.mxu0 %v8513_v37  ;;  %v778_v37 = vld [vmem:[%s9577_s11 + $0xba8] sm:$0xff] }
 0x27d   : > { %5785 = vmatpush2.bf16.msra.mxu1 %v8003_v38  ;;  %5745 = vmatprep.subr.bf16.mxu0 %v8498_v29  ;;  %v786_v38 = vld [vmem:[%s9577_s11 + $0xbe8] sm:$0xff] }
 0x27e   : > { %5786 = vmatprep.subr.bf16.mxu1 %v7988_v40  ;;  %v1034_v29 = vld [vmem:[%s9577_s11 + $0x13a8] sm:$0xff]  ;;  %v8148_v46 = vcombine.high %v778_v37, %v786_v38  ;;  %v8147_v52 = vcombine.low %v778_v37, %v786_v38  ;;  %v8099_v37 = vcombine.low %v730_v12, %v738_v15 }
 0x27f   : > { %v1042_v40 = vld [vmem:[%s9577_s11 + $0x13e8] sm:$0xff] }
 0x280   : > { %5746 = vmatpush2.bf16.msra.mxu0 %v8497_v48  ;;  %v8404_v47 = vcombine.high %v1034_v29, %v1042_v40  ;;  %v762_v48 = vld [vmem:[%s9577_s11 + $0xb28] sm:$0xff]  ;;  %v8403_v53 = vcombine.low %v1034_v29, %v1042_v40 }
 0x281   : > { %5787 = vmatpush2.bf16.msra.mxu1 %v7987_v49  ;;  %5747 = vmatprep.subr.bf16.mxu0 %v8482_v50  ;;  %v770_v49 = vld [vmem:[%s9577_s11 + $0xb68] sm:$0xff] }
 0x282   : > { %5788 = vmatprep.subr.bf16.mxu1 %v7972_v51  ;;  %v1018_v50 = vld [vmem:[%s9577_s11 + $0x1328] sm:$0xff]  ;;  %v8132_v55 = vcombine.high %v762_v48, %v770_v49  ;;  %v8131_v63 = vcombine.low %v762_v48, %v770_v49 }
 0x283   : > { %v1026_v51 = vld [vmem:[%s9577_s11 + $0x1368] sm:$0xff] }
 0x284   : > { %5748 = vmatpush2.bf16.msra.mxu0 %v8481_v57  ;;  %v8388_v56 = vcombine.high %v1018_v50, %v1026_v51  ;;  %v746_v57 = vld [vmem:[%s9577_s11 + $0xaa8] sm:$0xff] }
 0x285   : > { %5789 = vmatpush2.bf16.msra.mxu1 %v7971_v58  ;;  %5749 = vmatprep.subr.bf16.mxu0 %v8466_v59  ;;  %v754_v58 = vld [vmem:[%s9577_s11 + $0xae8] sm:$0xff] }
 0x286   : > { %5790 = vmatprep.subr.bf16.mxu1 %v7956_v9  ;;  %v1002_v9 = vld [vmem:[%s9577_s11 + $0x12a8] sm:$0xff] }
 0x287   : > { %v8371_v24 = vcombine.low %v1002_v9, %v1010_v60 }
 0x288   : > { %5750 = vmatpush2.bf16.msra.mxu0 %v8465_v2 }
 0x289   : > { %5791 = vmatpush2.bf16.msra.mxu1 %v7955_v3  ;;  %5751 = vmatprep.subr.bf16.mxu0 %v8450_v19  ;;  %v8387_v3 = vcombine.low %v1018_v50, %v1026_v51  ;;  %v8116_v19 = vcombine.high %v746_v57, %v754_v58 }
 0x28a   : > { %5792 = vmatprep.subr.bf16.mxu1 %v7940_v4 }
 0x28c   : > { %5752 = vmatpush2.bf16.msra.mxu0 %v8449_v39  ;;  %v986_v39 = vld [vmem:[%s9577_s11 + $0x1228] sm:$0xff] }
 0x28d   : > { %5793 = vmatpush2.bf16.msra.mxu1 %v7939_v20  ;;  %5753 = vmatprep.subr.bf16.mxu0 %v8434_v21  ;;  %v994_v20 = vld [vmem:[%s9577_s11 + $0x1268] sm:$0xff] }
 0x28e   : > { %5794 = vmatprep.subr.bf16.mxu1 %v7924_v22  ;;  %v8356_v54 = vcombine.high %v986_v39, %v994_v20  ;;  %v8355_v38 = vcombine.low %v986_v39, %v994_v20  ;;  %v914_v39 = vld [vmem:[%s9577_s11 + $0xfe8] sm:$0xff] }
 0x28f   : > { %v1162_v20 = vld [vmem:[%s9577_s11 + $0x17a8] sm:$0xff] }
 0x290   : > { %5754 = vmatpush2.bf16.msra.mxu0 %v8433_v28  ;;  %v714_v28 = vld [vmem:[%s9577_s11 + $0x9a8] sm:$0xff] }
 0x291   : > { %5795 = vmatpush2.bf16.msra.mxu1 %v7923_v31  ;;  %5755 = vmatprep.subr.bf16.mxu0 %v8418_v32  ;;  %v722_v31 = vld [vmem:[%s9577_s11 + $0x9e8] sm:$0xff] }
 0x292   : > { %5796 = vmatprep.subr.bf16.mxu1 %v7908_v34  ;;  %v970_v32 = vld [vmem:[%s9577_s11 + $0x11a8] sm:$0xff]  ;;  %v8084_v29 = vcombine.high %v714_v28, %v722_v31  ;;  %v8083_v48 = vcombine.low %v714_v28, %v722_v31 }
 0x293   : > { %v978_v34 = vld [vmem:[%s9577_s11 + $0x11e8] sm:$0xff] }
 0x294   : > { %5756 = vmatpush2.bf16.msra.mxu0 %v8417_v43  ;;  %v8340_v40 = vcombine.high %v970_v32, %v978_v34  ;;  %v698_v43 = vld [vmem:[%s9577_s11 + $0x928] sm:$0xff]  ;;  %v8339_v49 = vcombine.low %v970_v32, %v978_v34 }
 0x295   : > { %5797 = vmatpush2.bf16.msra.mxu1 %v7907_v45  ;;  %5807 = vmatprep.subr.bf16.mxu0 %v8148_v46  ;;  %v706_v45 = vld [vmem:[%s9577_s11 + $0x968] sm:$0xff] }
 0x296   : > { %5848 = vmatprep.subr.bf16.mxu1 %v8404_v47  ;;  %v954_v46 = vld [vmem:[%s9577_s11 + $0x1128] sm:$0xff]  ;;  %v8068_v50 = vcombine.high %v698_v43, %v706_v45 }
 0x297   : > { %v5513_v59 = vpop.f32.mrf.mxu0  ;;  %5758 = vmatmul.mubr.bf16.vlgmr.msra.gmra.mxu0 %v9669_v33  ;;  %v962_v47 = vld [vmem:[%s9577_s11 + $0x1168] sm:$0xff] }
 0x298   : > { %v10248_v61 = vadd.f32 %v5513_v59, %v10176_v11  ;;  %v10250_v62 = vpop.f32.mrf.mxu1  ;;  %5799 = vmatmul.mubr.bf16.vlgmr.msra.gmra.mxu1 %v9697_v23  ;;  %5808 = vmatpush1.bf16.msra.mxu0 %v8147_v52  ;;  %v8372_v11 = vcombine.high %v1002_v9, %v1010_v60  ;;  %v8324_v51 = vcombine.high %v954_v46, %v962_v47  ;;  %v682_v52 = vld [vmem:[%s9577_s11 + $0x8a8] sm:$0xff] }
 0x299   : > { %5849 = vmatpush1.bf16.msra.mxu1 %v8403_v53  ;;  %v5515_v2 = vpop.f32.mrf.mxu0  ;;  %5809 = vmatprep.subr.bf16.mxu0 %v8132_v55  ;;  %v690_v53 = vld [vmem:[%s9577_s11 + $0x8e8] sm:$0xff] }
 0x29a   : > { %v10254_v4 = vadd.f32 %v5515_v2, %v10184_v6  ;;  %v10256_v5 = vpop.f32.mrf.mxu1  ;;  %5850 = vmatprep.subr.bf16.mxu1 %v8388_v56  ;;  %5839 = vmatprep.mubr.bf16.mxu0 %v9653_v14  ;;  %v8115_v6 = vcombine.low %v746_v57, %v754_v58  ;;  %v938_v55 = vld [vmem:[%s9577_s11 + $0x10a8] sm:$0xff]  ;;  %v8067_v57 = vcombine.low %v698_v43, %v706_v45 }
 0x29b   : > { %v5517_v17 = vpop.f32.mrf.mxu0  ;;  %5880 = vmatprep.mubr.bf16.mxu1 %v9714_v41  ;;  %v946_v56 = vld [vmem:[%s9577_s11 + $0x10e8] sm:$0xff]  ;;  %v8323_v58 = vcombine.low %v954_v46, %v962_v47  ;;  %v8052_v59 = vcombine.high %v682_v52, %v690_v53 }
 0x29c   : > { %v5558_v21 = vpop.f32.mrf.mxu1  ;;  %5810 = vmatpush1.bf16.msra.mxu0 %v8131_v63  ;;  %v8308_v9 = vcombine.high %v938_v55, %v946_v56  ;;  %v666_v60 = vld [vmem:[%s9577_s11 + $0x828] sm:$0xff] }
 0x29d   : > { %5851 = vmatpush1.bf16.msra.mxu1 %v8387_v3  ;;  %v5518_v22 = vpop.f32.mrf.mxu0  ;;  %5811 = vmatprep.subr.bf16.mxu0 %v8116_v19  ;;  %v674_v63 = vld [vmem:[%s9577_s11 + $0x868] sm:$0xff]  ;;  %v8051_v19 = vcombine.low %v682_v52, %v690_v53 }
 0x29e   : > { %v5559_v26 = vpop.f32.mrf.mxu1  ;;  %5852 = vmatprep.subr.bf16.mxu1 %v8372_v11  ;;  %v922_v2 = vld [vmem:[%s9577_s11 + $0x1028] sm:$0xff]  ;;  %v8307_v11 = vcombine.low %v938_v55, %v946_v56  ;;  %v8036_v12 = vcombine.high %v666_v60, %v674_v63 }
 0x29f   : > { %v930_v3 = vld [vmem:[%s9577_s11 + $0x1068] sm:$0xff] }
 0x2a0   : > { %5812 = vmatpush1.bf16.msra.mxu0 %v8115_v6  ;;  %v8292_v15 = vcombine.high %v922_v2, %v930_v3  ;;  %v906_v17 = vld [vmem:[%s9577_s11 + $0xfa8] sm:$0xff]  ;;  %v8035_v6 = vcombine.low %v666_v60, %v674_v63  ;;  %v8291_v22 = vcombine.low %v922_v2, %v930_v3 }
 0x2a1   : > { %5853 = vmatpush1.bf16.msra.mxu1 %v8371_v24  ;;  %5813 = vmatprep.subr.bf16.mxu0 %v8100_v25  ;;  %v1170_v21 = vld [vmem:[%s9577_s11 + $0x17e8] sm:$0xff]  ;;  %v8276_v24 = vcombine.high %v906_v17, %v914_v39  ;;  %v8275_v32 = vcombine.low %v906_v17, %v914_v39 }
 0x2a2   : > { %5854 = vmatprep.subr.bf16.mxu1 %v8356_v54  ;;  %v8532_v25 = vcombine.high %v1162_v20, %v1170_v21  ;;  %v890_v26 = vld [vmem:[%s9577_s11 + $0xf28] sm:$0xff]  ;;  %v8531_v34 = vcombine.low %v1162_v20, %v1170_v21 }
 0x2a3   : > { %v898_v54 = vld [vmem:[%s9577_s11 + $0xf68] sm:$0xff] }
 0x2a4   : > { %5814 = vmatpush1.bf16.msra.mxu0 %v8099_v37  ;;  %v1146_v28 = vld [vmem:[%s9577_s11 + $0x1728] sm:$0xff]  ;;  %v8260_v37 = vcombine.high %v890_v26, %v898_v54  ;;  %v8259_v46 = vcombine.low %v890_v26, %v898_v54 }
 0x2a5   : > { %5855 = vmatpush1.bf16.msra.mxu1 %v8355_v38  ;;  %5815 = vmatprep.subr.bf16.mxu0 %v8084_v29  ;;  %v1154_v31 = vld [vmem:[%s9577_s11 + $0x1768] sm:$0xff] }
 0x2a6   : > { %5856 = vmatprep.subr.bf16.mxu1 %v8340_v40  ;;  %v8516_v38 = vcombine.high %v1146_v28, %v1154_v31  ;;  %v874_v29 = vld [vmem:[%s9577_s11 + $0xea8] sm:$0xff]  ;;  %v8515_v47 = vcombine.low %v1146_v28, %v1154_v31 }
 0x2a7   : > { %v882_v40 = vld [vmem:[%s9577_s11 + $0xee8] sm:$0xff] }
 0x2a8   : > { %5816 = vmatpush1.bf16.msra.mxu0 %v8083_v48  ;;  %v1130_v43 = vld [vmem:[%s9577_s11 + $0x16a8] sm:$0xff]  ;;  %v8244_v48 = vcombine.high %v874_v29, %v882_v40  ;;  %v8243_v55 = vcombine.low %v874_v29, %v882_v40 }
 0x2a9   : > { %5857 = vmatpush1.bf16.msra.mxu1 %v8339_v49  ;;  %5817 = vmatprep.subr.bf16.mxu0 %v8068_v50  ;;  %v1138_v45 = vld [vmem:[%s9577_s11 + $0x16e8] sm:$0xff] }
 0x2aa   : > { %5858 = vmatprep.subr.bf16.mxu1 %v8324_v51  ;;  %v8500_v49 = vcombine.high %v1130_v43, %v1138_v45  ;;  %v858_v50 = vld [vmem:[%s9577_s11 + $0xe28] sm:$0xff]  ;;  %v8499_v56 = vcombine.low %v1130_v43, %v1138_v45 }
 0x2ab   : > { %v866_v51 = vld [vmem:[%s9577_s11 + $0xe68] sm:$0xff] }
 0x2ac   : > { %5818 = vmatpush1.bf16.msra.mxu0 %v8067_v57  ;;  %v1114_v52 = vld [vmem:[%s9577_s11 + $0x1628] sm:$0xff]  ;;  %v8228_v57 = vcombine.high %v858_v50, %v866_v51  ;;  %v8227_v2 = vcombine.low %v858_v50, %v866_v51  ;;  %v531_v50 = vld [vmem:[%s9577_s11 + $0x3f0] sm:$0xff] }
 0x2ad   : > { %5859 = vmatpush1.bf16.msra.mxu1 %v8323_v58  ;;  %5819 = vmatprep.subr.bf16.mxu0 %v8052_v59  ;;  %v1122_v53 = vld [vmem:[%s9577_s11 + $0x1668] sm:$0xff]  ;;  %v779_v51 = vld [vmem:[%s9577_s11 + $0xbb0] sm:$0xff] }
 0x2ae   : > { %5860 = vmatprep.subr.bf16.mxu1 %v8308_v9  ;;  %v8484_v58 = vcombine.high %v1114_v52, %v1122_v53  ;;  %v842_v59 = vld [vmem:[%s9577_s11 + $0xda8] sm:$0xff]  ;;  %v8483_v3 = vcombine.low %v1114_v52, %v1122_v53  ;;  %v787_v52 = vld [vmem:[%s9577_s11 + $0xbf0] sm:$0xff]  ;;  %v1207_v53 = vsub.s32 7, %v9623_v44 }
 0x2af   : > { %v850_v9 = vld [vmem:[%s9577_s11 + $0xde8] sm:$0xff] }
 0x2b0   : > { %5820 = vmatpush1.bf16.msra.mxu0 %v8051_v19  ;;  %v1098_v60 = vld [vmem:[%s9577_s11 + $0x15a8] sm:$0xff]  ;;  %v8212_v19 = vcombine.high %v842_v59, %v850_v9  ;;  %v8211_v20 = vcombine.low %v842_v59, %v850_v9  ;;  %v8150_v59 = vcombine.high %v779_v51, %v787_v52  ;;  %v507_v9 = vld [vmem:[%s9577_s11 + $0x330] sm:$0xff] }
 0x2b1   : > { %5861 = vmatpush1.bf16.msra.mxu1 %v8307_v11  ;;  %5821 = vmatprep.subr.bf16.mxu0 %v8036_v12  ;;  %v1106_v63 = vld [vmem:[%s9577_s11 + $0x15e8] sm:$0xff] }
 0x2b2   : > { %5862 = vmatprep.subr.bf16.mxu1 %v8292_v15  ;;  %v8468_v11 = vcombine.high %v1098_v60, %v1106_v63  ;;  %v826_v12 = vld [vmem:[%s9577_s11 + $0xd28] sm:$0xff]  ;;  %v8467_v21 = vcombine.low %v1098_v60, %v1106_v63  ;;  %v515_v60 = vld [vmem:[%s9577_s11 + $0x370] sm:$0xff] }
 0x2b3   : > { %v834_v15 = vld [vmem:[%s9577_s11 + $0xd68] sm:$0xff]  ;;  %v763_v63 = vld [vmem:[%s9577_s11 + $0xb30] sm:$0xff] }
 0x2b4   : > { %5822 = vmatpush1.bf16.msra.mxu0 %v8035_v6  ;;  %v1082_v17 = vld [vmem:[%s9577_s11 + $0x1528] sm:$0xff]  ;;  %v8196_v6 = vcombine.high %v826_v12, %v834_v15  ;;  %v8195_v28 = vcombine.low %v826_v12, %v834_v15  ;;  %v7878_v12 = vcombine.high %v507_v9, %v515_v60 }
 0x2b5   : > { %5863 = vmatpush1.bf16.msra.mxu1 %v8291_v22  ;;  %5823 = vmatprep.subr.bf16.mxu0 %v8276_v24  ;;  %v1090_v39 = vld [vmem:[%s9577_s11 + $0x1568] sm:$0xff] }
 0x2b6   : > { %5864 = vmatprep.subr.bf16.mxu1 %v8532_v25  ;;  %v8452_v22 = vcombine.high %v1082_v17, %v1090_v39  ;;  %v810_v24 = vld [vmem:[%s9577_s11 + $0xca8] sm:$0xff]  ;;  %v8451_v31 = vcombine.low %v1082_v17, %v1090_v39  ;;  %v491_v39 = vld [vmem:[%s9577_s11 + $0x2b0] sm:$0xff] }
 0x2b7   : > { %v818_v25 = vld [vmem:[%s9577_s11 + $0xce8] sm:$0xff] }
 0x2b8   : > { %5824 = vmatpush2.bf16.msra.mxu0 %v8275_v32  ;;  %v1066_v26 = vld [vmem:[%s9577_s11 + $0x14a8] sm:$0xff]  ;;  %v8180_v32 = vcombine.high %v810_v24, %v818_v25  ;;  %v8179_v43 = vcombine.low %v810_v24, %v818_v25 }
 0x2b9   : > { %5865 = vmatpush2.bf16.msra.mxu1 %v8531_v34  ;;  %5825 = vmatprep.subr.bf16.mxu0 %v8260_v37  ;;  %v1074_v54 = vld [vmem:[%s9577_s11 + $0x14e8] sm:$0xff] }
 0x2ba   : > { %5866 = vmatprep.subr.bf16.mxu1 %v8516_v38  ;;  %v8436_v34 = vcombine.high %v1066_v26, %v1074_v54  ;;  %v794_v37 = vld [vmem:[%s9577_s11 + $0xc28] sm:$0xff]  ;;  %v8435_v45 = vcombine.low %v1066_v26, %v1074_v54 }
 0x2bb   : > { %v802_v38 = vld [vmem:[%s9577_s11 + $0xc68] sm:$0xff] }
 0x2bc   : > { %5826 = vmatpush2.bf16.msra.mxu0 %v8259_v46  ;;  %v1050_v29 = vld [vmem:[%s9577_s11 + $0x1428] sm:$0xff]  ;;  %v8164_v46 = vcombine.high %v794_v37, %v802_v38 }
 0x2bd   : > { %5867 = vmatpush2.bf16.msra.mxu1 %v8515_v47  ;;  %5827 = vmatprep.subr.bf16.mxu0 %v8244_v48  ;;  %v1058_v40 = vld [vmem:[%s9577_s11 + $0x1468] sm:$0xff]  ;;  %v1203_v47 = vsub.s32 6, %v9623_v44 }
 0x2be   : > { %5868 = vmatprep.subr.bf16.mxu1 %v8500_v49  ;;  %v8420_v48 = vcombine.high %v1050_v29, %v1058_v40  ;;  %v523_v49 = vld [vmem:[%s9577_s11 + $0x3b0] sm:$0xff] }
 0x2c0   : > { %5828 = vmatpush2.bf16.msra.mxu0 %v8243_v55  ;;  %v8163_v55 = vcombine.low %v794_v37, %v802_v38  ;;  %v475_v37 = vld [vmem:[%s9577_s11 + $0x230] sm:$0xff] }
 0x2c1   : > { %5869 = vmatpush2.bf16.msra.mxu1 %v8499_v56  ;;  %5829 = vmatprep.subr.bf16.mxu0 %v8228_v57  ;;  %v8419_v56 = vcombine.low %v1050_v29, %v1058_v40  ;;  %v7894_v57 = vcombine.high %v523_v49, %v531_v50  ;;  %v483_v38 = vld [vmem:[%s9577_s11 + $0x270] sm:$0xff] }
 0x2c2   : > { %5870 = vmatprep.subr.bf16.mxu1 %v8484_v58  ;;  %v1204_v58 = vrot.slane %v10162_v42, %v1203_v47  ;;  %v731_v40 = vld [vmem:[%s9577_s11 + $0xa30] sm:$0xff] }
 0x2c4   : > { %5830 = vmatpush2.bf16.msra.mxu0 %v8227_v2  ;;  %v771_v2 = vld [vmem:[%s9577_s11 + $0xb70] sm:$0xff]  ;;  %v5555_v15 = vadd.f32 %v10250_v62, %v1204_v58  ;;  %v7877_v62 = vcombine.low %v507_v9, %v515_v60  ;;  %v7845_v9 = vcombine.low %v475_v37, %v483_v38 }
 0x2c5   : > { %5871 = vmatpush2.bf16.msra.mxu1 %v8483_v3  ;;  %5831 = vmatprep.subr.bf16.mxu0 %v8212_v19  ;;  %v1208_v3 = vrot.slane %v10162_v42, %v1207_v53  ;;  %v7893_v19 = vcombine.low %v523_v49, %v531_v50  ;;  %v8134_v17 = vcombine.high %v763_v63, %v771_v2  ;;  %v715_v58 = vld [vmem:[%s9577_s11 + $0x9b0] sm:$0xff] }
 0x2c6   : > { %5872 = vmatprep.subr.bf16.mxu1 %v8468_v11  ;;  %v8149_v11 = vcombine.low %v779_v51, %v787_v52  ;;  %v8133_v54 = vcombine.low %v763_v63, %v771_v2  ;;  %v7846_v51 = vcombine.high %v475_v37, %v483_v38 }
 0x2c7   : > { %v5557_v24 = vadd.f32 %v10256_v5, %v1208_v3  ;;  %v443_v3 = vld [vmem:[%s9577_s11 + $0x130] sm:$0xff] }
 0x2c8   : > { %5832 = vmatpush2.bf16.msra.mxu0 %v8211_v20  ;;  %v499_v20 = vld [vmem:[%s9577_s11 + $0x2f0] sm:$0xff] }
 0x2c9   : > { %5873 = vmatpush2.bf16.msra.mxu1 %v8467_v21  ;;  %5833 = vmatprep.subr.bf16.mxu0 %v8196_v6  ;;  %v747_v6 = vld [vmem:[%s9577_s11 + $0xab0] sm:$0xff] }
 0x2ca   : > { %5874 = vmatprep.subr.bf16.mxu1 %v8452_v22  ;;  %v755_v22 = vld [vmem:[%s9577_s11 + $0xaf0] sm:$0xff] }
 0x2cb   : > { %v8118_v5 = vcombine.high %v747_v6, %v755_v22  ;;  %v8117_v50 = vcombine.low %v747_v6, %v755_v22  ;;  %v435_v6 = vld [vmem:[%s9577_s11 + $0xf0] sm:$0xff] }
 0x2cc   : > { %5834 = vmatpush2.bf16.msra.mxu0 %v8195_v28  ;;  %v7862_v28 = vcombine.high %v491_v39, %v499_v20  ;;  %v683_v22 = vld [vmem:[%s9577_s11 + $0x8b0] sm:$0xff] }
 0x2cd   : > { %5875 = vmatpush2.bf16.msra.mxu1 %v8451_v31  ;;  %5835 = vmatprep.subr.bf16.mxu0 %v8180_v32 }
 0x2ce   : > { %5876 = vmatprep.subr.bf16.mxu1 %v8436_v34 }
 0x2d0   : > { %5836 = vmatpush2.bf16.msra.mxu0 %v8179_v43  ;;  %v739_v43 = vld [vmem:[%s9577_s11 + $0xa70] sm:$0xff] }
 0x2d1   : > { %5877 = vmatpush2.bf16.msra.mxu1 %v8435_v45  ;;  %5837 = vmatprep.subr.bf16.mxu0 %v8164_v46  ;;  %v8101_v60 = vcombine.low %v731_v40, %v739_v43 }
 0x2d2   : > { %5878 = vmatprep.subr.bf16.mxu1 %v8420_v48  ;;  %v7861_v48 = vcombine.low %v491_v39, %v499_v20 }
 0x2d4   : > { %5838 = vmatpush2.bf16.msra.mxu0 %v8163_v55  ;;  %v8102_v55 = vcombine.high %v731_v40, %v739_v43  ;;  %v651_v40 = vld [vmem:[%s9577_s11 + $0x7b0] sm:$0xff] }
 0x2d5   : > { %5879 = vmatpush2.bf16.msra.mxu1 %v8419_v56  ;;  %5889 = vmatprep.subr.bf16.mxu0 %v7894_v57  ;;  %v459_v56 = vld [vmem:[%s9577_s11 + $0x1b0] sm:$0xff] }
 0x2d6   : > { %5930 = vmatprep.subr.bf16.mxu1 %v8150_v59  ;;  %v467_v57 = vld [vmem:[%s9577_s11 + $0x1f0] sm:$0xff] }
 0x2d7   : > { %v5595_v21 = vpop.f32.mrf.mxu0  ;;  %5840 = vmatmul.mubr.bf16.vlgmr.msra.gmra.mxu0 %v9707_v0  ;;  %v723_v59 = vld [vmem:[%s9577_s11 + $0x9f0] sm:$0xff]  ;;  %v7830_v63 = vcombine.high %v459_v56, %v467_v57 }
 0x2d8   : > { %v5596_v42 = vadd.f32 %v5595_v21, %v5555_v15  ;;  %v5636_v25 = vpop.f32.mrf.mxu1  ;;  %5881 = vmatmul.mubr.bf16.vlgmr.msra.gmra.mxu1 %v9669_v33  ;;  %5890 = vmatpush1.bf16.msra.mxu0 %v7893_v19  ;;  %v8086_v2 = vcombine.high %v715_v58, %v723_v59  ;;  %v451_v19 = vld [vmem:[%s9577_s11 + $0x170] sm:$0xff]  ;;  %v7829_v15 = vcombine.low %v459_v56, %v467_v57 }
 0x2d9   : > { %5931 = vmatpush1.bf16.msra.mxu1 %v8149_v11  ;;  %v5597_v26 = vpop.f32.mrf.mxu0  ;;  %5891 = vmatprep.subr.bf16.mxu0 %v7878_v12  ;;  %v699_v11 = vld [vmem:[%s9577_s11 + $0x930] sm:$0xff]  ;;  %v7814_v39 = vcombine.high %v443_v3, %v451_v19 }
 0x2da   : > { %v10336_v31 = vadd.f32 %v5636_v25, %v5596_v42  ;;  %v5598_v32 = vadd.f32 %v5597_v26, %v5557_v24  ;;  %v5638_v34 = vpop.f32.mrf.mxu1  ;;  %5932 = vmatprep.subr.bf16.mxu1 %v8134_v17  ;;  %5921 = vmatprep.mubr.bf16.mxu0 %v9646_v10  ;;  %v707_v12 = vld [vmem:[%s9577_s11 + $0x970] sm:$0xff]  ;;  %v8085_v17 = vcombine.low %v715_v58, %v723_v59 }
 0x2db   : > { %v5599_v29 = vpop.f32.mrf.mxu0  ;;  %5962 = vmatprep.mubr.bf16.mxu1 %v9653_v14  ;;  %v8070_v20 = vcombine.high %v699_v11, %v707_v12  ;;  %v427_v21 = vld [vmem:[%s9577_s11 + $0xb0] sm:$0xff]  ;;  %v7813_v42 = vcombine.low %v443_v3, %v451_v19  ;;  %v8069_v25 = vcombine.low %v699_v11, %v707_v12 }
 0x2dc   : > { %v10344_v45 = vadd.f32 %v5638_v34, %v5598_v32  ;;  %v5640_v46 = vpop.f32.mrf.mxu1  ;;  %5892 = vmatpush1.bf16.msra.mxu0 %v7877_v62  ;;  %v691_v24 = vld [vmem:[%s9577_s11 + $0x8f0] sm:$0xff]  ;;  %v7798_v62 = vcombine.high %v427_v21, %v435_v6 }
 0x2dd   : > { %5933 = vmatpush1.bf16.msra.mxu1 %v8133_v54  ;;  %v5600_v49 = vpop.f32.mrf.mxu0  ;;  %5893 = vmatprep.subr.bf16.mxu0 %v7862_v28  ;;  %v8054_v26 = vcombine.high %v683_v22, %v691_v24  ;;  %v411_v54 = vld [vmem:[%s9577_s11 + $0x30] sm:$0xff]  ;;  %v8053_v37 = vcombine.low %v683_v22, %v691_v24 }
 0x2de   : > { %v5641_v52 = vpop.f32.mrf.mxu1  ;;  %5934 = vmatprep.subr.bf16.mxu1 %v8118_v5  ;;  %v419_v28 = vld [vmem:[%s9577_s11 + $0x70] sm:$0xff]  ;;  %v7797_v5 = vcombine.low %v427_v21, %v435_v6 }
 0x2df   : > { %v667_v32 = vld [vmem:[%s9577_s11 + $0x830] sm:$0xff]  ;;  %v7782_v38 = vcombine.high %v411_v54, %v419_v28  ;;  %v7781_v49 = vcombine.low %v411_v54, %v419_v28 }
 0x2e0   : > { %5894 = vmatpush1.bf16.msra.mxu0 %v7861_v48  ;;  %v675_v34 = vld [vmem:[%s9577_s11 + $0x870] sm:$0xff] }
 0x2e1   : > { %5935 = vmatpush1.bf16.msra.mxu1 %v8117_v50  ;;  %5895 = vmatprep.subr.bf16.mxu0 %v7846_v51  ;;  %v8038_v29 = vcombine.high %v667_v32, %v675_v34  ;;  %v659_v43 = vld [vmem:[%s9577_s11 + $0x7f0] sm:$0xff]  ;;  %v8037_v50 = vcombine.low %v667_v32, %v675_v34 }
 0x2e2   : > { %5936 = vmatprep.subr.bf16.mxu1 %v8102_v55  ;;  %v907_v46 = vld [vmem:[%s9577_s11 + $0xfb0] sm:$0xff]  ;;  %v8022_v51 = vcombine.high %v651_v40, %v659_v43  ;;  %v8021_v59 = vcombine.low %v651_v40, %v659_v43 }
 0x2e3   : > { %v915_v48 = vld [vmem:[%s9577_s11 + $0xff0] sm:$0xff] }
 0x2e4   : > { %5896 = vmatpush1.bf16.msra.mxu0 %v7845_v9  ;;  %v8278_v52 = vcombine.high %v907_v46, %v915_v48  ;;  %v635_v55 = vld [vmem:[%s9577_s11 + $0x730] sm:$0xff]  ;;  %v8277_v9 = vcombine.low %v907_v46, %v915_v48 }
 0x2e5   : > { %5937 = vmatpush1.bf16.msra.mxu1 %v8101_v60  ;;  %5897 = vmatprep.subr.bf16.mxu0 %v7830_v63  ;;  %v643_v56 = vld [vmem:[%s9577_s11 + $0x770] sm:$0xff] }
 0x2e6   : > { %5938 = vmatprep.subr.bf16.mxu1 %v8086_v2  ;;  %v891_v57 = vld [vmem:[%s9577_s11 + $0xf30] sm:$0xff]  ;;  %v8006_v60 = vcombine.high %v635_v55, %v643_v56  ;;  %v8005_v12 = vcombine.low %v635_v55, %v643_v56 }
 0x2e7   : > { %v899_v58 = vld [vmem:[%s9577_s11 + $0xf70] sm:$0xff] }
 0x2e8   : > { %5898 = vmatpush1.bf16.msra.mxu0 %v7829_v15  ;;  %v8262_v63 = vcombine.high %v891_v57, %v899_v58  ;;  %v619_v2 = vld [vmem:[%s9577_s11 + $0x6b0] sm:$0xff]  ;;  %v8261_v15 = vcombine.low %v891_v57, %v899_v58 }
 0x2e9   : > { %5939 = vmatpush1.bf16.msra.mxu1 %v8085_v17  ;;  %5899 = vmatprep.subr.bf16.mxu0 %v7814_v39  ;;  %v627_v3 = vld [vmem:[%s9577_s11 + $0x6f0] sm:$0xff] }
 0x2ea   : > { %5940 = vmatprep.subr.bf16.mxu1 %v8070_v20  ;;  %v875_v19 = vld [vmem:[%s9577_s11 + $0xeb0] sm:$0xff]  ;;  %v7990_v17 = vcombine.high %v619_v2, %v627_v3  ;;  %v7989_v24 = vcombine.low %v619_v2, %v627_v3 }
 0x2eb   : > { %v883_v11 = vld [vmem:[%s9577_s11 + $0xef0] sm:$0xff] }
 0x2ec   : > { %5900 = vmatpush1.bf16.msra.mxu0 %v7813_v42  ;;  %v8246_v39 = vcombine.high %v875_v19, %v883_v11  ;;  %v603_v20 = vld [vmem:[%s9577_s11 + $0x630] sm:$0xff]  ;;  %v8245_v42 = vcombine.low %v875_v19, %v883_v11 }
 0x2ed   : > { %5941 = vmatpush1.bf16.msra.mxu1 %v8069_v25  ;;  %5901 = vmatprep.subr.bf16.mxu0 %v7798_v62  ;;  %v611_v21 = vld [vmem:[%s9577_s11 + $0x670] sm:$0xff] }
 0x2ee   : > { %5942 = vmatprep.subr.bf16.mxu1 %v8054_v26  ;;  %v859_v6 = vld [vmem:[%s9577_s11 + $0xe30] sm:$0xff]  ;;  %v7974_v25 = vcombine.high %v603_v20, %v611_v21  ;;  %v7973_v34 = vcombine.low %v603_v20, %v611_v21  ;;  %v524_v21 = vld [vmem:[%s9577_s11 + $0x3b8] sm:$0xff] }
 0x2ef   : > { %v867_v22 = vld [vmem:[%s9577_s11 + $0xe70] sm:$0xff] }
 0x2f0   : > { %5902 = vmatpush1.bf16.msra.mxu0 %v7797_v5  ;;  %v8230_v62 = vcombine.high %v859_v6, %v867_v22  ;;  %v587_v26 = vld [vmem:[%s9577_s11 + $0x5b0] sm:$0xff]  ;;  %v8229_v5 = vcombine.low %v859_v6, %v867_v22  ;;  %v532_v6 = vld [vmem:[%s9577_s11 + $0x3f8] sm:$0xff] }
 0x2f1   : > { %5943 = vmatpush1.bf16.msra.mxu1 %v8053_v37  ;;  %5903 = vmatprep.subr.bf16.mxu0 %v7782_v38  ;;  %v595_v54 = vld [vmem:[%s9577_s11 + $0x5f0] sm:$0xff] }
 0x2f2   : > { %5944 = vmatprep.subr.bf16.mxu1 %v8038_v29  ;;  %v843_v28 = vld [vmem:[%s9577_s11 + $0xdb0] sm:$0xff]  ;;  %v7958_v37 = vcombine.high %v587_v26, %v595_v54  ;;  %v7957_v48 = vcombine.low %v587_v26, %v595_v54 }
 0x2f3   : > { %v851_v32 = vld [vmem:[%s9577_s11 + $0xdf0] sm:$0xff] }
 0x2f4   : > { %5904 = vmatpush1.bf16.msra.mxu0 %v7781_v49  ;;  %v8214_v38 = vcombine.high %v843_v28, %v851_v32  ;;  %v571_v29 = vld [vmem:[%s9577_s11 + $0x530] sm:$0xff]  ;;  %v8213_v49 = vcombine.low %v843_v28, %v851_v32  ;;  %v508_v28 = vld [vmem:[%s9577_s11 + $0x338] sm:$0xff] }
 0x2f5   : > { %5945 = vmatpush1.bf16.msra.mxu1 %v8037_v50  ;;  %5905 = vmatprep.subr.bf16.mxu0 %v8022_v51  ;;  %v579_v40 = vld [vmem:[%s9577_s11 + $0x570] sm:$0xff]  ;;  %v516_v32 = vld [vmem:[%s9577_s11 + $0x378] sm:$0xff] }
 0x2f6   : > { %5946 = vmatprep.subr.bf16.mxu1 %v8278_v52  ;;  %v827_v43 = vld [vmem:[%s9577_s11 + $0xd30] sm:$0xff]  ;;  %v7942_v50 = vcombine.high %v571_v29, %v579_v40  ;;  %v7941_v58 = vcombine.low %v571_v29, %v579_v40  ;;  %v7880_v40 = vcombine.high %v508_v28, %v516_v32 }
 0x2f7   : > { %v835_v46 = vld [vmem:[%s9577_s11 + $0xd70] sm:$0xff] }
 0x2f8   : > { %5906 = vmatpush2.bf16.msra.mxu0 %v8021_v59  ;;  %v8198_v51 = vcombine.high %v827_v43, %v835_v46  ;;  %v555_v52 = vld [vmem:[%s9577_s11 + $0x4b0] sm:$0xff]  ;;  %v8197_v59 = vcombine.low %v827_v43, %v835_v46 }
 0x2f9   : > { %5947 = vmatpush2.bf16.msra.mxu1 %v8277_v9  ;;  %5907 = vmatprep.subr.bf16.mxu0 %v8006_v60  ;;  %v563_v55 = vld [vmem:[%s9577_s11 + $0x4f0] sm:$0xff] }
 0x2fa   : > { %5948 = vmatprep.subr.bf16.mxu1 %v8262_v63  ;;  %v811_v56 = vld [vmem:[%s9577_s11 + $0xcb0] sm:$0xff]  ;;  %v7926_v9 = vcombine.high %v555_v52, %v563_v55  ;;  %v7925_v11 = vcombine.low %v555_v52, %v563_v55  ;;  %v7879_v55 = vcombine.low %v508_v28, %v516_v32 }
 0x2fb   : > { %v819_v57 = vld [vmem:[%s9577_s11 + $0xcf0] sm:$0xff] }
 0x2fc   : > { %5908 = vmatpush2.bf16.msra.mxu0 %v8005_v12  ;;  %v8182_v60 = vcombine.high %v811_v56, %v819_v57  ;;  %v539_v63 = vld [vmem:[%s9577_s11 + $0x430] sm:$0xff]  ;;  %v8181_v12 = vcombine.low %v811_v56, %v819_v57 }
 0x2fd   : > { %5949 = vmatpush2.bf16.msra.mxu1 %v8261_v15  ;;  %5909 = vmatprep.subr.bf16.mxu0 %v7990_v17  ;;  %v547_v2 = vld [vmem:[%s9577_s11 + $0x470] sm:$0xff] }
 0x2fe   : > { %5950 = vmatprep.subr.bf16.mxu1 %v8246_v39  ;;  %v795_v3 = vld [vmem:[%s9577_s11 + $0xc30] sm:$0xff]  ;;  %v7910_v15 = vcombine.high %v539_v63, %v547_v2  ;;  %v7909_v22 = vcombine.low %v539_v63, %v547_v2 }
 0x2ff   : > { %v803_v19 = vld [vmem:[%s9577_s11 + $0xc70] sm:$0xff] }
 0x300   : > { %5910 = vmatpush2.bf16.msra.mxu0 %v7989_v24  ;;  %v8166_v17 = vcombine.high %v795_v3, %v803_v19  ;;  %v1035_v39 = vld [vmem:[%s9577_s11 + $0x13b0] sm:$0xff]  ;;  %v8165_v24 = vcombine.low %v795_v3, %v803_v19  ;;  %v476_v3 = vld [vmem:[%s9577_s11 + $0x238] sm:$0xff] }
 0x301   : > { %5951 = vmatpush2.bf16.msra.mxu1 %v8245_v42  ;;  %5911 = vmatprep.subr.bf16.mxu0 %v7974_v25  ;;  %v1043_v20 = vld [vmem:[%s9577_s11 + $0x13f0] sm:$0xff]  ;;  %v10399_v42 = vld [vmem:[%s9583_s9 + $0x8] sm:$0xff] }
 0x302   : > { %5952 = vmatprep.subr.bf16.mxu1 %v8230_v62  ;;  %v8406_v25 = vcombine.high %v1035_v39, %v1043_v20  ;;  %v7896_v62 = vcombine.high %v524_v21, %v532_v6  ;;  %v1019_v26 = vld [vmem:[%s9577_s11 + $0x1330] sm:$0xff]  ;;  %v1216_v29 = vrot.slane %v10399_v42, %v1183_v13  ;;  %v484_v19 = vld [vmem:[%s9577_s11 + $0x278] sm:$0xff] }
 0x303   : > { %v1027_v54 = vld [vmem:[%s9577_s11 + $0x1370] sm:$0xff] }
 0x304   : > { %5912 = vmatpush2.bf16.msra.mxu0 %v7973_v34  ;;  %v1212_v34 = vrot.slane %v10399_v42, %v1179_v7  ;;  %v1003_v43 = vld [vmem:[%s9577_s11 + $0x12b0] sm:$0xff]  ;;  %v8389_v52 = vcombine.low %v1019_v26, %v1027_v54 }
 0x305   : > { %5953 = vmatpush2.bf16.msra.mxu1 %v8229_v5  ;;  %5913 = vmatprep.subr.bf16.mxu0 %v7958_v37  ;;  %v8405_v5 = vcombine.low %v1035_v39, %v1043_v20  ;;  %v7895_v37 = vcombine.low %v524_v21, %v532_v6  ;;  %v1011_v46 = vld [vmem:[%s9577_s11 + $0x12f0] sm:$0xff]  ;;  %v7848_v6 = vcombine.high %v476_v3, %v484_v19 }
 0x306   : > { %5954 = vmatprep.subr.bf16.mxu1 %v8214_v38  ;;  %v8390_v38 = vcombine.high %v1019_v26, %v1027_v54  ;;  %v8374_v56 = vcombine.high %v1003_v43, %v1011_v46  ;;  %v995_v63 = vld [vmem:[%s9577_s11 + $0x1270] sm:$0xff]  ;;  %v7847_v26 = vcombine.low %v476_v3, %v484_v19 }
 0x307   : > { %v955_v32 = vld [vmem:[%s9577_s11 + $0x1130] sm:$0xff] }
 0x308   : > { %5914 = vmatpush2.bf16.msra.mxu0 %v7957_v48  ;;  %v1163_v3 = vld [vmem:[%s9577_s11 + $0x17b0] sm:$0xff] }
 0x309   : > { %5955 = vmatpush2.bf16.msra.mxu1 %v8213_v49  ;;  %5915 = vmatprep.subr.bf16.mxu0 %v7942_v50  ;;  %v492_v49 = vld [vmem:[%s9577_s11 + $0x2b8] sm:$0xff]  ;;  %v1171_v19 = vld [vmem:[%s9577_s11 + $0x17f0] sm:$0xff] }
 0x30a   : > { %5956 = vmatprep.subr.bf16.mxu1 %v8198_v51  ;;  %v500_v50 = vld [vmem:[%s9577_s11 + $0x2f8] sm:$0xff] }
 0x30b   : > { %v7863_v39 = vcombine.low %v492_v49, %v500_v50 }
 0x30c   : > { %5916 = vmatpush2.bf16.msra.mxu0 %v7941_v58 }
 0x30d   : > { %5957 = vmatpush2.bf16.msra.mxu1 %v8197_v59  ;;  %5917 = vmatprep.subr.bf16.mxu0 %v7926_v9  ;;  %v7864_v9 = vcombine.high %v492_v49, %v500_v50  ;;  %v428_v49 = vld [vmem:[%s9577_s11 + $0xb8] sm:$0xff] }
 0x30e   : > { %5958 = vmatprep.subr.bf16.mxu1 %v8182_v60  ;;  %v987_v60 = vld [vmem:[%s9577_s11 + $0x1230] sm:$0xff]  ;;  %v436_v50 = vld [vmem:[%s9577_s11 + $0xf8] sm:$0xff] }
 0x30f   : > { %v8358_v20 = vcombine.high %v987_v60, %v995_v63 }
 0x310   : > { %5918 = vmatpush2.bf16.msra.mxu0 %v7925_v11 }
 0x311   : > { %5959 = vmatpush2.bf16.msra.mxu1 %v8181_v12  ;;  %5919 = vmatprep.subr.bf16.mxu0 %v7910_v15  ;;  %v8373_v15 = vcombine.low %v1003_v43, %v1011_v46  ;;  %v939_v46 = vld [vmem:[%s9577_s11 + $0x10b0] sm:$0xff] }
 0x312   : > { %5960 = vmatprep.subr.bf16.mxu1 %v8166_v17 }
 0x314   : > { %5920 = vmatpush2.bf16.msra.mxu0 %v7909_v22  ;;  %v971_v22 = vld [vmem:[%s9577_s11 + $0x11b0] sm:$0xff] }
 0x315   : > { %5961 = vmatpush2.bf16.msra.mxu1 %v8165_v24  ;;  %5971 = vmatprep.subr.bf16.mxu0 %v8406_v25  ;;  %v460_v24 = vld [vmem:[%s9577_s11 + $0x1b8] sm:$0xff] }
 0x316   : > { %6012 = vmatprep.subr.bf16.mxu1 %v7896_v62  ;;  %v468_v25 = vld [vmem:[%s9577_s11 + $0x1f8] sm:$0xff]  ;;  %v8357_v62 = vcombine.low %v987_v60, %v995_v63  ;;  %v7799_v60 = vcombine.low %v428_v49, %v436_v50 }
 0x317   : > { %v5677_v48 = vpop.f32.mrf.mxu0  ;;  %5922 = vmatmul.mubr.bf16.vlgmr.msra.gmra.mxu0 %v9697_v23  ;;  %v7832_v28 = vcombine.high %v460_v24, %v468_v25 }
 0x318   : > { %v5678_v7 = vadd.f32 %v5677_v48, %v1212_v34  ;;  %v5718_v51 = vpop.f32.mrf.mxu1  ;;  %5963 = vmatmul.mubr.bf16.vlgmr.msra.gmra.mxu1 %v9707_v0  ;;  %5972 = vmatpush1.bf16.msra.mxu0 %v8405_v5  ;;  %v963_v34 = vld [vmem:[%s9577_s11 + $0x1170] sm:$0xff]  ;;  %v444_v5 = vld [vmem:[%s9577_s11 + $0x138] sm:$0xff] }
 0x319   : > { %6013 = vmatpush1.bf16.msra.mxu1 %v7895_v37  ;;  %v5679_v13 = vpop.f32.mrf.mxu0  ;;  %5973 = vmatprep.subr.bf16.mxu0 %v8390_v38  ;;  %v452_v37 = vld [vmem:[%s9577_s11 + $0x178] sm:$0xff]  ;;  %v947_v48 = vld [vmem:[%s9577_s11 + $0x10f0] sm:$0xff] }
 0x31a   : > { %v10417_v57 = vadd.f32 %v5718_v51, %v5678_v7  ;;  %v5680_v58 = vadd.f32 %v5679_v13, %v1216_v29  ;;  %v5720_v59 = vpop.f32.mrf.mxu1  ;;  %6014 = vmatprep.subr.bf16.mxu1 %v7880_v40  ;;  %6003 = vmatprep.mubr.bf16.mxu0 %v9714_v41  ;;  %v7831_v29 = vcombine.low %v460_v24, %v468_v25  ;;  %v644_v24 = vld [vmem:[%s9577_s11 + $0x778] sm:$0xff] }
 0x31b   : > { %v5681_v2 = vpop.f32.mrf.mxu0  ;;  %6044 = vmatprep.mubr.bf16.mxu1 %v9646_v10  ;;  %v979_v10 = vld [vmem:[%s9577_s11 + $0x11f0] sm:$0xff]  ;;  %v8326_v40 = vcombine.high %v955_v32, %v963_v34  ;;  %v7816_v43 = vcombine.high %v444_v5, %v452_v37  ;;  %v8325_v7 = vcombine.low %v955_v32, %v963_v34  ;;  %v7815_v51 = vcombine.low %v444_v5, %v452_v37  ;;  %v620_v34 = vld [vmem:[%s9577_s11 + $0x6b8] sm:$0xff] }
 0x31c   : > { %v10425_v11 = vadd.f32 %v5720_v59, %v5680_v58  ;;  %v5722_v12 = vpop.f32.mrf.mxu1  ;;  %5974 = vmatpush1.bf16.msra.mxu0 %v8389_v52  ;;  %v8342_v54 = vcombine.high %v971_v22, %v979_v10  ;;  %v8341_v38 = vcombine.low %v971_v22, %v979_v10  ;;  %v8310_v52 = vcombine.high %v939_v46, %v947_v48  ;;  %v412_v58 = vld [vmem:[%s9577_s11 + $0x38] sm:$0xff]  ;;  %v1155_v22 = vld [vmem:[%s9577_s11 + $0x1770] sm:$0xff] }
 0x31d   : > { %6015 = vmatpush1.bf16.msra.mxu1 %v7879_v55  ;;  %v5682_v17 = vpop.f32.mrf.mxu0  ;;  %5975 = vmatprep.subr.bf16.mxu0 %v8374_v56  ;;  %v7800_v13 = vcombine.high %v428_v49, %v436_v50  ;;  %v923_v55 = vld [vmem:[%s9577_s11 + $0x1030] sm:$0xff]  ;;  %v420_v59 = vld [vmem:[%s9577_s11 + $0x78] sm:$0xff]  ;;  %v8533_v25 = vcombine.low %v1163_v3, %v1171_v19 }
 0x31e   : > { %v5723_v21 = vpop.f32.mrf.mxu1  ;;  %6016 = vmatprep.subr.bf16.mxu1 %v7864_v9  ;;  %v931_v56 = vld [vmem:[%s9577_s11 + $0x1070] sm:$0xff]  ;;  %v8309_v9 = vcombine.low %v939_v46, %v947_v48  ;;  %v7784_v2 = vcombine.high %v412_v58, %v420_v59  ;;  %v652_v12 = vld [vmem:[%s9577_s11 + $0x7b8] sm:$0xff] }
 0x31f   : > { %v8294_v63 = vcombine.high %v923_v55, %v931_v56  ;;  %v8293_v17 = vcombine.low %v923_v55, %v931_v56  ;;  %v636_v10 = vld [vmem:[%s9577_s11 + $0x738] sm:$0xff]  ;;  %v1139_v32 = vld [vmem:[%s9577_s11 + $0x16f0] sm:$0xff] }
 0x320   : > { %5976 = vmatpush1.bf16.msra.mxu0 %v8373_v15  ;;  %v660_v15 = vld [vmem:[%s9577_s11 + $0x7f8] sm:$0xff]  ;;  %v1123_v46 = vld [vmem:[%s9577_s11 + $0x1670] sm:$0xff] }
 0x321   : > { %6017 = vmatpush1.bf16.msra.mxu1 %v7863_v39  ;;  %5977 = vmatprep.subr.bf16.mxu0 %v8358_v20  ;;  %v7783_v39 = vcombine.low %v412_v58, %v420_v59  ;;  %v8534_v20 = vcombine.high %v1163_v3, %v1171_v19  ;;  %v8024_v21 = vcombine.high %v652_v12, %v660_v15  ;;  %v628_v5 = vld [vmem:[%s9577_s11 + $0x6f8] sm:$0xff]  ;;  %v1107_v55 = vld [vmem:[%s9577_s11 + $0x15f0] sm:$0xff] }
 0x322   : > { %6018 = vmatprep.subr.bf16.mxu1 %v7848_v6  ;;  %v1147_v6 = vld [vmem:[%s9577_s11 + $0x1730] sm:$0xff]  ;;  %v604_v48 = vld [vmem:[%s9577_s11 + $0x638] sm:$0xff] }
 0x323   : > { %v8517_v37 = vcombine.low %v1147_v6, %v1155_v22  ;;  %v612_v49 = vld [vmem:[%s9577_s11 + $0x678] sm:$0xff]  ;;  %v1091_v3 = vld [vmem:[%s9577_s11 + $0x1570] sm:$0xff] }
 0x324   : > { %5978 = vmatpush1.bf16.msra.mxu0 %v8357_v62  ;;  %v8023_v62 = vcombine.low %v652_v12, %v660_v15  ;;  %v588_v56 = vld [vmem:[%s9577_s11 + $0x5b8] sm:$0xff] }
 0x325   : > { %6019 = vmatpush1.bf16.msra.mxu1 %v7847_v26  ;;  %5979 = vmatprep.subr.bf16.mxu0 %v8342_v54  ;;  %v8518_v26 = vcombine.high %v1147_v6, %v1155_v22  ;;  %v8008_v54 = vcombine.high %v636_v10, %v644_v24  ;;  %v596_v58 = vld [vmem:[%s9577_s11 + $0x5f8] sm:$0xff]  ;;  %v1075_v6 = vld [vmem:[%s9577_s11 + $0x14f0] sm:$0xff] }
 0x326   : > { %6020 = vmatprep.subr.bf16.mxu1 %v7832_v28  ;;  %v1131_v28 = vld [vmem:[%s9577_s11 + $0x16b0] sm:$0xff]  ;;  %v572_v19 = vld [vmem:[%s9577_s11 + $0x538] sm:$0xff] }
 0x327   : > { %v8501_v50 = vcombine.low %v1131_v28, %v1139_v32  ;;  %v580_v12 = vld [vmem:[%s9577_s11 + $0x578] sm:$0xff] }
 0x328   : > { %5980 = vmatpush1.bf16.msra.mxu0 %v8341_v38  ;;  %v8007_v38 = vcombine.low %v636_v10, %v644_v24  ;;  %v556_v22 = vld [vmem:[%s9577_s11 + $0x4b8] sm:$0xff] }
 0x329   : > { %6021 = vmatpush1.bf16.msra.mxu1 %v7831_v29  ;;  %5981 = vmatprep.subr.bf16.mxu0 %v8326_v40  ;;  %v8502_v29 = vcombine.high %v1131_v28, %v1139_v32  ;;  %v7992_v40 = vcombine.high %v620_v34, %v628_v5  ;;  %v564_v10 = vld [vmem:[%s9577_s11 + $0x4f8] sm:$0xff]  ;;  %v1059_v28 = vld [vmem:[%s9577_s11 + $0x1470] sm:$0xff] }
 0x32a   : > { %6022 = vmatprep.subr.bf16.mxu1 %v7816_v43  ;;  %v1115_v43 = vld [vmem:[%s9577_s11 + $0x1630] sm:$0xff]  ;;  %v540_v32 = vld [vmem:[%s9577_s11 + $0x438] sm:$0xff] }
 0x32b   : > { %v8485_v59 = vcombine.low %v1115_v43, %v1123_v46 }
 0x32c   : > { %5982 = vmatpush1.bf16.msra.mxu0 %v8325_v7  ;;  %v7991_v7 = vcombine.low %v620_v34, %v628_v5  ;;  %v548_v34 = vld [vmem:[%s9577_s11 + $0x478] sm:$0xff] }
 0x32d   : > { %6023 = vmatpush1.bf16.msra.mxu1 %v7815_v51  ;;  %5983 = vmatprep.subr.bf16.mxu0 %v8310_v52  ;;  %v8486_v51 = vcombine.high %v1115_v43, %v1123_v46  ;;  %v7976_v52 = vcombine.high %v604_v48, %v612_v49  ;;  %v788_v43 = vld [vmem:[%s9577_s11 + $0xbf8] sm:$0xff] }
 0x32e   : > { %6024 = vmatprep.subr.bf16.mxu1 %v7800_v13  ;;  %v1099_v13 = vld [vmem:[%s9577_s11 + $0x15b0] sm:$0xff]  ;;  %v1036_v46 = vld [vmem:[%s9577_s11 + $0x13b8] sm:$0xff] }
 0x32f   : > { %v8469_v15 = vcombine.low %v1099_v13, %v1107_v55 }
 0x330   : > { %5984 = vmatpush1.bf16.msra.mxu0 %v8309_v9  ;;  %v7975_v9 = vcombine.low %v604_v48, %v612_v49  ;;  %v1044_v48 = vld [vmem:[%s9577_s11 + $0x13f8] sm:$0xff] }
 0x331   : > { %6025 = vmatpush1.bf16.msra.mxu1 %v7799_v60  ;;  %5985 = vmatprep.subr.bf16.mxu0 %v8294_v63  ;;  %v8470_v60 = vcombine.high %v1099_v13, %v1107_v55  ;;  %v7960_v63 = vcombine.high %v588_v56, %v596_v58  ;;  %v772_v13 = vld [vmem:[%s9577_s11 + $0xb78] sm:$0xff] }
 0x332   : > { %6026 = vmatprep.subr.bf16.mxu1 %v7784_v2  ;;  %v1083_v2 = vld [vmem:[%s9577_s11 + $0x1530] sm:$0xff]  ;;  %v1020_v55 = vld [vmem:[%s9577_s11 + $0x1338] sm:$0xff] }
 0x333   : > { %v8453_v24 = vcombine.low %v1083_v2, %v1091_v3 }
 0x334   : > { %5986 = vmatpush1.bf16.msra.mxu0 %v8293_v17  ;;  %v7959_v17 = vcombine.low %v588_v56, %v596_v58  ;;  %v1028_v56 = vld [vmem:[%s9577_s11 + $0x1378] sm:$0xff] }
 0x335   : > { %6027 = vmatpush1.bf16.msra.mxu1 %v7783_v39  ;;  %5987 = vmatprep.subr.bf16.mxu0 %v8534_v20  ;;  %v8454_v39 = vcombine.high %v1083_v2, %v1091_v3  ;;  %v7944_v20 = vcombine.high %v572_v19, %v580_v12  ;;  %v748_v2 = vld [vmem:[%s9577_s11 + $0xab8] sm:$0xff] }
 0x336   : > { %6028 = vmatprep.subr.bf16.mxu1 %v8024_v21  ;;  %v1067_v21 = vld [vmem:[%s9577_s11 + $0x14b0] sm:$0xff]  ;;  %v756_v3 = vld [vmem:[%s9577_s11 + $0xaf8] sm:$0xff] }
 0x337   : > { %v8437_v5 = vcombine.low %v1067_v21, %v1075_v6 }
 0x338   : > { %5988 = vmatpush2.bf16.msra.mxu0 %v8533_v25  ;;  %v7943_v25 = vcombine.low %v572_v19, %v580_v12  ;;  %v1224_v12 = vrot.slane %v10399_v42, %v1191_v35  ;;  %v8391_v35 = vcombine.low %v1020_v55, %v1028_v56 }
 0x339   : > { %6029 = vmatpush2.bf16.msra.mxu1 %v8023_v62  ;;  %5989 = vmatprep.subr.bf16.mxu0 %v8518_v26  ;;  %v8438_v62 = vcombine.high %v1067_v21, %v1075_v6  ;;  %v7928_v26 = vcombine.high %v556_v22, %v564_v10 }
 0x33a   : > { %6030 = vmatprep.subr.bf16.mxu1 %v8008_v54  ;;  %v1051_v54 = vld [vmem:[%s9577_s11 + $0x1430] sm:$0xff] }
 0x33b   : > { %v8421_v49 = vcombine.low %v1051_v54, %v1059_v28 }
 0x33c   : > { %5990 = vmatpush2.bf16.msra.mxu0 %v8517_v37  ;;  %v7927_v37 = vcombine.low %v556_v22, %v564_v10 }
 0x33d   : > { %6031 = vmatpush2.bf16.msra.mxu1 %v8007_v38  ;;  %5991 = vmatprep.subr.bf16.mxu0 %v8502_v29  ;;  %v8422_v38 = vcombine.high %v1051_v54, %v1059_v28  ;;  %v7912_v29 = vcombine.high %v540_v32, %v548_v34  ;;  %v996_v54 = vld [vmem:[%s9577_s11 + $0x1278] sm:$0xff]  ;;  %v8119_v28 = vcombine.low %v748_v2, %v756_v3 }
 0x33e   : > { %6032 = vmatprep.subr.bf16.mxu1 %v7992_v40  ;;  %v780_v40 = vld [vmem:[%s9577_s11 + $0xbb8] sm:$0xff] }
 0x33f   : > { %v8151_v58 = vcombine.low %v780_v40, %v788_v43 }
 0x340   : > { %5992 = vmatpush2.bf16.msra.mxu0 %v8501_v50  ;;  %v7911_v50 = vcombine.low %v540_v32, %v548_v34 }
 0x341   : > { %6033 = vmatpush2.bf16.msra.mxu1 %v7991_v7  ;;  %5993 = vmatprep.subr.bf16.mxu0 %v8486_v51  ;;  %v8152_v7 = vcombine.high %v780_v40, %v788_v43  ;;  %v8408_v51 = vcombine.high %v1036_v46, %v1044_v48  ;;  %v972_v40 = vld [vmem:[%s9577_s11 + $0x11b8] sm:$0xff] }
 0x342   : > { %6034 = vmatprep.subr.bf16.mxu1 %v7976_v52  ;;  %v764_v52 = vld [vmem:[%s9577_s11 + $0xb38] sm:$0xff] }
 0x343   : > { %v980_v43 = vld [vmem:[%s9577_s11 + $0x11f8] sm:$0xff] }
 0x344   : > { %5994 = vmatpush2.bf16.msra.mxu0 %v8485_v59  ;;  %v1220_v59 = vrot.slane %v10399_v42, %v1187_v27  ;;  %v8120_v42 = vcombine.high %v748_v2, %v756_v3 }
 0x345   : > { %6035 = vmatpush2.bf16.msra.mxu1 %v7975_v9  ;;  %5995 = vmatprep.subr.bf16.mxu0 %v8470_v60  ;;  %v8407_v9 = vcombine.low %v1036_v46, %v1044_v48  ;;  %v8136_v60 = vcombine.high %v764_v52, %v772_v13 }
 0x346   : > { %6036 = vmatprep.subr.bf16.mxu1 %v7960_v63  ;;  %v8392_v63 = vcombine.high %v1020_v55, %v1028_v56  ;;  %v8343_v55 = vcombine.low %v972_v40, %v980_v43 }
 0x348   : > { %5996 = vmatpush2.bf16.msra.mxu0 %v8469_v15  ;;  %v1004_v15 = vld [vmem:[%s9577_s11 + $0x12b8] sm:$0xff] }
 0x349   : > { %6037 = vmatpush2.bf16.msra.mxu1 %v7959_v17  ;;  %5997 = vmatprep.subr.bf16.mxu0 %v8454_v39  ;;  %v1012_v17 = vld [vmem:[%s9577_s11 + $0x12f8] sm:$0xff] }
 0x34a   : > { %6038 = vmatprep.subr.bf16.mxu1 %v7944_v20  ;;  %v8135_v20 = vcombine.low %v764_v52, %v772_v13  ;;  %v8376_v10 = vcombine.high %v1004_v15, %v1012_v17  ;;  %v8375_v34 = vcombine.low %v1004_v15, %v1012_v17  ;;  %v964_v52 = vld [vmem:[%s9577_s11 + $0x1178] sm:$0xff] }
 0x34b   : > { %v668_v15 = vld [vmem:[%s9577_s11 + $0x838] sm:$0xff] }
 0x34c   : > { %5998 = vmatpush2.bf16.msra.mxu0 %v8453_v24  ;;  %v732_v24 = vld [vmem:[%s9577_s11 + $0xa38] sm:$0xff] }
 0x34d   : > { %6039 = vmatpush2.bf16.msra.mxu1 %v7943_v25  ;;  %5999 = vmatprep.subr.bf16.mxu0 %v8438_v62  ;;  %v740_v25 = vld [vmem:[%s9577_s11 + $0xa78] sm:$0xff] }
 0x34e   : > { %6040 = vmatprep.subr.bf16.mxu1 %v7928_v26  ;;  %v988_v26 = vld [vmem:[%s9577_s11 + $0x1238] sm:$0xff] }
 0x34f   : > { %v8359_v46 = vcombine.low %v988_v26, %v996_v54  ;;  %v676_v17 = vld [vmem:[%s9577_s11 + $0x878] sm:$0xff] }
 0x350   : > { %6000 = vmatpush2.bf16.msra.mxu0 %v8437_v5  ;;  %v8104_v5 = vcombine.high %v732_v24, %v740_v25 }
 0x351   : > { %6041 = vmatpush2.bf16.msra.mxu1 %v7927_v37  ;;  %6001 = vmatprep.subr.bf16.mxu0 %v8422_v38  ;;  %v8360_v37 = vcombine.high %v988_v26, %v996_v54  ;;  %v716_v38 = vld [vmem:[%s9577_s11 + $0x9b8] sm:$0xff]  ;;  %v8039_v26 = vcombine.low %v668_v15, %v676_v17 }
 0x352   : > { %6042 = vmatprep.subr.bf16.mxu1 %v7912_v29  ;;  %v724_v29 = vld [vmem:[%s9577_s11 + $0x9f8] sm:$0xff] }
 0x353   : > { %v8088_v48 = vcombine.high %v716_v38, %v724_v29  ;;  %v8087_v13 = vcombine.low %v716_v38, %v724_v29 }
 0x354   : > { %6002 = vmatpush2.bf16.msra.mxu0 %v8421_v49  ;;  %v8344_v49 = vcombine.high %v972_v40, %v980_v43  ;;  %v876_v43 = vld [vmem:[%s9577_s11 + $0xeb8] sm:$0xff] }
 0x355   : > { %6043 = vmatpush2.bf16.msra.mxu1 %v7911_v50  ;;  %6053 = vmatprep.subr.bf16.mxu0 %v8152_v7  ;;  %v700_v50 = vld [vmem:[%s9577_s11 + $0x938] sm:$0xff] }
 0x356   : > { %6094 = vmatprep.subr.bf16.mxu1 %v8408_v51  ;;  %v708_v7 = vld [vmem:[%s9577_s11 + $0x978] sm:$0xff] }
 0x357   : > { %v5759_v19 = vpop.f32.mrf.mxu0  ;;  %6004 = vmatmul.mubr.bf16.vlgmr.msra.gmra.mxu0 %v9669_v33  ;;  %v956_v51 = vld [vmem:[%s9577_s11 + $0x1138] sm:$0xff]  ;;  %v8072_v56 = vcombine.high %v700_v50, %v708_v7  ;;  %v8071_v2 = vcombine.low %v700_v50, %v708_v7 }
 0x358   : > { %v10495_v39 = vadd.f32 %v5759_v19, %v10417_v57  ;;  %v5800_v27 = vpop.f32.mrf.mxu1  ;;  %6045 = vmatmul.mubr.bf16.vlgmr.msra.gmra.mxu1 %v9697_v23  ;;  %6054 = vmatpush1.bf16.msra.mxu0 %v8151_v58  ;;  %v8328_v58 = vcombine.high %v956_v51, %v964_v52  ;;  %v8327_v3 = vcombine.low %v956_v51, %v964_v52  ;;  %v860_v52 = vld [vmem:[%s9577_s11 + $0xe38] sm:$0xff] }
 0x359   : > { %v10498_v21 = vadd.f32 %v5800_v27, %v1220_v59  ;;  %6095 = vmatpush1.bf16.msra.mxu1 %v8407_v9  ;;  %v5761_v6 = vpop.f32.mrf.mxu0  ;;  %6055 = vmatprep.subr.bf16.mxu0 %v8136_v60  ;;  %v684_v59 = vld [vmem:[%s9577_s11 + $0x8b8] sm:$0xff] }
 0x35a   : > { %v10501_v22 = vadd.f32 %v5761_v6, %v10425_v11  ;;  %v5802_v57 = vpop.f32.mrf.mxu1  ;;  %6096 = vmatprep.subr.bf16.mxu1 %v8392_v63  ;;  %6085 = vmatprep.mubr.bf16.mxu0 %v9653_v14  ;;  %v692_v9 = vld [vmem:[%s9577_s11 + $0x8f8] sm:$0xff] }
 0x35b   : > { %v10506_v23 = vadd.f32 %v5802_v57, %v1224_v12  ;;  %v5763_v62 = vpop.f32.mrf.mxu0  ;;  %6126 = vmatprep.mubr.bf16.mxu1 %v9714_v41  ;;  %v8103_v41 = vcombine.low %v732_v24, %v740_v25  ;;  %v940_v60 = vld [vmem:[%s9577_s11 + $0x10b8] sm:$0xff]  ;;  %v8056_v19 = vcombine.high %v684_v59, %v692_v9  ;;  %v8055_v6 = vcombine.low %v684_v59, %v692_v9 }
 0x35c   : > { %v5804_v11 = vpop.f32.mrf.mxu1  ;;  %6056 = vmatpush1.bf16.msra.mxu0 %v8135_v20  ;;  %v948_v63 = vld [vmem:[%s9577_s11 + $0x10f8] sm:$0xff] }
 0x35d   : > { %6097 = vmatpush1.bf16.msra.mxu1 %v8391_v35  ;;  %v5764_v32 = vpop.f32.mrf.mxu0  ;;  %6057 = vmatprep.subr.bf16.mxu0 %v8120_v42  ;;  %v8312_v12 = vcombine.high %v940_v60, %v948_v63  ;;  %v924_v27 = vld [vmem:[%s9577_s11 + $0x1038] sm:$0xff]  ;;  %v8311_v35 = vcombine.low %v940_v60, %v948_v63  ;;  %v8040_v42 = vcombine.high %v668_v15, %v676_v17 }
 0x35e   : > { %v5805_v14 = vpop.f32.mrf.mxu1  ;;  %6098 = vmatprep.subr.bf16.mxu1 %v8376_v10  ;;  %v932_v20 = vld [vmem:[%s9577_s11 + $0x1078] sm:$0xff] }
 0x35f   : > { %v8296_v57 = vcombine.high %v924_v27, %v932_v20  ;;  %v908_v10 = vld [vmem:[%s9577_s11 + $0xfb8] sm:$0xff]  ;;  %v8295_v54 = vcombine.low %v924_v27, %v932_v20 }
 0x360   : > { %6058 = vmatpush1.bf16.msra.mxu0 %v8119_v28  ;;  %v916_v24 = vld [vmem:[%s9577_s11 + $0xff8] sm:$0xff] }
 0x361   : > { %6099 = vmatpush1.bf16.msra.mxu1 %v8375_v34  ;;  %6059 = vmatprep.subr.bf16.mxu0 %v8104_v5  ;;  %v1164_v25 = vld [vmem:[%s9577_s11 + $0x17b8] sm:$0xff]  ;;  %v8280_v11 = vcombine.high %v908_v10, %v916_v24 }
 0x362   : > { %6100 = vmatprep.subr.bf16.mxu1 %v8360_v37  ;;  %v1172_v62 = vld [vmem:[%s9577_s11 + $0x17f8] sm:$0xff]  ;;  %v8279_v37 = vcombine.low %v908_v10, %v916_v24 }
 0x363   : > { %v8536_v28 = vcombine.high %v1164_v25, %v1172_v62  ;;  %v892_v32 = vld [vmem:[%s9577_s11 + $0xf38] sm:$0xff]  ;;  %v8535_v38 = vcombine.low %v1164_v25, %v1172_v62 }
 0x364   : > { %6060 = vmatpush1.bf16.msra.mxu0 %v8103_v41  ;;  %v900_v34 = vld [vmem:[%s9577_s11 + $0xf78] sm:$0xff] }
 0x365   : > { %6101 = vmatpush1.bf16.msra.mxu1 %v8359_v46  ;;  %6061 = vmatprep.subr.bf16.mxu0 %v8088_v48  ;;  %v1148_v5 = vld [vmem:[%s9577_s11 + $0x1738] sm:$0xff]  ;;  %v8264_v29 = vcombine.high %v892_v32, %v900_v34 }
 0x366   : > { %6102 = vmatprep.subr.bf16.mxu1 %v8344_v49  ;;  %v1156_v14 = vld [vmem:[%s9577_s11 + $0x1778] sm:$0xff]  ;;  %v8263_v49 = vcombine.low %v892_v32, %v900_v34 }
 0x367   : > { %v8520_v40 = vcombine.high %v1148_v5, %v1156_v14  ;;  %v884_v41 = vld [vmem:[%s9577_s11 + $0xef8] sm:$0xff]  ;;  %v8519_v50 = vcombine.low %v1148_v5, %v1156_v14 }
 0x368   : > { %6062 = vmatpush1.bf16.msra.mxu0 %v8087_v13  ;;  %v1132_v46 = vld [vmem:[%s9577_s11 + $0x16b8] sm:$0xff]  ;;  %v8248_v7 = vcombine.high %v876_v43, %v884_v41 }
 0x369   : > { %6103 = vmatpush1.bf16.msra.mxu1 %v8343_v55  ;;  %6063 = vmatprep.subr.bf16.mxu0 %v8072_v56  ;;  %v1140_v48 = vld [vmem:[%s9577_s11 + $0x16f8] sm:$0xff] }
 0x36a   : > { %6104 = vmatprep.subr.bf16.mxu1 %v8328_v58  ;;  %v8504_v51 = vcombine.high %v1132_v46, %v1140_v48  ;;  %v868_v13 = vld [vmem:[%s9577_s11 + $0xe78] sm:$0xff]  ;;  %v8247_v58 = vcombine.low %v876_v43, %v884_v41  ;;  %v8503_v59 = vcombine.low %v1132_v46, %v1140_v48 }
 0x36b   : > { %v1116_v55 = vld [vmem:[%s9577_s11 + $0x1638] sm:$0xff]  ;;  %v8232_v9 = vcombine.high %v860_v52, %v868_v13 }
 0x36c   : > { %6064 = vmatpush1.bf16.msra.mxu0 %v8071_v2  ;;  %v1124_v56 = vld [vmem:[%s9577_s11 + $0x1678] sm:$0xff] }
 0x36d   : > { %6105 = vmatpush1.bf16.msra.mxu1 %v8327_v3  ;;  %6065 = vmatprep.subr.bf16.mxu0 %v8056_v19  ;;  %v8488_v60 = vcombine.high %v1116_v55, %v1124_v56  ;;  %v844_v63 = vld [vmem:[%s9577_s11 + $0xdb8] sm:$0xff]  ;;  %v8487_v15 = vcombine.low %v1116_v55, %v1124_v56  ;;  %v8979_v55 = vld [vmem:[%s9597_s14 + $0xb8] sm:$0xff]   ;;  %v8980_v56 = vld [vmem:[%s9597_s14 + $0x70] sm:$0xff]  }
 0x36e   : > { %6106 = vmatprep.subr.bf16.mxu1 %v8312_v12  ;;  %v852_v2 = vld [vmem:[%s9577_s11 + $0xdf8] sm:$0xff]  ;;  %v8231_v12 = vcombine.low %v860_v52, %v868_v13  ;;  %v6138_v52 = vmax.f32 %v10101_v16, 0.0  ;;  %v8978_v13 = vld [vmem:[%s9597_s14 + $0x38] sm:$0xff]  }
 0x36f   : > { %v1100_v3 = vld [vmem:[%s9577_s11 + $0x15b8] sm:$0xff]  ;;  %v8216_v17 = vcombine.high %v844_v63, %v852_v2 }
 0x370   : > { %6066 = vmatpush1.bf16.msra.mxu0 %v8055_v6  ;;  %v1108_v19 = vld [vmem:[%s9577_s11 + $0x15f8] sm:$0xff] }
 0x371   : > { %6107 = vmatpush1.bf16.msra.mxu1 %v8311_v35  ;;  %6067 = vmatprep.subr.bf16.mxu0 %v8040_v42  ;;  %v8472_v27 = vcombine.high %v1100_v3, %v1108_v19  ;;  %v828_v20 = vld [vmem:[%s9577_s11 + $0xd38] sm:$0xff]  ;;  %v8471_v10 = vcombine.low %v1100_v3, %v1108_v19  ;;  %v8983_v3 = vld [vmem:[%s9597_s14 + $0xb0] sm:$0xff]   ;;  %v8984_v19 = vld [vmem:[%s9597_s14 + $0x68] sm:$0xff]  }
 0x372   : > { %6108 = vmatprep.subr.bf16.mxu1 %v8296_v57  ;;  %v836_v6 = vld [vmem:[%s9577_s11 + $0xd78] sm:$0xff]  ;;  %v8215_v57 = vcombine.low %v844_v63, %v852_v2  ;;  %v8982_v63 = vld [vmem:[%s9597_s14 + $0x30] sm:$0xff]  }
 0x373   : > { %v1084_v35 = vld [vmem:[%s9577_s11 + $0x1538] sm:$0xff]  ;;  %v8200_v24 = vcombine.high %v828_v20, %v836_v6 }
 0x374   : > { %6068 = vmatpush1.bf16.msra.mxu0 %v8039_v26  ;;  %v1092_v42 = vld [vmem:[%s9577_s11 + $0x1578] sm:$0xff] }
 0x375   : > { %6109 = vmatpush1.bf16.msra.mxu1 %v8295_v54  ;;  %6069 = vmatprep.subr.bf16.mxu0 %v8280_v11  ;;  %v8456_v25 = vcombine.high %v1084_v35, %v1092_v42  ;;  %v812_v62 = vld [vmem:[%s9577_s11 + $0xcb8] sm:$0xff]  ;;  %v8455_v32 = vcombine.low %v1084_v35, %v1092_v42 }
 0x376   : > { %6110 = vmatprep.subr.bf16.mxu1 %v8536_v28  ;;  %v820_v26 = vld [vmem:[%s9577_s11 + $0xcf8] sm:$0xff]  ;;  %v8199_v28 = vcombine.low %v828_v20, %v836_v6  ;;  %v8987_v20 = vld [vmem:[%s9597_s14 + $0xa8] sm:$0xff]  }
 0x377   : > { %v1068_v54 = vld [vmem:[%s9577_s11 + $0x14b8] sm:$0xff]  ;;  %v8184_v34 = vcombine.high %v812_v62, %v820_v26 }
 0x378   : > { %6070 = vmatpush2.bf16.msra.mxu0 %v8279_v37  ;;  %v1076_v11 = vld [vmem:[%s9577_s11 + $0x14f8] sm:$0xff] }
 0x379   : > { %6111 = vmatpush2.bf16.msra.mxu1 %v8535_v38  ;;  %6071 = vmatprep.subr.bf16.mxu0 %v8264_v29  ;;  %v8440_v5 = vcombine.high %v1068_v54, %v1076_v11  ;;  %v796_v14 = vld [vmem:[%s9577_s11 + $0xc38] sm:$0xff]  ;;  %v8439_v43 = vcombine.low %v1068_v54, %v1076_v11  ;;  %v8996_v54 = vld [vmem:[%s9597_s14 + $0x50] sm:$0xff]  }
 0x37a   : > { %6112 = vmatprep.subr.bf16.mxu1 %v8520_v40  ;;  %v804_v37 = vld [vmem:[%s9577_s11 + $0xc78] sm:$0xff]  ;;  %v8183_v40 = vcombine.low %v812_v62, %v820_v26  ;;  %v8994_v62 = vld [vmem:[%s9597_s14 + $0x18] sm:$0xff]   ;;  %v8997_v11 = vld [vmem:[%s9597_s14 + $0xd0] sm:$0xff]  }
 0x37b   : > { %v1052_v38 = vld [vmem:[%s9577_s11 + $0x1438] sm:$0xff]  ;;  %v8168_v41 = vcombine.high %v796_v14, %v804_v37  ;;  %v8167_v48 = vcombine.low %v796_v14, %v804_v37  ;;  %v8995_v26 = vld [vmem:[%s9597_s14 + $0x98] sm:$0xff]   ;;  %v9002_v14 = vld [vmem:[%s9597_s14 + $0x8] sm:$0xff]  }
 0x37c   : > { %6072 = vmatpush2.bf16.msra.mxu0 %v8263_v49  ;;  %v1060_v29 = vld [vmem:[%s9577_s11 + $0x1478] sm:$0xff]  ;;  %v9003_v37 = vld [vmem:[%s9597_s14 + $0x88] sm:$0xff]  }
 0x37d   : > { %6113 = vmatpush2.bf16.msra.mxu1 %v8519_v50  ;;  %6073 = vmatprep.subr.bf16.mxu0 %v8248_v7  ;;  %v8424_v46 = vcombine.high %v1052_v38, %v1060_v29  ;;  %v8423_v49 = vcombine.low %v1052_v38, %v1060_v29  ;;  %v8976_v50 = vld [vmem:[%s9597_s14 + $0x78] sm:$0xff]   ;;  %v8988_v6 = vld [vmem:[%s9597_s14 + $0x60] sm:$0xff]  }
 0x37e   : > { %6114 = vmatprep.subr.bf16.mxu1 %v8504_v51  ;;  %v8977_v7 = vld [vmem:[%s9597_s14 + $0xf8] sm:$0xff]   ;;  %v6136_v51 = vmax.f32 %v10011_v18, 0.0  ;;  %v8989_v42 = vld [vmem:[%s9597_s14 + $0xe0] sm:$0xff]  }
 0x37f   : > { %v9004_v38 = vld [vmem:[%s9597_s14 + $0x40] sm:$0xff]  }
 0x380   : > { %6074 = vmatpush2.bf16.msra.mxu0 %v8247_v58  ;;  %v6153_v58 = vpack.c.bf16 %v6136_v51, %v6136_v51  ;;  %v9005_v29 = vld [vmem:[%s9597_s14 + $0xc0] sm:$0xff]   ;;  %v9010_v51 = vld [vmem:[%s9597_s14 + $0x138] sm:$0xff]  }
 0x381   : > { %6115 = vmatpush2.bf16.msra.mxu1 %v8503_v59  ;;  %6075 = vmatprep.subr.bf16.mxu0 %v8232_v9  ;;  %v8981_v9 = vld [vmem:[%s9597_s14 + $0xf0] sm:$0xff]  }
 0x382   : > { %6116 = vmatprep.subr.bf16.mxu1 %v8488_v60  ;;  %v6155_v60 = vpack.c.bf16 %v6138_v52, %v6138_v52 }
 0x384   : > { %6076 = vmatpush2.bf16.msra.mxu0 %v8231_v12 }
 0x385   : > { %6117 = vmatpush2.bf16.msra.mxu1 %v8487_v15  ;;  %6077 = vmatprep.subr.bf16.mxu0 %v8216_v17  ;;  %v8986_v17 = vld [vmem:[%s9597_s14 + $0x28] sm:$0xff]  }
 0x386   : > { %6118 = vmatprep.subr.bf16.mxu1 %v8472_v27 }
 0x388   : > { %6078 = vmatpush2.bf16.msra.mxu0 %v8215_v57  ;;  %v8990_v57 = vld [vmem:[%s9597_s14 + $0x20] sm:$0xff]  }
 0x389   : > { %6119 = vmatpush2.bf16.msra.mxu1 %v8471_v10  ;;  %6079 = vmatprep.subr.bf16.mxu0 %v8200_v24  ;;  %v8991_v10 = vld [vmem:[%s9597_s14 + $0xa0] sm:$0xff]   ;;  %v8992_v24 = vld [vmem:[%s9597_s14 + $0x58] sm:$0xff]  }
 0x38a   : > { %6120 = vmatprep.subr.bf16.mxu1 %v8456_v25  ;;  %v8993_v25 = vld [vmem:[%s9597_s14 + $0xd8] sm:$0xff]  }
 0x38c   : > { %6080 = vmatpush2.bf16.msra.mxu0 %v8199_v28  ;;  %v8998_v28 = vld [vmem:[%s9597_s14 + $0x10] sm:$0xff]  }
 0x38d   : > { %6121 = vmatpush2.bf16.msra.mxu1 %v8455_v32  ;;  %6081 = vmatprep.subr.bf16.mxu0 %v8184_v34  ;;  %v8999_v32 = vld [vmem:[%s9597_s14 + $0x90] sm:$0xff]   ;;  %v9000_v34 = vld [vmem:[%s9597_s14 + $0x48] sm:$0xff]  }
 0x38e   : > { %6122 = vmatprep.subr.bf16.mxu1 %v8440_v5  ;;  %v9001_v5 = vld [vmem:[%s9597_s14 + $0xc8] sm:$0xff]  }
 0x390   : > { %6082 = vmatpush2.bf16.msra.mxu0 %v8183_v40  ;;  %v9006_v40 = vld [vmem:[%s9597_s14] sm:$0xff]  }
 0x391   : > { %6123 = vmatpush2.bf16.msra.mxu1 %v8439_v43  ;;  %6083 = vmatprep.subr.bf16.mxu0 %v8168_v41  ;;  %v6135_v43 = vmax.f32 %v10005_v8, 0.0  ;;  %v9007_v41 = vld [vmem:[%s9597_s14 + $0x80] sm:$0xff]   ;;  %v9011_v8 = vld [vmem:[%s9597_s14 + $0x1b8] sm:$0xff]  }
 0x392   : > { %6124 = vmatprep.subr.bf16.mxu1 %v8424_v46  ;;  %v9008_v46 = vld [vmem:[%s9597_s14 + $0x178] sm:$0xff]  }
 0x393   : > { %v6152_v52 = vpack.c.bf16 %v6135_v43, %v6135_v43  ;;  %v9045_v43 = vld [vmem:[%s9597_s14 + $0x2f0] sm:$0xff]  }
 0x394   : > { %6084 = vmatpush2.bf16.msra.mxu0 %v8167_v48  ;;  %v6137_v48 = vmax.f32 %v10093_v1, 0.0  ;;  %v9012_v1 = vld [vmem:[%s9597_s14 + $0x170] sm:$0xff]  }
 0x395   : > { %6125 = vmatpush2.bf16.msra.mxu1 %v8423_v49  ;;  %8679 = vmatprep.subr.bf16.mxu0 %v8976_v50  ;;  %v9009_v49 = vld [vmem:[%s9597_s14 + $0x1f8] sm:$0xff]   ;;  %v6140_v50 = vmax.f32 %v10254_v4, 0.0 }
 0x396   : > { %8701 = vmatprep.subr.bf16.mxu1 %v8977_v7  ;;  %v6142_v7 = vmax.f32 %v10344_v45, 0.0  ;;  %v9014_v45 = vld [vmem:[%s9597_s14 + $0x130] sm:$0xff]  }
 0x397   : > { %v5841_v59 = vpop.f32.mrf.mxu0  ;;  %6086 = vmatmul.mubr.bf16.vlgmr.msra.gmra.mxu0 %v9707_v0 }
 0x398   : > { %v5842_v18 = vadd.f32 %v5841_v59, %v10498_v21  ;;  %v5882_v16 = vpop.f32.mrf.mxu1  ;;  %6127 = vmatmul.mubr.bf16.vlgmr.msra.gmra.mxu1 %v9669_v33  ;;  %8680 = vmatpush3.bf16.msra.mxu0 %v8978_v13  ;;  %v8985_v33 = vld [vmem:[%s9597_s14 + $0xe8] sm:$0xff]   ;;  %v6154_v13 = vpack.c.bf16 %v6137_v48, %v6137_v48  ;;  %v6159_v4 = vpack.c.bf16 %v6142_v7, %v6142_v7 }
 0x399   : > { %7224 = vmatprep.mubr.bf16.mxu0 %v6153_v58  ;;  %8702 = vmatpush3.bf16.msra.mxu1 %v8979_v55  ;;  %v10571_v2 = vpop.f32.mrf.mxu0  ;;  %v6157_v55 = vpack.c.bf16 %v6140_v50, %v6140_v50  ;;  %v9015_v58 = vld [vmem:[%s9597_s14 + $0x1b0] sm:$0xff]   ;;  %v9016_v59 = vld [vmem:[%s9597_s14 + $0x168] sm:$0xff]  }
 0x39a   : > { %v10575_v0 = vadd.f32 %v5882_v16, %v5842_v18  ;;  %7264 = vmatprep.mubr.bf16.mxu1 %v6155_v60  ;;  %v10577_v12 = vpop.f32.mrf.mxu1  ;;  %8681 = vmatprep.subr.bf16.mxu0 %v8980_v56  ;;  %v9013_v56 = vld [vmem:[%s9597_s14 + $0x1f0] sm:$0xff]   ;;  %v9018_v60 = vld [vmem:[%s9597_s14 + $0x128] sm:$0xff]   ;;  %v9020_v16 = vld [vmem:[%s9597_s14 + $0x160] sm:$0xff]  }
 0x39b   : > { %v5845_v21 = vpop.f32.mrf.mxu0  ;;  %8703 = vmatprep.subr.bf16.mxu1 %v8981_v9  ;;  %v9017_v9 = vld [vmem:[%s9597_s14 + $0x1e8] sm:$0xff]  }
 0x39c   : > { %v5886_v15 = vpop.f32.mrf.mxu1  ;;  %8682 = vmatpush3.bf16.msra.mxu0 %v8982_v63  ;;  %v9019_v18 = vld [vmem:[%s9597_s14 + $0x1a8] sm:$0xff]   ;;  %v9021_v63 = vld [vmem:[%s9597_s14 + $0x1e0] sm:$0xff]   ;;  %v9025_v21 = vld [vmem:[%s9597_s14 + $0x1d8] sm:$0xff]  }
 0x39d   : > { %8704 = vmatpush3.bf16.msra.mxu1 %v8983_v3  ;;  %v5846_v27 = vpop.f32.mrf.mxu0  ;;  %8683 = vmatprep.subr.bf16.mxu0 %v8984_v19  ;;  %v9022_v3 = vld [vmem:[%s9597_s14 + $0x120] sm:$0xff]   ;;  %v9026_v15 = vld [vmem:[%s9597_s14 + $0x118] sm:$0xff]   ;;  %v9048_v50 = vld [vmem:[%s9597_s14 + $0x268] sm:$0xff]  }
 0x39e   : > { %v5887_v35 = vpop.f32.mrf.mxu1  ;;  %8705 = vmatprep.subr.bf16.mxu1 %v8985_v33  ;;  %v9023_v19 = vld [vmem:[%s9597_s14 + $0x1a0] sm:$0xff]   ;;  %v9024_v33 = vld [vmem:[%s9597_s14 + $0x158] sm:$0xff]   ;;  %v9028_v27 = vld [vmem:[%s9597_s14 + $0x150] sm:$0xff]  }
 0x39f   : > { %v9031_v35 = vld [vmem:[%s9597_s14 + $0x190] sm:$0xff]  }
 0x3a0   : > { %8684 = vmatpush3.bf16.msra.mxu0 %v8986_v17  ;;  %v9027_v17 = vld [vmem:[%s9597_s14 + $0x198] sm:$0xff]  }
 0x3a1   : > { %8706 = vmatpush3.bf16.msra.mxu1 %v8987_v20  ;;  %8685 = vmatprep.subr.bf16.mxu0 %v8988_v6  ;;  %v9029_v20 = vld [vmem:[%s9597_s14 + $0x1d0] sm:$0xff]  }
 0x3a2   : > { %8707 = vmatprep.subr.bf16.mxu1 %v8989_v42  ;;  %v9030_v6 = vld [vmem:[%s9597_s14 + $0x110] sm:$0xff]   ;;  %v9032_v42 = vld [vmem:[%s9597_s14 + $0x148] sm:$0xff]  }
 0x3a4   : > { %8686 = vmatpush3.bf16.msra.mxu0 %v8990_v57  ;;  %v9033_v57 = vld [vmem:[%s9597_s14 + $0x1c8] sm:$0xff]  }
 0x3a5   : > { %8708 = vmatpush3.bf16.msra.mxu1 %v8991_v10  ;;  %8687 = vmatprep.subr.bf16.mxu0 %v8992_v24  ;;  %v5844_v10 = vadd.f32 %v10571_v2, %v10506_v23  ;;  %v9034_v24 = vld [vmem:[%s9597_s14 + $0x108] sm:$0xff]   ;;  %v9039_v23 = vld [vmem:[%s9597_s14 + $0x180] sm:$0xff]   ;;  %v9040_v2 = vld [vmem:[%s9597_s14 + $0x278] sm:$0xff]  }
 0x3a6   : > { %8709 = vmatprep.subr.bf16.mxu1 %v8993_v25  ;;  %v9035_v25 = vld [vmem:[%s9597_s14 + $0x188] sm:$0xff]  }
 0x3a8   : > { %8688 = vmatpush3.bf16.msra.mxu0 %v8994_v62  ;;  %v9036_v62 = vld [vmem:[%s9597_s14 + $0x140] sm:$0xff]  }
 0x3a9   : > { %8710 = vmatpush3.bf16.msra.mxu1 %v8995_v26  ;;  %8689 = vmatprep.subr.bf16.mxu0 %v8996_v54  ;;  %v9037_v26 = vld [vmem:[%s9597_s14 + $0x1c0] sm:$0xff]   ;;  %v5885_v54 = vadd.f32 %v10577_v12, %v5844_v10  ;;  %v9042_v12 = vld [vmem:[%s9597_s14 + $0x238] sm:$0xff]  }
 0x3aa   : > { %8711 = vmatprep.subr.bf16.mxu1 %v8997_v11  ;;  %v9038_v11 = vld [vmem:[%s9597_s14 + $0x100] sm:$0xff]   ;;  %v9072_v10 = vld [vmem:[%s9597_s14 + $0x378] sm:$0xff]  }
 0x3ac   : > { %8690 = vmatpush3.bf16.msra.mxu0 %v8998_v28  ;;  %v6139_v28 = vmax.f32 %v10248_v61, 0.0  ;;  %v9043_v61 = vld [vmem:[%s9597_s14 + $0x2b8] sm:$0xff]  }
 0x3ad   : > { %8712 = vmatpush3.bf16.msra.mxu1 %v8999_v32  ;;  %8691 = vmatprep.subr.bf16.mxu0 %v9000_v34  ;;  %v6141_v32 = vmax.f32 %v10336_v31, 0.0  ;;  %v9041_v34 = vld [vmem:[%s9597_s14 + $0x2f8] sm:$0xff]  }
 0x3ae   : > { %8713 = vmatprep.subr.bf16.mxu1 %v9001_v5  ;;  %v6144_v5 = vmax.f32 %v10501_v22, 0.0 }
 0x3b0   : > { %8692 = vmatpush3.bf16.msra.mxu0 %v9002_v14  ;;  %v6146_v14 = vmax.f32 %v5885_v54, 0.0  ;;  %v9074_v54 = vld [vmem:[%s9597_s14 + $0x370] sm:$0xff]  }
 0x3b1   : > { %8714 = vmatpush3.bf16.msra.mxu1 %v9003_v37  ;;  %8693 = vmatprep.subr.bf16.mxu0 %v9004_v38  ;;  %v6156_v37 = vpack.c.bf16 %v6139_v28, %v6139_v28  ;;  %v6158_v38 = vpack.c.bf16 %v6141_v32, %v6141_v32  ;;  %v9090_v28 = vld [vmem:[%s9597_s14 + $0x3f0] sm:$0xff]   ;;  %v9092_v32 = vld [vmem:[%s9597_s14 + $0x3e8] sm:$0xff]  }
 0x3b2   : > { %8715 = vmatprep.subr.bf16.mxu1 %v9005_v29  ;;  %v9044_v29 = vld [vmem:[%s9597_s14 + $0x270] sm:$0xff]   ;;  %v6163_v22 = vpack.c.bf16 %v6146_v14, %v6146_v14  ;;  %v9093_v14 = vld [vmem:[%s9597_s14 + $0x3a8] sm:$0xff]  }
 0x3b4   : > { %8694 = vmatpush3.bf16.msra.mxu0 %v9006_v40  ;;  %v6161_v40 = vpack.c.bf16 %v6144_v5, %v6144_v5  ;;  %v9078_v5 = vld [vmem:[%s9597_s14 + $0x360] sm:$0xff]  }
 0x3b5   : > { %8716 = vmatpush3.bf16.msra.mxu1 %v9007_v41  ;;  %8723 = vmatprep.subr.bf16.mxu0 %v9008_v46  ;;  %v9046_v46 = vld [vmem:[%s9597_s14 + $0x230] sm:$0xff]  }
 0x3b6   : > { %8745 = vmatprep.subr.bf16.mxu1 %v9009_v49  ;;  %v9047_v49 = vld [vmem:[%s9597_s14 + $0x2b0] sm:$0xff]  }
 0x3b7   : > { %7225 = vmatmul.mubr.bf16.vlgmr.msra.gmra.mxu0 %v6152_v52 }
 0x3b8   : > { %7265 = vmatmul.mubr.bf16.vlgmr.msra.gmra.mxu1 %v6154_v13  ;;  %8724 = vmatpush3.bf16.msra.mxu0 %v9010_v51  ;;  %v9049_v51 = vld [vmem:[%s9597_s14 + $0x2e8] sm:$0xff]  }
 0x3b9   : > { %7304 = vmatprep.mubr.bf16.mxu0 %v6157_v55  ;;  %8746 = vmatpush3.bf16.msra.mxu1 %v9011_v8  ;;  %v9050_v13 = vld [vmem:[%s9597_s14 + $0x228] sm:$0xff]  }
 0x3ba   : > { %7344 = vmatprep.mubr.bf16.mxu1 %v6159_v4  ;;  %8725 = vmatprep.subr.bf16.mxu0 %v9012_v1  ;;  %v9051_v55 = vld [vmem:[%s9597_s14 + $0x2a8] sm:$0xff]  }
 0x3bb   : > { %8747 = vmatprep.subr.bf16.mxu1 %v9013_v56  ;;  %v9052_v56 = vld [vmem:[%s9597_s14 + $0x260] sm:$0xff]  }
 0x3bc   : > { %8726 = vmatpush3.bf16.msra.mxu0 %v9014_v45  ;;  %v9053_v45 = vld [vmem:[%s9597_s14 + $0x2e0] sm:$0xff]  }
 0x3bd   : > { %8748 = vmatpush3.bf16.msra.mxu1 %v9015_v58  ;;  %8727 = vmatprep.subr.bf16.mxu0 %v9016_v59  ;;  %v9054_v58 = vld [vmem:[%s9597_s14 + $0x220] sm:$0xff]  }
 0x3be   : > { %8749 = vmatprep.subr.bf16.mxu1 %v9017_v9  ;;  %v9055_v59 = vld [vmem:[%s9597_s14 + $0x2a0] sm:$0xff]   ;;  %v9056_v9 = vld [vmem:[%s9597_s14 + $0x258] sm:$0xff]  }
 0x3c0   : > { %8728 = vmatpush3.bf16.msra.mxu0 %v9018_v60  ;;  %v9057_v60 = vld [vmem:[%s9597_s14 + $0x2d8] sm:$0xff]  }
 0x3c1   : > { %8750 = vmatpush3.bf16.msra.mxu1 %v9019_v18  ;;  %8729 = vmatprep.subr.bf16.mxu0 %v9020_v16  ;;  %v9058_v18 = vld [vmem:[%s9597_s14 + $0x218] sm:$0xff]  }
 0x3c2   : > { %8751 = vmatprep.subr.bf16.mxu1 %v9021_v63  ;;  %v9059_v16 = vld [vmem:[%s9597_s14 + $0x298] sm:$0xff]   ;;  %v9060_v63 = vld [vmem:[%s9597_s14 + $0x250] sm:$0xff]  }
 0x3c4   : > { %8730 = vmatpush3.bf16.msra.mxu0 %v9022_v3  ;;  %v9061_v3 = vld [vmem:[%s9597_s14 + $0x2d0] sm:$0xff]  }
 0x3c5   : > { %8752 = vmatpush3.bf16.msra.mxu1 %v9023_v19  ;;  %8731 = vmatprep.subr.bf16.mxu0 %v9024_v33  ;;  %v9062_v19 = vld [vmem:[%s9597_s14 + $0x210] sm:$0xff]  }
 0x3c6   : > { %8753 = vmatprep.subr.bf16.mxu1 %v9025_v21  ;;  %v9063_v33 = vld [vmem:[%s9597_s14 + $0x290] sm:$0xff]   ;;  %v9064_v21 = vld [vmem:[%s9597_s14 + $0x248] sm:$0xff]  }
 0x3c8   : > { %8732 = vmatpush3.bf16.msra.mxu0 %v9026_v15  ;;  %v9065_v15 = vld [vmem:[%s9597_s14 + $0x2c8] sm:$0xff]  }
 0x3c9   : > { %8754 = vmatpush3.bf16.msra.mxu1 %v9027_v17  ;;  %8733 = vmatprep.subr.bf16.mxu0 %v9028_v27  ;;  %v9066_v17 = vld [vmem:[%s9597_s14 + $0x208] sm:$0xff]  }
 0x3ca   : > { %8755 = vmatprep.subr.bf16.mxu1 %v9029_v20  ;;  %v9067_v27 = vld [vmem:[%s9597_s14 + $0x288] sm:$0xff]   ;;  %v9068_v20 = vld [vmem:[%s9597_s14 + $0x240] sm:$0xff]  }
 0x3cc   : > { %8734 = vmatpush3.bf16.msra.mxu0 %v9030_v6  ;;  %v9069_v6 = vld [vmem:[%s9597_s14 + $0x2c0] sm:$0xff]  }
 0x3cd   : > { %8756 = vmatpush3.bf16.msra.mxu1 %v9031_v35  ;;  %8735 = vmatprep.subr.bf16.mxu0 %v9032_v42  ;;  %v9070_v35 = vld [vmem:[%s9597_s14 + $0x200] sm:$0xff]   ;;  %v6143_v42 = vmax.f32 %v10495_v39, 0.0  ;;  %v9089_v39 = vld [vmem:[%s9597_s14 + $0x3b8] sm:$0xff]  }
 0x3ce   : > { %8757 = vmatprep.subr.bf16.mxu1 %v9033_v57  ;;  %v9071_v57 = vld [vmem:[%s9597_s14 + $0x280] sm:$0xff]  }
 0x3d0   : > { %8736 = vmatpush3.bf16.msra.mxu0 %v9034_v24  ;;  %v6145_v24 = vmax.f32 %v10575_v0, 0.0  ;;  %v9075_v0 = vld [vmem:[%s9597_s14 + $0x330] sm:$0xff]  }
 0x3d1   : > { %8758 = vmatpush3.bf16.msra.mxu1 %v9035_v25  ;;  %8737 = vmatprep.subr.bf16.mxu0 %v9036_v62  ;;  %v9088_v25 = vld [vmem:[%s9597_s14 + $0x3f8] sm:$0xff]  }
 0x3d2   : > { %8759 = vmatprep.subr.bf16.mxu1 %v9037_v26  ;;  %v9073_v62 = vld [vmem:[%s9597_s14 + $0x338] sm:$0xff]   ;;  %v6160_v26 = vpack.c.bf16 %v6143_v42, %v6143_v42 }
 0x3d4   : > { %8738 = vmatpush3.bf16.msra.mxu0 %v9038_v11  ;;  %v6162_v11 = vpack.c.bf16 %v6145_v24, %v6145_v24 }
 0x3d5   : > { %8760 = vmatpush3.bf16.msra.mxu1 %v9039_v23  ;;  %8767 = vmatprep.subr.bf16.mxu0 %v9040_v2  ;;  %v9076_v23 = vld [vmem:[%s9597_s14 + $0x368] sm:$0xff]   ;;  %v9091_v2 = vld [vmem:[%s9597_s14 + $0x3b0] sm:$0xff]  }
 0x3d6   : > { %8789 = vmatprep.subr.bf16.mxu1 %v9041_v34  ;;  %v9077_v34 = vld [vmem:[%s9597_s14 + $0x328] sm:$0xff]  }
 0x3d7   : > { %v10649_v31 = vpop.f32.mrf.mxu0  ;;  %7305 = vmatmul.mubr.bf16.vlgmr.msra.gmra.mxu0 %v6156_v37  ;;  %v9079_v37 = vld [vmem:[%s9597_s14 + $0x320] sm:$0xff]  }
 0x3d8   : > { %v10652_v41 = vpop.f32.mrf.mxu1  ;;  %7345 = vmatmul.mubr.bf16.vlgmr.msra.gmra.mxu1 %v6158_v38  ;;  %8768 = vmatpush3.bf16.msra.mxu0 %v9042_v12  ;;  %v9094_v12 = vld [vmem:[%s9597_s14 + $0x3e0] sm:$0xff]  }
 0x3d9   : > { %7384 = vmatprep.mubr.bf16.mxu0 %v6161_v40  ;;  %8790 = vmatpush3.bf16.msra.mxu1 %v9043_v61  ;;  %v10655_v48 = vpop.f32.mrf.mxu0  ;;  %v9080_v61 = vld [vmem:[%s9597_s14 + $0x358] sm:$0xff]   ;;  %v9095_v38 = vld [vmem:[%s9597_s14 + $0x3a0] sm:$0xff]  }
 0x3da   : > { %7424 = vmatprep.mubr.bf16.mxu1 %v6163_v22  ;;  %v10659_v7 = vpop.f32.mrf.mxu1  ;;  %8769 = vmatprep.subr.bf16.mxu0 %v9044_v29  ;;  %v9096_v29 = vld [vmem:[%s9597_s14 + $0x3d8] sm:$0xff]  }
 0x3db   : > { %v5927_v52 = vpop.f32.mrf.mxu0  ;;  %8791 = vmatprep.subr.bf16.mxu1 %v9045_v43  ;;  %v9081_v40 = vld [vmem:[%s9597_s14 + $0x318] sm:$0xff]   ;;  %v9082_v43 = vld [vmem:[%s9597_s14 + $0x350] sm:$0xff]  }
 0x3dc   : > { %v5968_v8 = vpop.f32.mrf.mxu1  ;;  %8770 = vmatpush3.bf16.msra.mxu0 %v9046_v46  ;;  %v9097_v22 = vld [vmem:[%s9597_s14 + $0x398] sm:$0xff]   ;;  %v9098_v46 = vld [vmem:[%s9597_s14 + $0x3d0] sm:$0xff]   ;;  %v9100_v52 = vld [vmem:[%s9597_s14 + $0x3c8] sm:$0xff]  }
 0x3dd   : > { %8792 = vmatpush3.bf16.msra.mxu1 %v9047_v49  ;;  %v5928_v1 = vpop.f32.mrf.mxu0  ;;  %8771 = vmatprep.subr.bf16.mxu0 %v9048_v50  ;;  %v9083_v49 = vld [vmem:[%s9597_s14 + $0x310] sm:$0xff]   ;;  %v9084_v50 = vld [vmem:[%s9597_s14 + $0x348] sm:$0xff]  }
 0x3de   : > { %v5969_v4 = vpop.f32.mrf.mxu1  ;;  %8793 = vmatprep.subr.bf16.mxu1 %v9049_v51  ;;  %v9099_v51 = vld [vmem:[%s9597_s14 + $0x390] sm:$0xff]   ;;  %v9085_v8 = vld [vmem:[%s9597_s14 + $0x308] sm:$0xff]  }
 0x3df   : > { %v9101_v1 = vld [vmem:[%s9597_s14 + $0x388] sm:$0xff]   ;;  %v9102_v4 = vld [vmem:[%s9597_s14 + $0x3c0] sm:$0xff]  }
 0x3e0   : > { %8772 = vmatpush3.bf16.msra.mxu0 %v9050_v13  ;;  %v9086_v13 = vld [vmem:[%s9597_s14 + $0x340] sm:$0xff]  }
 0x3e1   : > { %8794 = vmatpush3.bf16.msra.mxu1 %v9051_v55  ;;  %8773 = vmatprep.subr.bf16.mxu0 %v9052_v56  ;;  %v9105_v55 = vld [vmem:[%s9583_s9 + $0x8] sm:$0xff] }
 0x3e2   : > { %8795 = vmatprep.subr.bf16.mxu1 %v9053_v45  ;;  %v1228_v56 = vrot.slane %v9105_v55, %v1195_v30  ;;  %v1232_v45 = vrot.slane %v9105_v55, %v1199_v36 }
 0x3e4   : > { %8774 = vmatpush3.bf16.msra.mxu0 %v9054_v58  ;;  %v9087_v58 = vld [vmem:[%s9597_s14 + $0x300] sm:$0xff]  }
 0x3e5   : > { %8796 = vmatpush3.bf16.msra.mxu1 %v9055_v59  ;;  %8775 = vmatprep.subr.bf16.mxu0 %v9056_v9  ;;  %v9103_v59 = vld [vmem:[%s9597_s14 + $0x380] sm:$0xff]   ;;  %v5924_v9 = vadd.f32 %v10649_v31, %v1228_v56 }
 0x3e6   : > { %8797 = vmatprep.subr.bf16.mxu1 %v9057_v60  ;;  %v5926_v60 = vadd.f32 %v10655_v48, %v1232_v45 }
 0x3e8   : > { %8776 = vmatpush3.bf16.msra.mxu0 %v9058_v18  ;;  %v5965_v18 = vadd.f32 %v10652_v41, %v5924_v9  ;;  %v1236_v41 = vrot.slane %v9105_v55, %v1203_v47 }
 0x3e9   : > { %8798 = vmatpush3.bf16.msra.mxu1 %v9059_v16  ;;  %8777 = vmatprep.subr.bf16.mxu0 %v9060_v63  ;;  %v5967_v16 = vadd.f32 %v10659_v7, %v5926_v60  ;;  %v1240_v7 = vrot.slane %v9105_v55, %v1207_v53 }
 0x3ea   : > { %8799 = vmatprep.subr.bf16.mxu1 %v9061_v3 }
 0x3ec   : > { %8778 = vmatpush3.bf16.msra.mxu0 %v9062_v19 }
 0x3ed   : > { %8800 = vmatpush3.bf16.msra.mxu1 %v9063_v33  ;;  %8779 = vmatprep.subr.bf16.mxu0 %v9064_v21 }
 0x3ee   : > { %8801 = vmatprep.subr.bf16.mxu1 %v9065_v15 }
 0x3f0   : > { %8780 = vmatpush3.bf16.msra.mxu0 %v9066_v17 }
 0x3f1   : > { %8802 = vmatpush3.bf16.msra.mxu1 %v9067_v27  ;;  %8781 = vmatprep.subr.bf16.mxu0 %v9068_v20 }
 0x3f2   : > { %8803 = vmatprep.subr.bf16.mxu1 %v9069_v6 }
 0x3f4   : > { %8782 = vmatpush3.bf16.msra.mxu0 %v9070_v35 }
 0x3f5   : > { %8804 = vmatpush3.bf16.msra.mxu1 %v9071_v57  ;;  %8811 = vmatprep.subr.bf16.mxu0 %v9072_v10 }
 0x3f6   : > { %8833 = vmatprep.subr.bf16.mxu1 %v9088_v25 }
 0x3f7   : > { %7385 = vmatmul.mubr.bf16.vlgmr.msra.gmra.mxu0 %v6160_v26 }
 0x3f8   : > { %7425 = vmatmul.mubr.bf16.vlgmr.msra.gmra.mxu1 %v6162_v11  ;;  %8812 = vmatpush3.bf16.msra.mxu0 %v9073_v62 }
 0x3f9   : > { %8813 = vmatprep.subr.bf16.mxu0 %v9074_v54  ;;  %8834 = vmatpush3.bf16.msra.mxu1 %v9089_v39 }
 0x3fa   : > { %8835 = vmatprep.subr.bf16.mxu1 %v9090_v28 }
 0x3fc   : > { %8814 = vmatpush3.bf16.msra.mxu0 %v9075_v0 }
 0x3fd   : > { %8815 = vmatprep.subr.bf16.mxu0 %v9076_v23  ;;  %8836 = vmatpush3.bf16.msra.mxu1 %v9091_v2 }
 0x3fe   : > { %8837 = vmatprep.subr.bf16.mxu1 %v9092_v32 }
 0x400   : > { %8816 = vmatpush3.bf16.msra.mxu0 %v9077_v34 }
 0x401   : > { %8817 = vmatprep.subr.bf16.mxu0 %v9078_v5  ;;  %8838 = vmatpush3.bf16.msra.mxu1 %v9093_v14 }
 0x402   : > { %8839 = vmatprep.subr.bf16.mxu1 %v9094_v12 }
 0x404   : > { %8818 = vmatpush3.bf16.msra.mxu0 %v9079_v37 }
 0x405   : > { %8819 = vmatprep.subr.bf16.mxu0 %v9080_v61  ;;  %8840 = vmatpush3.bf16.msra.mxu1 %v9095_v38 }
 0x406   : > { %8841 = vmatprep.subr.bf16.mxu1 %v9096_v29 }
 0x408   : > { %8820 = vmatpush3.bf16.msra.mxu0 %v9081_v40 }
 0x409   : > { %8821 = vmatprep.subr.bf16.mxu0 %v9082_v43  ;;  %8842 = vmatpush3.bf16.msra.mxu1 %v9097_v22 }
 0x40a   : > { %8843 = vmatprep.subr.bf16.mxu1 %v9098_v46 }
 0x40c   : > { %8822 = vmatpush3.bf16.msra.mxu0 %v9083_v49 }
 0x40d   : > { %8823 = vmatprep.subr.bf16.mxu0 %v9084_v50  ;;  %8844 = vmatpush3.bf16.msra.mxu1 %v9099_v51 }
 0x40e   : > { %8845 = vmatprep.subr.bf16.mxu1 %v9100_v52 }
 0x410   : > { %8824 = vmatpush3.bf16.msra.mxu0 %v9085_v8 }
 0x411   : > { %8825 = vmatprep.subr.bf16.mxu0 %v9086_v13  ;;  %8846 = vmatpush3.bf16.msra.mxu1 %v9101_v1 }
 0x412   : > { %8847 = vmatprep.subr.bf16.mxu1 %v9102_v4 }
 0x414   : > { %8826 = vmatpush3.bf16.msra.mxu0 %v9087_v58 }
 0x415   : > { %8848 = vmatpush3.bf16.msra.mxu1 %v9103_v59 }
 0x417   : > { %v6005_v30 = vpop.f32.mrf.mxu0 }
 0x418   : > { %v6006_v63 = vadd.f32 %v6005_v30, %v5965_v18  ;;  %v6046_v3 = vpop.f32.mrf.mxu1 }
 0x419   : > { %v6007_v36 = vpop.f32.mrf.mxu0  ;;  %v6047_v35 = vadd.f32 %v6046_v3, %v1236_v41  ;;  %v6151_v41 = vld [vmem:[#allocation2] sm:$0x3] }
 0x41a   : > { %v6008_v19 = vadd.f32 %v6007_v36, %v5967_v16  ;;  %v6048_v33 = vpop.f32.mrf.mxu1  ;;  %v6147_v21 = vmax.f32 %v6006_v63, 0.0 }
 0x41b   : > { %v6009_v15 = vpop.f32.mrf.mxu0  ;;  %v6049_v57 = vadd.f32 %v6048_v33, %v1240_v7 }
 0x41c   : > { %v6148_v17 = vmax.f32 %v6008_v19, 0.0  ;;  %v6050_v27 = vpop.f32.mrf.mxu1  ;;  %v6164_v48 = vpack.c.bf16 %v6147_v21, %v6147_v21 }
 0x41d   : > { %v6010_v31 = vpop.f32.mrf.mxu0 }
 0x41e   : > { %v6165_v20 = vpack.c.bf16 %v6148_v17, %v6148_v17  ;;  %v6051_v6 = vpop.f32.mrf.mxu1 }
 0x420   : > { %7464 = vmatprep.mubr.bf16.mxu0 %v6165_v20 }
 0x421   : > { %7465 = vmatmul.mubr.bf16.vlgmr.msra.gmra.mxu0 %v6164_v48 }
 0x457   : > { %v6087_v42 = vpop.f32.mrf.mxu0 }
 0x458   : > { %v6088_v10 = vadd.f32 %v6087_v42, %v6047_v35  ;;  %v6128_v24 = vpop.f32.mrf.mxu1 }
 0x459   : > { %v6089_v25 = vpop.f32.mrf.mxu0 }
 0x45a   : > { %v6129_v62 = vadd.f32 %v6128_v24, %v6088_v10  ;;  %v6090_v26 = vadd.f32 %v6089_v25, %v6049_v57  ;;  %v6130_v54 = vpop.f32.mrf.mxu1 }
 0x45b   : > { %v6091_v39 = vpop.f32.mrf.mxu0 }
 0x45c   : > { %v6131_v11 = vadd.f32 %v6130_v54, %v6090_v26  ;;  %v6132_v28 = vpop.f32.mrf.mxu1  ;;  %v6149_v0 = vmax.f32 %v6129_v62, 0.0 }
 0x45d   : > { %v6092_v23 = vpop.f32.mrf.mxu0 }
 0x45e   : > { %v6150_v2 = vmax.f32 %v6131_v11, 0.0  ;;  %v6133_v32 = vpop.f32.mrf.mxu1  ;;  %v6166_v34 = vpack.c.bf16 %v6149_v0, %v6149_v0 }
 0x460   : > { %v6167_v47 = vpack.c.bf16 %v6150_v2, %v6150_v2 }
 0x462   : > { %7504 = vmatprep.mubr.bf16.mxu1 %v6167_v47 }
 0x463   : > { %7505 = vmatmul.mubr.bf16.vlgmr.msra.gmra.mxu1 %v6166_v34 }
 0x477   : > { %v8695_v44 = vpop.f32.mrf.mxu0 }
 0x478   : > { %v8717_v53 = vpop.f32.mrf.mxu1 }
 0x479   : > { %v8696_v5 = vpop.f32.mrf.mxu0 }
 0x47a   : > { %v8697_v14 = vadd.f32 %v8696_v5, %v8695_v44  ;;  %v8718_v12 = vpop.f32.mrf.mxu1 }
 0x47b   : > { %v8719_v37 = vadd.f32 %v8718_v12, %v8717_v53  ;;  %v8698_v61 = vpop.f32.mrf.mxu0 }
 0x47c   : > { %v8720_v38 = vpop.f32.mrf.mxu1 }
 0x47d   : > { %v7267_v29 = vadd.f32 %v8719_v37, %v8697_v14  ;;  %v8699_v40 = vpop.f32.mrf.mxu0 }
 0x47e   : > { %v8721_v43 = vpop.f32.mrf.mxu1 }
 0x497   : > { %v8739_v22 = vpop.f32.mrf.mxu0 }
 0x498   : > { %v8761_v46 = vpop.f32.mrf.mxu1 }
 0x499   : > { %v8740_v49 = vpop.f32.mrf.mxu0 }
 0x49a   : > { %v8741_v50 = vadd.f32 %v8740_v49, %v8739_v22  ;;  %v8762_v51 = vpop.f32.mrf.mxu1 }
 0x49b   : > { %v8763_v52 = vadd.f32 %v8762_v51, %v8761_v46  ;;  %v8742_v8 = vpop.f32.mrf.mxu0 }
 0x49c   : > { %v7307_v13 = vadd.f32 %v8741_v50, %v7267_v29  ;;  %v8764_v1 = vpop.f32.mrf.mxu1 }
 0x49d   : > { %v8743_v55 = vpop.f32.mrf.mxu0 }
 0x49e   : > { %v7347_v56 = vadd.f32 %v8763_v52, %v7307_v13  ;;  %v8765_v4 = vpop.f32.mrf.mxu1 }
 0x4b7   : > { %v8783_v45 = vpop.f32.mrf.mxu0 }
 0x4b8   : > { %v8805_v58 = vpop.f32.mrf.mxu1 }
 0x4b9   : > { %v8784_v59 = vpop.f32.mrf.mxu0 }
 0x4ba   : > { %v8785_v9 = vadd.f32 %v8784_v59, %v8783_v45  ;;  %v8806_v60 = vpop.f32.mrf.mxu1 }
 0x4bb   : > { %v8807_v18 = vadd.f32 %v8806_v60, %v8805_v58  ;;  %v8786_v30 = vpop.f32.mrf.mxu0 }
 0x4bc   : > { %v7387_v16 = vadd.f32 %v8785_v9, %v7347_v56  ;;  %v8808_v63 = vpop.f32.mrf.mxu1 }
 0x4bd   : > { %v8787_v3 = vpop.f32.mrf.mxu0 }
 0x4be   : > { %v7427_v36 = vadd.f32 %v8807_v18, %v7387_v16  ;;  %v8809_v19 = vpop.f32.mrf.mxu1 }
 0x4e1   : > { %v8827_v33 = vpop.f32.mrf.mxu0 }
 0x4e3   : > { %v8828_v21 = vpop.f32.mrf.mxu0 }
 0x4e4   : > { %v8829_v15 = vadd.f32 %v8828_v21, %v8827_v33 }
 0x4e5   : > { %v8830_v17 = vpop.f32.mrf.mxu0 }
 0x4e6   : > { %v7467_v27 = vadd.f32 %v8829_v15, %v7427_v36 }
 0x4e7   : > { %v8831_v31 = vpop.f32.mrf.mxu0 }
 0x523   : > { %v8849_v20 = vpop.f32.mrf.mxu1 }
 0x525   : > { %v8850_v6 = vpop.f32.mrf.mxu1 }
 0x526   : > { %v8851_v48 = vadd.f32 %v8850_v6, %v8849_v20 }
 0x527   : > { %v8852_v7 = vpop.f32.mrf.mxu1 }
 0x528   : > { %v7507_v35 = vadd.f32 %v8851_v48, %v7467_v27  ;;  %7518 = sbr.rel (%p8665_p7) target bundleno = 1654 (0x676), region = 80 }
 0x529   : > { %v8853_v42 = vpop.f32.mrf.mxu1 }
 0x52a   : > { %v7512_v57 = vadd.f32 %v7507_v35, %v6151_v41 }
 0x52c   : > { %7514 = vst.msk [vmem:[#allocation2] sm:$0x3] %vm7513_vm1, %v7512_v57 }
 0x52d   : > { %v9106_v10 = vld [vmem:[#allocation11 + $0x18] sm:$0xff]   ;;  %v9358_v24 = vmov 0.0   ;;  %v9107_v25 = vld [vmem:[#allocation11 + $0x10] sm:$0xff]   ;;  %vm9359_vm2 = vmmov 0   ;;  %v9108_v62 = vld [vmem:[#allocation11 + $0x8] sm:$0xff]   ;;  %vm7568_vm3 = vcmask 523264  }
 0x52e   : > { %8860 = vmatprep.subr.bf16.mxu0 %v9358_v24  ;;  %8868 = vmatprep.mubr.msk.bf16.mxu0 %vm9359_vm2, %v9358_v24  ;;  %v8666_v54 = vld [vmem:[#allocation9] ss:$0 sm:$0xff]  ;;  %v9109_v11 = vld [vmem:[#allocation11] sm:$0xff]  }
 0x52f   : > { %8861 = vmatpush3.bf16.msra.mxu0 %v9106_v10  ;;  %v8667_v0 = vld [vmem:[#allocation12] ss:$0 sm:$0xff] }
 0x530   : > { %8862 = vmatprep.subr.bf16.mxu0 %v9358_v24 }
 0x533   : > { %8863 = vmatpush3.bf16.msra.mxu0 %v9107_v25  ;;  %v7519_v26 = vld [vmem:[#allocation2] sm:$0x3] }
 0x534   : > { %8864 = vmatprep.subr.bf16.mxu0 %v9358_v24  ;;  %v7527_v39 = vadd.f32 %v8666_v54, %v7519_v26 }
 0x536   : > { %v7528_v28 = vpack.c.bf16 %v7527_v39, %v7527_v39 }
 0x537   : > { %8865 = vmatpush3.bf16.msra.mxu0 %v9108_v62 }
 0x538   : > { %8866 = vmatprep.subr.bf16.mxu0 %v9358_v24 }
 0x53b   : > { %8867 = vmatpush3.bf16.msra.mxu0 %v9109_v11 }
 0x53e   : > { %8869 = vmatmul.mubr.msk.bf16.vlgmr.msra.gmra.mxu0 %vm7568_vm3, %v7528_v28 }
 0x5fe   : > { %v7606_v23 = vpop.f32.mrf.mxu0 }
 0x5ff   : > { %v7607_v2 = vadd.f32 %v8667_v0, %v7606_v23 }
 0x600   : > { %v8870_v32 = vpop.f32.mrf.mxu0 }
 0x601   : > { %7613 = vrot.lane.b32.xlu0 %v7607_v2, %s9360_s22 }
 0x602   : > { %v7609_v47 = vpop.f32.mrf.mxu0 }
 0x604   : > { %v8871_v34 = vpop.f32.mrf.mxu0 }
 0x673   : > { %v7614_v44 = vpop.permute.xlu0 %7613 }
 0x674   : > { %v7616_v53 = vsel %vm7568_vm3, %v7527_v39, %v7614_v44 }
 0x675   : > { %7617 = vst [vmem:[#allocation14] sm:$0x3] %v7616_v53 }
 0x676 PF: > { %p8927_p1 = scmp.eq.s32.totalorder %s9421_s28, 1  ;;  %s9361_s21 = smov [#allocation14]  }
 0x677   : > { %s7625_s8 = sshll.u32 %s9361_s21, 4  ;;  %s7626_s8 = int_to_ptr.vmem [resolvable:$true] %s7625_s8 }
 0x678   : > { %s9270_s20 = scalar_lea.vmem %s7626_s8, 32  ;;  %p9277_p8 = scmp.lt.s32.totalorder %s7626_s8, %s7626_s8 }
 0x679   : > { %p9271_p5 = scmp.ne.s32.totalorder %s7626_s8, %s9270_s20  ;;  %p9278_p10 = scmp.lt.s32.totalorder %s9270_s20, %s9270_s20 }
 0x67b   : > { %p9272_p6 = pnand %p9271_p5, %p8927_p1  ;;  %p9279_p11 = por %p9278_p10, %p9277_p8 }
 0x67d   : > { %p9273_p3 = pneg %p9272_p6 }
 0x67f   : > { %p9280_p0 = pnand %p9279_p11, %p9273_p3 }
 0x681   : > { %9283 = shalt.err (!%p9280_p0)
}
 0x682   : > { %8895 = dma.vmem_to_hbm [thread:$0]  (%p8927_p1), %s7626_s8, 32, %s10764_s7, [#allocation5]  }
 0x683   : > { %9327 = dma.done.wait (%p8927_p1), [#allocation5], 32  }
 0x684   : > { %9329 = vsyncadd (%p8927_p1), [#allocation5], 4294967264 }
 0x685 PF: > { %p21_p4 = scmp.ge.s32.totalorder %s9441_s10, 4   ;;  %s10789_s24 = smov %s9336_s25 }
 0x686   : > { %s10790_s25 = smov %s9340_s26  ;;  %s10791_s26 = smov %s9471_s19 }
 0x687   : > { %s10792_s27 = smov %s9441_s10  ;;  %23 = sbr.rel (!%p21_p4) target bundleno = 7 (0x7), region = 124 }
 0x68c   :  { %7638 = vsyncpa [#allocation4], 1 }
 0x68d   :  { %7640 = vsyncpa [#allocation4 + $0x1], 1 }
 0x68e   :  { %7641 = vsyncpa [#allocation7], 1 }
 0x68f   :  { %7643 = vsyncpa [#allocation7 + $0x1], 1 }
 0x690   :  { %7644 = vsyncpa [#allocation10], 1 }
 0x691   :  { %7645 = vsyncpa [#allocation13], 1 }
 0x692   :  { %7646 = vsyncpa [#allocation5], 1 }
 0x693   :  { %7648 = vsyncpa [#allocation5 + $0x1], 1 }

</bundles_post_ra>
